<compile_context>
chip_gen: v7x
topology: tpu7x:2x2x1
jax: 0.10.0
libtpu: 0.0.40
codegen_flags: <defaults>
</compile_context>

<pallas_src>
import math

import jax
import jax.numpy as jnp
from jax.experimental import pallas as pl
from jax.experimental.pallas import tpu as pltpu

BN_EPS = 1e-5


def _round_up(x, m):
    return (x + m - 1) // m * m


# ----------------------------------------------------------------------------
# Pallas kernels
# ----------------------------------------------------------------------------

def _bn_relu_matmul_kernel(x_ref, s_ref, b_ref, w_ref, o_ref):
    # x: (tm, K) f32, s/b: (1, K) f32, w: (K, N) bf16, o: (tm, N).
    a = jnp.maximum(x_ref[...] * s_ref[...] + b_ref[...], 0.0)
    o_ref[...] = jnp.dot(a.astype(jnp.bfloat16), w_ref[...],
                         preferred_element_type=jnp.float32).astype(o_ref.dtype)


def bn_relu_matmul(x2d, scale, bias, w_bf16, out_dtype=jnp.bfloat16, tm=256):
    """out = relu(x2d * scale + bias) @ w, fused (eval-mode BN + ReLU + 1x1 conv).

    x2d: (M, K) f32; scale/bias: (K,) f32; w_bf16: (K, N) bf16.
    K and N are carried as single full-extent blocks (small in DenseBlock),
    so no padding/slicing copies are needed on those axes.
    """
    M, K = x2d.shape
    K2, N = w_bf16.shape
    assert K == K2
    tm = min(tm, _round_up(M, 8))
    Mp = _round_up(M, tm)
    if Mp != M:
        x2d = jnp.pad(x2d, ((0, Mp - M), (0, 0)))
    out = pl.pallas_call(
        _bn_relu_matmul_kernel,
        out_shape=jax.ShapeDtypeStruct((Mp, N), out_dtype),
        grid_spec=pltpu.PrefetchScalarGridSpec(
            num_scalar_prefetch=0,
            grid=(Mp // tm,),
            in_specs=[pl.BlockSpec((tm, K), lambda i: (i, 0)),
                      pl.BlockSpec((1, K), lambda i: (0, 0)),
                      pl.BlockSpec((1, K), lambda i: (0, 0)),
                      pl.BlockSpec((K, N), lambda i: (0, 0))],
            out_specs=pl.BlockSpec((tm, N), lambda i: (i, 0))),
        compiler_params=pltpu.CompilerParams(
            dimension_semantics=("parallel",)),
    )(x2d, scale.reshape(1, K), bias.reshape(1, K), w_bf16)
    return out[:M] if Mp != M else out


def _matmul_kernel(a_ref, b_ref, o_ref):
    o_ref[...] = jnp.dot(a_ref[...], b_ref[...],
                         preferred_element_type=jnp.float32).astype(o_ref.dtype)


def matmul_bf16(a, b, out_dtype=jnp.float32, tm=256):
    """a: (M, K) bf16, b: (K, N) bf16 -> (M, N); f32 MXU accumulation.

    K (<= ~2k in DenseBlock) is a single full-extent block: no K-loop, no
    accumulator scratch, no K padding.
    """
    M, K = a.shape
    K2, N = b.shape
    assert K == K2
    tm = min(tm, _round_up(M, 8))
    Mp = _round_up(M, tm)
    if Mp != M:
        a = jnp.pad(a, ((0, Mp - M), (0, 0)))
    out = pl.pallas_call(
        _matmul_kernel,
        out_shape=jax.ShapeDtypeStruct((Mp, N), out_dtype),
        grid_spec=pltpu.PrefetchScalarGridSpec(
            num_scalar_prefetch=0,
            grid=(Mp // tm,),
            in_specs=[pl.BlockSpec((tm, K), lambda i: (i, 0)),
                      pl.BlockSpec((K, N), lambda i: (0, 0))],
            out_specs=pl.BlockSpec((tm, N), lambda i: (i, 0))),
        compiler_params=pltpu.CompilerParams(
            dimension_semantics=("parallel",)),
    )(a.astype(jnp.bfloat16), b.astype(jnp.bfloat16))
    return out[:M] if Mp != M else out


# ----------------------------------------------------------------------------
# DenseBlock forward (Pallas hot path + JAX glue)
# ----------------------------------------------------------------------------

def _im2col_3x3(x_nhwc):
    """3x3, stride 1, pad 1 patch extraction: (N,H,W,C) -> (N*H*W, 9*C)."""
    N, H, W, C = x_nhwc.shape
    xp = jnp.pad(x_nhwc, ((0, 0), (1, 1), (1, 1), (0, 0)))
    cols = [xp[:, ky:ky + H, kx:kx + W, :] for ky in range(3) for kx in range(3)]
    return jnp.concatenate(cols, axis=-1).reshape(N * H * W, 9 * C)


def dense_layer_forward(x_nhwc, lp):
    """x: (N,H,W,Cin) f32 -> (N,H,W,Cin+growth) f32."""
    N, H, W, Cin = x_nhwc.shape
    M = N * H * W
    # Fused BN(eval) + ReLU + 1x1 bottleneck conv (one HBM pass over x).
    h1 = bn_relu_matmul(x_nhwc.reshape(M, Cin), lp['scale'], lp['bias'],
                        lp['w1'], out_dtype=jnp.bfloat16)          # (M, Cb) bf16
    Cb = h1.shape[1]
    # 3x3 conv = im2col (bf16) + MXU matmul with f32 accumulation.
    patches = _im2col_3x3(h1.reshape(N, H, W, Cb))                 # (M, 9*Cb) bf16
    h2 = matmul_bf16(patches, lp['w2'], out_dtype=jnp.float32)     # (M, growth)
    g = h2.shape[1]
    # drop_rate == 0.0 in this configuration -> dropout is the identity.
    # TODO(synk): pltpu.prng_seed/prng_random_bits based dropout if drop_rate > 0.
    # TODO(synk): the per-layer concat could be removed by preallocating the
    # block-wide activation and aliasing Pallas outputs into channel slices,
    # but growth=32 slices are not 128-lane aligned, so it is kept in XLA.
    return jnp.concatenate([x_nhwc, h2.reshape(N, H, W, g)], axis=-1)


def dense_block_forward(prepared_layers, x_nchw):
    x = jnp.transpose(x_nchw, (0, 2, 3, 1)).astype(jnp.float32)    # NCHW -> NHWC
    for lp in prepared_layers:
        x = dense_layer_forward(x, lp)
    return jnp.transpose(x, (0, 3, 1, 2))                          # NHWC -> NCHW


# ----------------------------------------------------------------------------
# Parameters (PyTorch layouts) + one-time folding into matmul-ready form
# ----------------------------------------------------------------------------

def init_dense_block_params(key, in_channel, num_layers, growth_rate, bn_size=4):
    """PyTorch-layout parameters for DenseBlock(in_channel, num_layers, ...)."""
    layers = []
    for i in range(num_layers):
        cin = in_channel + i * growth_rate
        cb = bn_size * growth_rate
        key, k1, k2, k3, k4, k5, k6 = jax.random.split(key, 7)
        std1 = math.sqrt(2.0 / (cin * 1 * 1))
        std2 = math.sqrt(2.0 / (cb * 3 * 3))
        layers.append(dict(
            # Fresh PyTorch BatchNorm2d init is gamma=1, beta=0, mean=0, var=1;
            # randomize slightly so the fused BN folding is actually exercised
            # by the correctness check below.
            gamma=1.0 + 0.1 * jax.random.normal(k1, (cin,), jnp.float32),
            beta=0.1 * jax.random.normal(k2, (cin,), jnp.float32),
            mean=0.1 * jax.random.normal(k3, (cin,), jnp.float32),
            var=jax.random.uniform(k4, (cin,), jnp.float32, minval=0.5, maxval=1.5),
            conv1_w=jax.random.normal(k5, (cb, cin, 1, 1), jnp.float32) * std1,
            conv2_w=jax.random.normal(k6, (growth_rate, cb, 3, 3), jnp.float32) * std2,
        ))
    return tuple(layers)


def prepare_params(raw_layers):
    """Fold BN stats and transpose conv weights into bf16 matmul operands (once)."""
    prepared = []
    for p in raw_layers:
        scale = p['gamma'] * jax.lax.rsqrt(p['var'] + BN_EPS)
        bias = p['beta'] - p['mean'] * scale
        cb = p['conv1_w'].shape[0]
        g = p['conv2_w'].shape[0]
        w1 = jnp.transpose(p['conv1_w'][:, :, 0, 0], (1, 0)).astype(jnp.bfloat16)
        w2 = jnp.transpose(p['conv2_w'], (2, 3, 1, 0)).reshape(9 * cb, g)
        prepared.append(dict(scale=scale.astype(jnp.float32),
                             bias=bias.astype(jnp.float32),
                             w1=w1, w2=w2.astype(jnp.bfloat16)))
    return tuple(prepared)


# ----------------------------------------------------------------------------
# Pure-JAX reference (gold standard, f32, highest precision)
# ----------------------------------------------------------------------------

def dense_block_reference(raw_layers, x_nchw):
    x = x_nchw.astype(jnp.float32)
    for p in raw_layers:
        scale = p['gamma'] / jnp.sqrt(p['var'] + BN_EPS)
        bias = p['beta'] - p['mean'] * scale
        h = jnp.maximum(x * scale[None, :, None, None] + bias[None, :, None, None], 0.0)
        h = jax.lax.conv_general_dilated(
            h, p['conv1_w'], (1, 1), 'VALID',
            dimension_numbers=('NCHW', 'OIHW', 'NCHW'),
            precision=jax.lax.Precision.HIGHEST)
        h = jax.lax.conv_general_dilated(
            h, p['conv2_w'], (1, 1), ((1, 1), (1, 1)),
            dimension_numbers=('NCHW', 'OIHW', 'NCHW'),
            precision=jax.lax.Precision.HIGHEST)
        x = jnp.concatenate([x, h], axis=1)
    return x


# ----------------------------------------------------------------------------

if __name__ == "__main__":
    key = jax.random.PRNGKey(0)
    pkey, xkey = jax.random.split(key)

    IN_CH, NUM_LAYERS, GROWTH, BN_SIZE = 64, 4, 32, 4

    raw = init_dense_block_params(pkey, IN_CH, NUM_LAYERS, GROWTH, BN_SIZE)
    prepared = prepare_params(raw)

    # NCHW input, like the PyTorch module.
    x = jax.random.normal(xkey, (2, IN_CH, 16, 16), jnp.float32)

    fwd = jax.jit(dense_block_forward)
    out = fwd(prepared, x)
    jax.block_until_ready(out)

    assert out.shape == (2, IN_CH + NUM_LAYERS * GROWTH, 16, 16), out.shape
    assert bool(jnp.all(jnp.isfinite(out)))

    # Correctness check against the pure-JAX f32 reference (bf16 MXU inputs ->
    # loose tolerance).
    ref = dense_block_reference(raw, x)
    rel_err = float(jnp.max(jnp.abs(out - ref)) / (jnp.max(jnp.abs(ref)) + 1e-6))
    assert rel_err < 5e-2, f"relative error too large: {rel_err}"

    print("KERNEL_OK")
</pallas_src>

<mosaic_0001>
module attributes {stable_mosaic.version = 11 : i64} {
  func.func @_bn_relu_matmul_kernel(%arg0: i32, %arg1: memref<256x64xf32, #tpu.memory_space<vmem>>, %arg2: memref<1x64xf32, #tpu.memory_space<vmem>>, %arg3: memref<1x64xf32, #tpu.memory_space<vmem>>, %arg4: memref<64x128xbf16, #tpu.memory_space<vmem>>, %arg5: memref<256x128xbf16, #tpu.memory_space<vmem>>) attributes {dimension_semantics = [#tpu.dimension_semantics<parallel>], iteration_bounds = array<i64: 2>, scalar_prefetch = 0 : i64, scratch_operands = 0 : i64, tpu.core_type = #tpu.core_type<tc>, window_params = [{transform_indices = @transform_0, window_bounds = array<i64: 256, 64>}, {pipeline_mode = #tpu.pipeline_mode<synchronous>, transform_indices = @transform_1, window_bounds = array<i64: 1, 64>}, {pipeline_mode = #tpu.pipeline_mode<synchronous>, transform_indices = @transform_2, window_bounds = array<i64: 1, 64>}, {pipeline_mode = #tpu.pipeline_mode<synchronous>, transform_indices = @transform_3, window_bounds = array<i64: 64, 128>}, {transform_indices = @transform_4, window_bounds = array<i64: 256, 128>}]} {
    %c0 = arith.constant 0 : index
    %c0_0 = arith.constant 0 : index
    %0 = vector.load %arg1[%c0, %c0_0] : memref<256x64xf32, #tpu.memory_space<vmem>>, vector<256x64xf32>
    %c0_1 = arith.constant 0 : index
    %c0_2 = arith.constant 0 : index
    %1 = vector.load %arg2[%c0_1, %c0_2] : memref<1x64xf32, #tpu.memory_space<vmem>>, vector<1x64xf32>
    %2 = vector.broadcast %1 : vector<1x64xf32> to vector<256x64xf32>
    %3 = arith.mulf %0, %2 : vector<256x64xf32>
    %c0_3 = arith.constant 0 : index
    %c0_4 = arith.constant 0 : index
    %4 = vector.load %arg3[%c0_3, %c0_4] : memref<1x64xf32, #tpu.memory_space<vmem>>, vector<1x64xf32>
    %5 = vector.broadcast %4 : vector<1x64xf32> to vector<256x64xf32>
    %6 = arith.addf %3, %5 : vector<256x64xf32>
    %cst = arith.constant 0.000000e+00 : f32
    %7 = vector.broadcast %cst : f32 to vector<256x64xf32>
    %8 = arith.maximumf %6, %7 : vector<256x64xf32>
    %9 = arith.truncf %8 : vector<256x64xf32> to vector<256x64xbf16>
    %c0_5 = arith.constant 0 : index
    %c0_6 = arith.constant 0 : index
    %10 = vector.load %arg4[%c0_5, %c0_6] : memref<64x128xbf16, #tpu.memory_space<vmem>>, vector<64x128xbf16>
    %cst_7 = arith.constant dense<0.000000e+00> : vector<256x128xf32>
    %11 = tpu.matmul %9, %10, %cst_7 {dimension_numbers = #tpu.dot_dimension_numbers<[1], [0], [0], [1], [0, 0, 1, 1], [], []>} : vector<256x64xbf16>, vector<64x128xbf16>, vector<256x128xf32> -> vector<256x128xf32>
    %12 = arith.truncf %11 : vector<256x128xf32> to vector<256x128xbf16>
    %c0_8 = arith.constant 0 : index
    %c0_9 = arith.constant 0 : index
    %13 = vector.load %arg5[%c0_8, %c0_9] : memref<256x128xbf16, #tpu.memory_space<vmem>>, vector<256x128xbf16>
    tpu.vector_store %arg5[%c0_8, %c0_9], %12 {strides = array<i32>} : memref<256x128xbf16, #tpu.memory_space<vmem>>, vector<256x128xbf16>,
    return
  }
  func.func @transform_0(%arg0: i32) -> (i32, i32) {
    %c0_i32 = arith.constant 0 : i32
    %c0_i32_0 = arith.constant 0 : i32
    return %arg0, %c0_i32 : i32, i32
  }
  func.func @transform_1(%arg0: i32) -> (i32, i32) {
    %c0_i32 = arith.constant 0 : i32
    %c0_i32_0 = arith.constant 0 : i32
    %c0_i32_1 = arith.constant 0 : i32
    return %c0_i32, %c0_i32_0 : i32, i32
  }
  func.func @transform_2(%arg0: i32) -> (i32, i32) {
    %c0_i32 = arith.constant 0 : i32
    %c0_i32_0 = arith.constant 0 : i32
    %c0_i32_1 = arith.constant 0 : i32
    return %c0_i32, %c0_i32_0 : i32, i32
  }
  func.func @transform_3(%arg0: i32) -> (i32, i32) {
    %c0_i32 = arith.constant 0 : i32
    %c0_i32_0 = arith.constant 0 : i32
    %c0_i32_1 = arith.constant 0 : i32
    return %c0_i32, %c0_i32_0 : i32, i32
  }
  func.func @transform_4(%arg0: i32) -> (i32, i32) {
    %c0_i32 = arith.constant 0 : i32
    %c0_i32_0 = arith.constant 0 : i32
    return %arg0, %c0_i32 : i32, i32
  }
}

module attributes {stable_mosaic.version = 11 : i64} {
  func.func @_matmul_kernel(%arg0: i32, %arg1: memref<256x1152xbf16, #tpu.memory_space<vmem>>, %arg2: memref<1152x32xbf16, #tpu.memory_space<vmem>>, %arg3: memref<256x32xf32, #tpu.memory_space<vmem>>) attributes {dimension_semantics = [#tpu.dimension_semantics<parallel>], iteration_bounds = array<i64: 2>, scalar_prefetch = 0 : i64, scratch_operands = 0 : i64, tpu.core_type = #tpu.core_type<tc>, window_params = [{transform_indices = @transform_0, window_bounds = array<i64: 256, 1152>}, {pipeline_mode = #tpu.pipeline_mode<synchronous>, transform_indices = @transform_1, window_bounds = array<i64: 1152, 32>}, {transform_indices = @transform_2, window_bounds = array<i64: 256, 32>}]} {
    %c0 = arith.constant 0 : index
    %c0_0 = arith.constant 0 : index
    %0 = vector.load %arg1[%c0, %c0_0] : memref<256x1152xbf16, #tpu.memory_space<vmem>>, vector<256x1152xbf16>
    %c0_1 = arith.constant 0 : index
    %c0_2 = arith.constant 0 : index
    %1 = vector.load %arg2[%c0_1, %c0_2] : memref<1152x32xbf16, #tpu.memory_space<vmem>>, vector<1152x32xbf16>
    %cst = arith.constant dense<0.000000e+00> : vector<256x32xf32>
    %2 = tpu.matmul %0, %1, %cst {dimension_numbers = #tpu.dot_dimension_numbers<[1], [0], [0], [1], [0, 0, 1, 1], [], []>} : vector<256x1152xbf16>, vector<1152x32xbf16>, vector<256x32xf32> -> vector<256x32xf32>
    %c0_3 = arith.constant 0 : index
    %c0_4 = arith.constant 0 : index
    %3 = vector.load %arg3[%c0_3, %c0_4] : memref<256x32xf32, #tpu.memory_space<vmem>>, vector<256x32xf32>
    tpu.vector_store %arg3[%c0_3, %c0_4], %2 {strides = array<i32>} : memref<256x32xf32, #tpu.memory_space<vmem>>, vector<256x32xf32>,
    return
  }
  func.func @transform_0(%arg0: i32) -> (i32, i32) {
    %c0_i32 = arith.constant 0 : i32
    %c0_i32_0 = arith.constant 0 : i32
    return %arg0, %c0_i32 : i32, i32
  }
  func.func @transform_1(%arg0: i32) -> (i32, i32) {
    %c0_i32 = arith.constant 0 : i32
    %c0_i32_0 = arith.constant 0 : i32
    %c0_i32_1 = arith.constant 0 : i32
    return %c0_i32, %c0_i32_0 : i32, i32
  }
  func.func @transform_2(%arg0: i32) -> (i32, i32) {
    %c0_i32 = arith.constant 0 : i32
    %c0_i32_0 = arith.constant 0 : i32
    return %arg0, %c0_i32 : i32, i32
  }
}

module attributes {stable_mosaic.version = 11 : i64} {
  func.func @_bn_relu_matmul_kernel(%arg0: i32, %arg1: memref<256x96xf32, #tpu.memory_space<vmem>>, %arg2: memref<1x96xf32, #tpu.memory_space<vmem>>, %arg3: memref<1x96xf32, #tpu.memory_space<vmem>>, %arg4: memref<96x128xbf16, #tpu.memory_space<vmem>>, %arg5: memref<256x128xbf16, #tpu.memory_space<vmem>>) attributes {dimension_semantics = [#tpu.dimension_semantics<parallel>], iteration_bounds = array<i64: 2>, scalar_prefetch = 0 : i64, scratch_operands = 0 : i64, tpu.core_type = #tpu.core_type<tc>, window_params = [{transform_indices = @transform_0, window_bounds = array<i64: 256, 96>}, {pipeline_mode = #tpu.pipeline_mode<synchronous>, transform_indices = @transform_1, window_bounds = array<i64: 1, 96>}, {pipeline_mode = #tpu.pipeline_mode<synchronous>, transform_indices = @transform_2, window_bounds = array<i64: 1, 96>}, {pipeline_mode = #tpu.pipeline_mode<synchronous>, transform_indices = @transform_3, window_bounds = array<i64: 96, 128>}, {transform_indices = @transform_4, window_bounds = array<i64: 256, 128>}]} {
    %c0 = arith.constant 0 : index
    %c0_0 = arith.constant 0 : index
    %0 = vector.load %arg1[%c0, %c0_0] : memref<256x96xf32, #tpu.memory_space<vmem>>, vector<256x96xf32>
    %c0_1 = arith.constant 0 : index
    %c0_2 = arith.constant 0 : index
    %1 = vector.load %arg2[%c0_1, %c0_2] : memref<1x96xf32, #tpu.memory_space<vmem>>, vector<1x96xf32>
    %2 = vector.broadcast %1 : vector<1x96xf32> to vector<256x96xf32>
    %3 = arith.mulf %0, %2 : vector<256x96xf32>
    %c0_3 = arith.constant 0 : index
    %c0_4 = arith.constant 0 : index
    %4 = vector.load %arg3[%c0_3, %c0_4] : memref<1x96xf32, #tpu.memory_space<vmem>>, vector<1x96xf32>
    %5 = vector.broadcast %4 : vector<1x96xf32> to vector<256x96xf32>
    %6 = arith.addf %3, %5 : vector<256x96xf32>
    %cst = arith.constant 0.000000e+00 : f32
    %7 = vector.broadcast %cst : f32 to vector<256x96xf32>
    %8 = arith.maximumf %6, %7 : vector<256x96xf32>
    %9 = arith.truncf %8 : vector<256x96xf32> to vector<256x96xbf16>
    %c0_5 = arith.constant 0 : index
    %c0_6 = arith.constant 0 : index
    %10 = vector.load %arg4[%c0_5, %c0_6] : memref<96x128xbf16, #tpu.memory_space<vmem>>, vector<96x128xbf16>
    %cst_7 = arith.constant dense<0.000000e+00> : vector<256x128xf32>
    %11 = tpu.matmul %9, %10, %cst_7 {dimension_numbers = #tpu.dot_dimension_numbers<[1], [0], [0], [1], [0, 0, 1, 1], [], []>} : vector<256x96xbf16>, vector<96x128xbf16>, vector<256x128xf32> -> vector<256x128xf32>
    %12 = arith.truncf %11 : vector<256x128xf32> to vector<256x128xbf16>
    %c0_8 = arith.constant 0 : index
    %c0_9 = arith.constant 0 : index
    %13 = vector.load %arg5[%c0_8, %c0_9] : memref<256x128xbf16, #tpu.memory_space<vmem>>, vector<256x128xbf16>
    tpu.vector_store %arg5[%c0_8, %c0_9], %12 {strides = array<i32>} : memref<256x128xbf16, #tpu.memory_space<vmem>>, vector<256x128xbf16>,
    return
  }
  func.func @transform_0(%arg0: i32) -> (i32, i32) {
    %c0_i32 = arith.constant 0 : i32
    %c0_i32_0 = arith.constant 0 : i32
    return %arg0, %c0_i32 : i32, i32
  }
  func.func @transform_1(%arg0: i32) -> (i32, i32) {
    %c0_i32 = arith.constant 0 : i32
    %c0_i32_0 = arith.constant 0 : i32
    %c0_i32_1 = arith.constant 0 : i32
    return %c0_i32, %c0_i32_0 : i32, i32
  }
  func.func @transform_2(%arg0: i32) -> (i32, i32) {
    %c0_i32 = arith.constant 0 : i32
    %c0_i32_0 = arith.constant 0 : i32
    %c0_i32_1 = arith.constant 0 : i32
    return %c0_i32, %c0_i32_0 : i32, i32
  }
  func.func @transform_3(%arg0: i32) -> (i32, i32) {
    %c0_i32 = arith.constant 0 : i32
    %c0_i32_0 = arith.constant 0 : i32
    %c0_i32_1 = arith.constant 0 : i32
    return %c0_i32, %c0_i32_0 : i32, i32
  }
  func.func @transform_4(%arg0: i32) -> (i32, i32) {
    %c0_i32 = arith.constant 0 : i32
    %c0_i32_0 = arith.constant 0 : i32
    return %arg0, %c0_i32 : i32, i32
  }
}

module attributes {stable_mosaic.version = 11 : i64} {
  func.func @_bn_relu_matmul_kernel(%arg0: i32, %arg1: memref<256x128xf32, #tpu.memory_space<vmem>>, %arg2: memref<1x128xf32, #tpu.memory_space<vmem>>, %arg3: memref<1x128xf32, #tpu.memory_space<vmem>>, %arg4: memref<128x128xbf16, #tpu.memory_space<vmem>>, %arg5: memref<256x128xbf16, #tpu.memory_space<vmem>>) attributes {dimension_semantics = [#tpu.dimension_semantics<parallel>], iteration_bounds = array<i64: 2>, scalar_prefetch = 0 : i64, scratch_operands = 0 : i64, tpu.core_type = #tpu.core_type<tc>, window_params = [{transform_indices = @transform_0, window_bounds = array<i64: 256, 128>}, {pipeline_mode = #tpu.pipeline_mode<synchronous>, transform_indices = @transform_1, window_bounds = array<i64: 1, 128>}, {pipeline_mode = #tpu.pipeline_mode<synchronous>, transform_indices = @transform_2, window_bounds = array<i64: 1, 128>}, {pipeline_mode = #tpu.pipeline_mode<synchronous>, transform_indices = @transform_3, window_bounds = array<i64: 128, 128>}, {transform_indices = @transform_4, window_bounds = array<i64: 256, 128>}]} {
    %c0 = arith.constant 0 : index
    %c0_0 = arith.constant 0 : index
    %0 = vector.load %arg1[%c0, %c0_0] : memref<256x128xf32, #tpu.memory_space<vmem>>, vector<256x128xf32>
    %c0_1 = arith.constant 0 : index
    %c0_2 = arith.constant 0 : index
    %1 = vector.load %arg2[%c0_1, %c0_2] : memref<1x128xf32, #tpu.memory_space<vmem>>, vector<1x128xf32>
    %2 = vector.broadcast %1 : vector<1x128xf32> to vector<256x128xf32>
    %3 = arith.mulf %0, %2 : vector<256x128xf32>
    %c0_3 = arith.constant 0 : index
    %c0_4 = arith.constant 0 : index
    %4 = vector.load %arg3[%c0_3, %c0_4] : memref<1x128xf32, #tpu.memory_space<vmem>>, vector<1x128xf32>
    %5 = vector.broadcast %4 : vector<1x128xf32> to vector<256x128xf32>
    %6 = arith.addf %3, %5 : vector<256x128xf32>
    %cst = arith.constant 0.000000e+00 : f32
    %7 = vector.broadcast %cst : f32 to vector<256x128xf32>
    %8 = arith.maximumf %6, %7 : vector<256x128xf32>
    %9 = arith.truncf %8 : vector<256x128xf32> to vector<256x128xbf16>
    %c0_5 = arith.constant 0 : index
    %c0_6 = arith.constant 0 : index
    %10 = vector.load %arg4[%c0_5, %c0_6] : memref<128x128xbf16, #tpu.memory_space<vmem>>, vector<128x128xbf16>
    %cst_7 = arith.constant dense<0.000000e+00> : vector<256x128xf32>
    %11 = tpu.matmul %9, %10, %cst_7 {dimension_numbers = #tpu.dot_dimension_numbers<[1], [0], [0], [1], [0, 0, 1, 1], [], []>} : vector<256x128xbf16>, vector<128x128xbf16>, vector<256x128xf32> -> vector<256x128xf32>
    %12 = arith.truncf %11 : vector<256x128xf32> to vector<256x128xbf16>
    %c0_8 = arith.constant 0 : index
    %c0_9 = arith.constant 0 : index
    %13 = vector.load %arg5[%c0_8, %c0_9] : memref<256x128xbf16, #tpu.memory_space<vmem>>, vector<256x128xbf16>
    tpu.vector_store %arg5[%c0_8, %c0_9], %12 {strides = array<i32>} : memref<256x128xbf16, #tpu.memory_space<vmem>>, vector<256x128xbf16>,
    return
  }
  func.func @transform_0(%arg0: i32) -> (i32, i32) {
    %c0_i32 = arith.constant 0 : i32
    %c0_i32_0 = arith.constant 0 : i32
    return %arg0, %c0_i32 : i32, i32
  }
  func.func @transform_1(%arg0: i32) -> (i32, i32) {
    %c0_i32 = arith.constant 0 : i32
    %c0_i32_0 = arith.constant 0 : i32
    %c0_i32_1 = arith.constant 0 : i32
    return %c0_i32, %c0_i32_0 : i32, i32
  }
  func.func @transform_2(%arg0: i32) -> (i32, i32) {
    %c0_i32 = arith.constant 0 : i32
    %c0_i32_0 = arith.constant 0 : i32
    %c0_i32_1 = arith.constant 0 : i32
    return %c0_i32, %c0_i32_0 : i32, i32
  }
  func.func @transform_3(%arg0: i32) -> (i32, i32) {
    %c0_i32 = arith.constant 0 : i32
    %c0_i32_0 = arith.constant 0 : i32
    %c0_i32_1 = arith.constant 0 : i32
    return %c0_i32, %c0_i32_0 : i32, i32
  }
  func.func @transform_4(%arg0: i32) -> (i32, i32) {
    %c0_i32 = arith.constant 0 : i32
    %c0_i32_0 = arith.constant 0 : i32
    return %arg0, %c0_i32 : i32, i32
  }
}

module attributes {stable_mosaic.version = 11 : i64} {
  func.func @_bn_relu_matmul_kernel(%arg0: i32, %arg1: memref<256x160xf32, #tpu.memory_space<vmem>>, %arg2: memref<1x160xf32, #tpu.memory_space<vmem>>, %arg3: memref<1x160xf32, #tpu.memory_space<vmem>>, %arg4: memref<160x128xbf16, #tpu.memory_space<vmem>>, %arg5: memref<256x128xbf16, #tpu.memory_space<vmem>>) attributes {dimension_semantics = [#tpu.dimension_semantics<parallel>], iteration_bounds = array<i64: 2>, scalar_prefetch = 0 : i64, scratch_operands = 0 : i64, tpu.core_type = #tpu.core_type<tc>, window_params = [{transform_indices = @transform_0, window_bounds = array<i64: 256, 160>}, {pipeline_mode = #tpu.pipeline_mode<synchronous>, transform_indices = @transform_1, window_bounds = array<i64: 1, 160>}, {pipeline_mode = #tpu.pipeline_mode<synchronous>, transform_indices = @transform_2, window_bounds = array<i64: 1, 160>}, {pipeline_mode = #tpu.pipeline_mode<synchronous>, transform_indices = @transform_3, window_bounds = array<i64: 160, 128>}, {transform_indices = @transform_4, window_bounds = array<i64: 256, 128>}]} {
    %c0 = arith.constant 0 : index
    %c0_0 = arith.constant 0 : index
    %0 = vector.load %arg1[%c0, %c0_0] : memref<256x160xf32, #tpu.memory_space<vmem>>, vector<256x160xf32>
    %c0_1 = arith.constant 0 : index
    %c0_2 = arith.constant 0 : index
    %1 = vector.load %arg2[%c0_1, %c0_2] : memref<1x160xf32, #tpu.memory_space<vmem>>, vector<1x160xf32>
    %2 = vector.broadcast %1 : vector<1x160xf32> to vector<256x160xf32>
    %3 = arith.mulf %0, %2 : vector<256x160xf32>
    %c0_3 = arith.constant 0 : index
    %c0_4 = arith.constant 0 : index
    %4 = vector.load %arg3[%c0_3, %c0_4] : memref<1x160xf32, #tpu.memory_space<vmem>>, vector<1x160xf32>
    %5 = vector.broadcast %4 : vector<1x160xf32> to vector<256x160xf32>
    %6 = arith.addf %3, %5 : vector<256x160xf32>
    %cst = arith.constant 0.000000e+00 : f32
    %7 = vector.broadcast %cst : f32 to vector<256x160xf32>
    %8 = arith.maximumf %6, %7 : vector<256x160xf32>
    %9 = arith.truncf %8 : vector<256x160xf32> to vector<256x160xbf16>
    %c0_5 = arith.constant 0 : index
    %c0_6 = arith.constant 0 : index
    %10 = vector.load %arg4[%c0_5, %c0_6] : memref<160x128xbf16, #tpu.memory_space<vmem>>, vector<160x128xbf16>
    %cst_7 = arith.constant dense<0.000000e+00> : vector<256x128xf32>
    %11 = tpu.matmul %9, %10, %cst_7 {dimension_numbers = #tpu.dot_dimension_numbers<[1], [0], [0], [1], [0, 0, 1, 1], [], []>} : vector<256x160xbf16>, vector<160x128xbf16>, vector<256x128xf32> -> vector<256x128xf32>
    %12 = arith.truncf %11 : vector<256x128xf32> to vector<256x128xbf16>
    %c0_8 = arith.constant 0 : index
    %c0_9 = arith.constant 0 : index
    %13 = vector.load %arg5[%c0_8, %c0_9] : memref<256x128xbf16, #tpu.memory_space<vmem>>, vector<256x128xbf16>
    tpu.vector_store %arg5[%c0_8, %c0_9], %12 {strides = array<i32>} : memref<256x128xbf16, #tpu.memory_space<vmem>>, vector<256x128xbf16>,
    return
  }
  func.func @transform_0(%arg0: i32) -> (i32, i32) {
    %c0_i32 = arith.constant 0 : i32
    %c0_i32_0 = arith.constant 0 : i32
    return %arg0, %c0_i32 : i32, i32
  }
  func.func @transform_1(%arg0: i32) -> (i32, i32) {
    %c0_i32 = arith.constant 0 : i32
    %c0_i32_0 = arith.constant 0 : i32
    %c0_i32_1 = arith.constant 0 : i32
    return %c0_i32, %c0_i32_0 : i32, i32
  }
  func.func @transform_2(%arg0: i32) -> (i32, i32) {
    %c0_i32 = arith.constant 0 : i32
    %c0_i32_0 = arith.constant 0 : i32
    %c0_i32_1 = arith.constant 0 : i32
    return %c0_i32, %c0_i32_0 : i32, i32
  }
  func.func @transform_3(%arg0: i32) -> (i32, i32) {
    %c0_i32 = arith.constant 0 : i32
    %c0_i32_0 = arith.constant 0 : i32
    %c0_i32_1 = arith.constant 0 : i32
    return %c0_i32, %c0_i32_0 : i32, i32
  }
  func.func @transform_4(%arg0: i32) -> (i32, i32) {
    %c0_i32 = arith.constant 0 : i32
    %c0_i32_0 = arith.constant 0 : i32
    return %arg0, %c0_i32 : i32, i32
  }
}

</mosaic_0001>

<bundles_post_ra>
// kernel: dense_block_forward.8
= control target key start
LH: loop header
LB: loop body
LE: loop exit
PB: predicated region body
PF: predicated region fallthrough
CT: control target
= control target key end

     0   :  { %9 = vsyncpa [#allocation3], 0  ;;  %s1799_s0 = inlined_call_operand.hbm [shape: f32[512,64], index: 0, kind: input, shape index: {}]   ;;  %s1800_s1 = inlined_call_operand.hbm [shape: f32[1,64], index: 1, kind: input, shape index: {}]   ;;  %s1801_s2 = inlined_call_operand.hbm [shape: f32[1,64], index: 2, kind: input, shape index: {}]   ;;  %s1802_s3 = inlined_call_operand.hbm [shape: bf16[64,128], index: 3, kind: input, shape index: {}]   ;;  %s1803_s4 = inlined_call_operand.vmem [shape: bf16[512,128], index: 4, kind: output, shape index: {}]  }
   0x1   :  { %11 = vsyncpa [#allocation3 + $0x1], 0 }
   0x2   :  { %12 = vsyncpa [#allocation5], 0 }
   0x3   :  { %13 = vsyncpa [#allocation8], 0  ;;  %s1455_s15 = smov 0   ;;  %s1457_s16 = smov 0  }
   0x4   :  { %s1459_s17 = smov 0   ;;  %s1461_s18 = smov 0  }
   0x5 LB: > { %s917_s19 = sadd.s32 4294967295, %s1420_s18   ;;  %p39_p0 = scmp.ne.s32.totalorder %s1412_s16, %s1408_s15  ;;  %s1420_s18 = sphi %s1461_s18, %s1820_s18   ;;  %s1416_s17 = sphi %s1459_s17, %s1819_s17   ;;  %s1412_s16 = sphi %s1457_s16, %s1818_s16   ;;  %s1408_s15 = sphi %s1455_s15, %s1817_s15  }
   0x6   : > { %p1477_p1 = scmp.eq.s32.totalorder %s917_s19, 0  ;;  %p919_p2 = scmp.ge.s32.totalorder %s1420_s18, 1 }
   0x7   : > { %p139_p3 = scmp.lt.s32.totalorder %s1420_s18, 3  ;;  %s1422_s23 = smov [#allocation4]  }
   0x8   : > { %s1808_s20 = scalar_select %p1477_p1, 1, 0 }
   0x9   : > { %p1485_p4 = por %p1477_p1, %p39_p0  ;;  %p1489_p5 = pnand %p919_p2, %p139_p3 }
   0xa   : > { %s152_s24 = sshll.u32 %s1422_s23, 4  ;;  %s1423_s25 = smov [#allocation6]   ;;  %s153_s24 = int_to_ptr.vmem [resolvable:$true] %s152_s24 }
   0xb   : > { %s1809_s21 = scalar_select %p1485_p4, 1, 0 }
   0xc   : > { %s1810_s22 = scalar_select %p1489_p5, 1, 0 }
   0xd   : > { %p1200_p6 = pneg %p1489_p5  ;;  %s163_s26 = sshll.u32 %s1423_s25, 4  ;;  %s1501_s26 = int_to_ptr.vmem [resolvable:$true] %s163_s26 }
   0xe   : > { %s1424_s28 = smov [#allocation7]   ;;  %s1264_s6 = scalar_lea.hbm %s1800_s1, 16 }
   0xf   : > { %p1497_p7 = pnand %p1200_p6, %p1477_p1  ;;  %s173_s29 = sshll.u32 %s1424_s28, 4  ;;  %s1503_s29 = int_to_ptr.vmem [resolvable:$true] %s173_s29 }
  0x10   : > { %p1265_p8 = scmp.ne.s32.totalorder %s1800_s1, %s1264_s6  ;;  %p1271_p12 = scmp.lt.u32.totalorder %s1264_s6, %s1800_s1 }
  0x11   : > { %p1513_p9 = pneg %p1497_p7 }
  0x13   : > { %p1267_p10 = pnand %p1513_p9, %p1265_p8 }
  0x15   : > { %p1268_p11 = pneg %p1267_p10 }
  0x17   : > { %p1273_p13 = pnand %p1271_p12, %p1268_p11 }
  0x19   : > { %1276 = shalt.err (!%p1273_p13)
}
  0x1a   : > { %s1277_s12 = scalar_lea.vmem %s153_s24, 16  ;;  %s1284_s13 = scalar_lea.vmem %s153_s24, 32 }
  0x1b   : > { %p1278_p0 = scmp.ne.s32.totalorder %s153_s24, %s1277_s12  ;;  %p1285_p6 = scmp.lt.s32.totalorder %s153_s24, %s153_s24 }
  0x1c   : > { %p1286_p1 = scmp.lt.s32.totalorder %s1284_s13, %s1277_s12 }
  0x1d   : > { %p1280_p2 = pnand %p1278_p0, %p1513_p9 }
  0x1e   : > { %p1287_p4 = por %p1286_p1, %p1285_p6 }
  0x1f   : > { %p1281_p3 = pneg %p1280_p2 }
  0x21   : > { %p1288_p5 = pnand %p1287_p4, %p1281_p3 }
  0x23   : > { %1291 = shalt.err (!%p1288_p5)
}
  0x24   : > { %1203 = dma.hbm_to_vmem [thread:$0]  (!%p1497_p7), %s1800_s1, 16, %s153_s24, [#allocation5]  }
  0x25   : > { %s1292_s28 = scalar_lea.hbm %s1801_s2, 16 }
  0x26   : > { %p1293_p8 = scmp.ne.s32.totalorder %s1801_s2, %s1292_s28  ;;  %p1299_p4 = scmp.lt.u32.totalorder %s1292_s28, %s1801_s2 }
  0x28   : > { %p1295_p10 = pnand %p1293_p8, %p1513_p9 }
  0x2a   : > { %p1296_p1 = pneg %p1295_p10 }
  0x2c   : > { %p1301_p5 = pnand %p1299_p4, %p1296_p1 }
  0x2e   : > { %1304 = shalt.err (!%p1301_p5)
}
  0x2f   : > { %s1305_s24 = scalar_lea.vmem %s1501_s26, 16  ;;  %s1312_s8 = scalar_lea.vmem %s1501_s26, 32 }
  0x30   : > { %p1306_p11 = scmp.ne.s32.totalorder %s1501_s26, %s1305_s24  ;;  %p1313_p0 = scmp.lt.s32.totalorder %s1501_s26, %s1501_s26 }
  0x31   : > { %p1314_p2 = scmp.lt.s32.totalorder %s1312_s8, %s1305_s24 }
  0x32   : > { %p1308_p12 = pnand %p1306_p11, %p1513_p9 }
  0x33   : > { %p1315_p3 = por %p1314_p2, %p1313_p0 }
  0x34   : > { %p1309_p13 = pneg %p1308_p12 }
  0x36   : > { %p1316_p6 = pnand %p1315_p3, %p1309_p13 }
  0x38   : > { %1319 = shalt.err (!%p1316_p6)
}
  0x39   : > { %1206 = dma.hbm_to_vmem [thread:$0]  (!%p1497_p7), %s1801_s2, 16, %s1501_s26, [#allocation5]  }
  0x3a   : > { %s1320_s14 = scalar_lea.hbm %s1802_s3, 512 }
  0x3b   : > { %p1321_p8 = scmp.ne.s32.totalorder %s1802_s3, %s1320_s14  ;;  %p1327_p4 = scmp.lt.u32.totalorder %s1320_s14, %s1802_s3 }
  0x3d   : > { %p1323_p10 = pnand %p1321_p8, %p1513_p9 }
  0x3f   : > { %p1324_p1 = pneg %p1323_p10 }
  0x41   : > { %p1329_p5 = pnand %p1327_p4, %p1324_p1 }
  0x43   : > { %1332 = shalt.err (!%p1329_p5)
}
  0x44   : > { %s1333_s26 = scalar_lea.vmem %s1503_s29, 512  ;;  %p1341_p0 = scmp.lt.s32.totalorder %s1503_s29, %s1503_s29 }
  0x45   : > { %p1334_p11 = scmp.ne.s32.totalorder %s1503_s29, %s1333_s26  ;;  %p1342_p2 = scmp.lt.s32.totalorder %s1333_s26, %s1333_s26 }
  0x47   : > { %p1336_p12 = pnand %p1334_p11, %p1513_p9  ;;  %p1343_p3 = por %p1342_p2, %p1341_p0 }
  0x49   : > { %p1337_p13 = pneg %p1336_p12 }
  0x4b   : > { %p1344_p6 = pnand %p1343_p3, %p1337_p13 }
  0x4d   : > { %1347 = shalt.err (!%p1344_p6)
}
  0x4e   : > { %s1425_s30 = smov 64   ;;  %s1426_s9 = smov 4  }
  0x4f   : > { %1209 = dma.hbm_to_vmem [thread:$0]  (!%p1497_p7), %s1802_s3, 512, %s1503_s29, [#allocation8], %s1425_s30, %s1425_s30, %s1426_s9  }
  0x50   : > { %s1577_s7 = sadd.s32 1, %s1420_s18   ;;  %s26_s8 = sadd.s32 1, %s1416_s17 }
  0x51   : > { %s23_s24 = ssub.s32 %s1420_s18, %s1577_s7  ;;  %p33_p8 = scmp.ne.s32.totalorder %s1416_s17, %s1412_s16 }
  0x52   : > { %p24_p9 = scmp.eq.s32.totalorder %s23_s24, 0  ;;  %p34_p10 = scmp.eq.s32.totalorder %s1420_s18, 0 }
  0x53   : > { %p1217_p1 = scmp.lt.s32.totalorder %s1420_s18, 2  ;;  %s187_s11 = sand.u32 1, %s1416_s17  }
  0x54   : > { %s1587_s10 = scalar_select %p24_p9, %s1416_s17, %s26_s8  }
  0x55   : > { %p35_p4 = por %p34_p10, %p33_p8  ;;  %s924_s12 = sshll.u32 %s187_s11, 8 }
  0x56   : > { %s990_s13 = sshll.u32 %s1420_s18, 12  ;;  %s191_s29 = scalar_lea.vmem [#allocation2], %s924_s12 }
  0x57   : > { %s1594_s15 = scalar_lea.hbm %s1799_s0, %s990_s13  ;;  %s198_s23 = sshll.u32 %s191_s29, 4  ;;  %s1596_s23 = int_to_ptr.vmem [resolvable:$true] %s198_s23 }
  0x58   : > { %p1598_p7 = pnand %p1217_p1, %p35_p4  ;;  %s1602_s28 = scalar_lea.sflag [#allocation3], %s187_s11 }
  0x59   : > { %s1348_s26 = scalar_lea.hbm %s1594_s15, 4096  ;;  %s1353_s5 = scalar_lea.hbm %s1799_s0, 8192 }
  0x5a   : > { %p1349_p5 = scmp.ne.s32.totalorder %s1594_s15, %s1348_s26  ;;  %p1350_p11 = pneg %p1598_p7 }
  0x5b   : > { %p1354_p0 = scmp.lt.u32.totalorder %s1594_s15, %s1799_s0  ;;  %p1355_p2 = scmp.lt.u32.totalorder %s1353_s5, %s1348_s26 }
  0x5c   : > { %p1351_p12 = pnand %p1350_p11, %p1349_p5  ;;  %p1357_p6 = scmp.lt.u32.totalorder %s1348_s26, %s1594_s15 }
  0x5d   : > { %p1356_p3 = por %p1355_p2, %p1354_p0 }
  0x5e   : > { %p1352_p13 = pneg %p1351_p12 }
  0x5f   : > { %p1358_p9 = por %p1357_p6, %p1356_p3 }
  0x61   : > { %p1359_p8 = pnand %p1358_p9, %p1352_p13 }
  0x63   : > { %1362 = shalt.err (!%p1359_p8)
}
  0x64   : > { %s1363_s8 = scalar_lea.vmem %s1596_s23, 4096  ;;  %s1427_s11 = smov [#allocation2]  }
  0x65   : > { %p1364_p10 = scmp.ne.s32.totalorder %s1596_s23, %s1363_s8  ;;  %s1368_s12 = sshll.u32 %s1427_s11, 4  ;;  %s1369_s12 = int_to_ptr.vmem [resolvable:$false] %s1368_s12 }
  0x66   : > { %s1370_s13 = scalar_lea.vmem %s1369_s12, 8192  ;;  %p1371_p5 = scmp.lt.s32.totalorder %s1596_s23, %s1369_s12 }
  0x67   : > { %p1366_p1 = pnand %p1364_p10, %p1350_p11  ;;  %p1372_p12 = scmp.lt.s32.totalorder %s1370_s13, %s1363_s8 }
  0x69   : > { %p1367_p4 = pneg %p1366_p1  ;;  %p1373_p0 = por %p1372_p12, %p1371_p5 }
  0x6b   : > { %p1374_p2 = pnand %p1373_p0, %p1367_p4 }
  0x6d   : > { %1377 = shalt.err (!%p1374_p2)
}
  0x6e   : > { %s1428_s27 = smov 128   ;;  %s1429_s14 = smov 8  }
  0x6f   : > { %1213 = dma.hbm_to_vmem [thread:$0]  (!%p1598_p7), %s1594_s15, 4096, %s1596_s23, %s1602_s28, %s1428_s27, %s1428_s27, %s1429_s14  }
  0x70   : > { %p1814_p11 = scmp.ne.s32.totalorder %s1810_s22, 0 }
  0x71   : > { %s212_s29 = sand.u32 (!%p1814_p11), 1, %s1412_s16   ;;  %p1815_p13 = scmp.ne.s32.totalorder (!%p1814_p11), %s1809_s21, 0 }
  0x72   : > { %210 = sbr.rel (%p1814_p11) target bundleno = 386 (0x182), region = 36  ;;  %s928_s26 = sshll.u32 (!%p1814_p11), %s212_s29, 8 }
  0x73   : > { %s213_s30 = scalar_lea.sflag (!%p1814_p11), [#allocation3], %s212_s29  ;;  %s1633_s9 = scalar_lea.vmem (!%p1814_p11), [#allocation2], %s928_s26 }
  0x79   : > { %1395 = dma.done.wait (%p1815_p13), %s213_s30, 4096  }
  0x7a   : > { %1397 = vsyncadd (%p1815_p13), %s213_s30, 4294963200  ;;  %p1816_p3 = scmp.ne.s32.totalorder %s1808_s20, 0 }
  0x7c   : > { %1399 = dma.done.wait (%p1816_p3), [#allocation5], 32  }
  0x7d   : > { %1401 = vsyncadd (%p1816_p3), [#allocation5], 4294967264 }
  0x7e   : > { %1403 = dma.done.wait (%p1816_p3), [#allocation8], 512  }
  0x7f   : > { %1405 = vsyncadd (%p1816_p3), [#allocation8], 4294966784  ;;  %v1260_v0 = vld [vmem:[#allocation7] sm:$0xff]   ;;  %v1261_v1 = vld [vmem:[#allocation7 + $0x8] sm:$0xff]   ;;  %vm451_vm0 = vcmask 523264   ;;  %s932_s20 = sshll.u32 %s917_s19, 5 }
  0x80   : > { %1138 = vmatprep.subr.bf16.mxu0 %v1260_v0  ;;  %1178 = vmatprep.subr.bf16.mxu1 %v1260_v0  ;;  %v1262_v2 = vld [vmem:[#allocation7 + $0x10] sm:$0xff]   ;;  %v261_v3 = vld [vmem:[%s1633_s9] sm:$0xff]  ;;  %v262_v4 = vld [vmem:[%s1633_s9 + $0x8] sm:$0xff]  ;;  %p255_p7 = scmp.lt.s32.totalorder %s932_s20, 63 }
  0x81   : > { %1139 = vmatpush3.bf16.msra.mxu0 %v1260_v0  ;;  %1182 = vmatpush3.bf16.msra.mxu1 %v1260_v0  ;;  %v1649_v5 = vld [vmem:[#allocation4] ss:$0 sm:$0xff]  ;;  %v1653_v8 = vld [vmem:[#allocation6] ss:$0 sm:$0xff]  ;;  %v278_v10 = vld [vmem:[%s1633_s9 + $0x88] sm:$0xff] }
  0x82   : > { %1140 = vmatprep.subr.bf16.mxu0 %v1261_v1  ;;  %1179 = vmatprep.subr.bf16.mxu1 %v1261_v1  ;;  %v300_v6 = vmul.f32 %v1649_v5, %v261_v3  ;;  %v301_v7 = vmul.f32 %v1649_v5, %v262_v4  ;;  %v277_v9 = vld [vmem:[%s1633_s9 + $0x80] sm:$0xff]  ;;  %v317_v12 = vmul.f32 %v1649_v5, %v278_v10  ;;  %v263_v13 = vld [vmem:[%s1633_s9 + $0x10] sm:$0xff]  ;;  %v264_v14 = vld [vmem:[%s1633_s9 + $0x18] sm:$0xff]  ;;  %s1822_s20 = smov (!%p255_p7, %s932_s20), 63 }
  0x83   : > { %v316_v11 = vmul.f32 %v1649_v5, %v277_v9  ;;  %v279_v15 = vld [vmem:[%s1633_s9 + $0x90] sm:$0xff]  ;;  %v302_v18 = vmul.f32 %v1649_v5, %v263_v13  ;;  %v280_v19 = vld [vmem:[%s1633_s9 + $0x98] sm:$0xff]  ;;  %v303_v23 = vmul.f32 %v1649_v5, %v264_v14  ;;  %v265_v24 = vld [vmem:[%s1633_s9 + $0x20] sm:$0xff]  ;;  %s933_s21 = sshll.u32 %s1822_s20, 2 }
  0x84   : > { %v339_v16 = vadd.f32 %v1653_v8, %v300_v6  ;;  %v340_v17 = vadd.f32 %v1653_v8, %v301_v7  ;;  %v1263_v20 = vld [vmem:[#allocation7 + $0x18] sm:$0xff]   ;;  %v356_v22 = vadd.f32 %v1653_v8, %v317_v12  ;;  %v318_v28 = vmul.f32 %v1649_v5, %v279_v15  ;;  %v266_v29 = vld [vmem:[%s1633_s9 + $0x28] sm:$0xff]  ;;  %v267_v40 = vld [vmem:[%s1633_s9 + $0x30] sm:$0xff]  ;;  %s1768_s23 = scalar_lea.vmem %s1803_s4, %s933_s21 }
  0x85   : > { %1141 = vmatpush3.bf16.msra.mxu0 %v1261_v1  ;;  %1183 = vmatpush3.bf16.msra.mxu1 %v1261_v1  ;;  %v355_v21 = vadd.f32 %v1653_v8, %v316_v11  ;;  %v341_v27 = vadd.f32 %v1653_v8, %v302_v18  ;;  %v342_v32 = vadd.f32 %v1653_v8, %v303_v23  ;;  %v281_v34 = vld [vmem:[%s1633_s9 + $0xa0] sm:$0xff]  ;;  %v282_v35 = vld [vmem:[%s1633_s9 + $0xa8] sm:$0xff]  ;;  %v268_v45 = vld [vmem:[%s1633_s9 + $0x38] sm:$0xff] }
  0x86   : > { %1142 = vmatprep.subr.bf16.mxu0 %v1262_v2  ;;  %1180 = vmatprep.subr.bf16.mxu1 %v1262_v2  ;;  %v371_v25 = vmax.f32 %v339_v16, 0.0  ;;  %v372_v26 = vmax.f32 %v340_v17, 0.0  ;;  %v388_v31 = vmax.f32 %v356_v22, 0.0  ;;  %v319_v33 = vmul.f32 %v1649_v5, %v280_v19  ;;  %v283_v50 = vld [vmem:[%s1633_s9 + $0xb0] sm:$0xff]  ;;  %v284_v55 = vld [vmem:[%s1633_s9 + $0xb8] sm:$0xff]  ;;  %v269_v60 = vld [vmem:[%s1633_s9 + $0x40] sm:$0xff] }
  0x87   : > { %v387_v30 = vmax.f32 %v355_v21, 0.0  ;;  %v373_v37 = vmax.f32 %v341_v27, 0.0  ;;  %v357_v38 = vadd.f32 %v1653_v8, %v318_v28  ;;  %v304_v39 = vmul.f32 %v1649_v5, %v265_v24  ;;  %v270_v1 = vld [vmem:[%s1633_s9 + $0x48] sm:$0xff]  ;;  %v285_v7 = vld [vmem:[%s1633_s9 + $0xc0] sm:$0xff]  ;;  %v271_v14 = vld [vmem:[%s1633_s9 + $0x50] sm:$0xff] }
  0x88   : > { %v403_v36 = vpack.c.bf16 %v372_v26, %v371_v25  ;;  %v374_v42 = vmax.f32 %v342_v32, 0.0  ;;  %v358_v43 = vadd.f32 %v1653_v8, %v319_v33  ;;  %v305_v44 = vmul.f32 %v1649_v5, %v266_v29  ;;  %v286_v9 = vld [vmem:[%s1633_s9 + $0xc8] sm:$0xff]  ;;  %v272_v19 = vld [vmem:[%s1633_s9 + $0x58] sm:$0xff]  ;;  %v287_v24 = vld [vmem:[%s1633_s9 + $0xd0] sm:$0xff] }
  0x89   : > { %1143 = vmatpush3.bf16.msra.mxu0 %v1262_v2  ;;  %1184 = vmatpush3.bf16.msra.mxu1 %v1262_v2  ;;  %v411_v41 = vpack.c.bf16 %v388_v31, %v387_v30  ;;  %v389_v46 = vmax.f32 %v357_v38, 0.0  ;;  %v343_v47 = vadd.f32 %v1653_v8, %v304_v39  ;;  %v320_v48 = vmul.f32 %v1649_v5, %v281_v34  ;;  %v288_v29 = vld [vmem:[%s1633_s9 + $0xd8] sm:$0xff]  ;;  %v273_v34 = vld [vmem:[%s1633_s9 + $0x60] sm:$0xff]  ;;  %v274_v39 = vld [vmem:[%s1633_s9 + $0x68] sm:$0xff] }
  0x8a   : > { %1144 = vmatprep.subr.bf16.mxu0 %v1263_v20  ;;  %1181 = vmatprep.subr.bf16.mxu1 %v1263_v20  ;;  %v321_v49 = vmul.f32 %v1649_v5, %v282_v35  ;;  %v404_v51 = vpack.c.bf16 %v374_v42, %v373_v37  ;;  %v390_v52 = vmax.f32 %v358_v43, 0.0  ;;  %v344_v53 = vadd.f32 %v1653_v8, %v305_v44  ;;  %v289_v44 = vld [vmem:[%s1633_s9 + $0xe0] sm:$0xff] }
  0x8b   : > { %1146 = vmatprep.mubr.msk.bf16.mxu0 %vm451_vm0, %v403_v36  ;;  %1162 = vmatprep.mubr.msk.bf16.mxu1 %vm451_vm0, %v411_v41  ;;  %v306_v54 = vmul.f32 %v1649_v5, %v267_v40  ;;  %v375_v56 = vmax.f32 %v343_v47, 0.0  ;;  %v359_v57 = vadd.f32 %v1653_v8, %v320_v48  ;;  %v307_v59 = vmul.f32 %v1649_v5, %v268_v45  ;;  %v290_v45 = vld [vmem:[%s1633_s9 + $0xe8] sm:$0xff] }
  0x8c   : > { %v360_v58 = vadd.f32 %v1653_v8, %v321_v49  ;;  %v412_v61 = vpack.c.bf16 %v390_v52, %v389_v46  ;;  %v376_v62 = vmax.f32 %v344_v53, 0.0  ;;  %v322_v0 = vmul.f32 %v1649_v5, %v283_v50  ;;  %v275_v50 = vld [vmem:[%s1633_s9 + $0x70] sm:$0xff] }
  0x8d   : > { %1145 = vmatpush3.bf16.msra.mxu0 %v1263_v20  ;;  %1185 = vmatpush3.bf16.msra.mxu1 %v1263_v20  ;;  %v345_v63 = vadd.f32 %v1653_v8, %v306_v54  ;;  %v391_v2 = vmax.f32 %v359_v57, 0.0  ;;  %v346_v4 = vadd.f32 %v1653_v8, %v307_v59  ;;  %v323_v6 = vmul.f32 %v1649_v5, %v284_v55  ;;  %v276_v55 = vld [vmem:[%s1633_s9 + $0x78] sm:$0xff] }
  0x8e   : > { %v392_v3 = vmax.f32 %v360_v58, 0.0  ;;  %v405_v10 = vpack.c.bf16 %v376_v62, %v375_v56  ;;  %v361_v12 = vadd.f32 %v1653_v8, %v322_v0  ;;  %v308_v13 = vmul.f32 %v1649_v5, %v269_v60  ;;  %v291_v60 = vld [vmem:[%s1633_s9 + $0xf0] sm:$0xff] }
  0x8f   : > { %v377_v11 = vmax.f32 %v345_v63, 0.0  ;;  %v378_v16 = vmax.f32 %v346_v4, 0.0  ;;  %v362_v17 = vadd.f32 %v1653_v8, %v323_v6  ;;  %v309_v18 = vmul.f32 %v1649_v5, %v270_v1  ;;  %v292_v1 = vld [vmem:[%s1633_s9 + $0xf8] sm:$0xff] }
  0x90   : > { %1147 = vmatmul.mubr.msk.bf16.vlgmr.msra.gmra.mrb[0].mxu0 %vm451_vm0, %v404_v51  ;;  %1163 = vmatmul.mubr.msk.bf16.vlgmr.msra.gmra.mrb[0].mxu1 %vm451_vm0, %v412_v61  ;;  %v413_v15 = vpack.c.bf16 %v392_v3, %v391_v2  ;;  %v393_v20 = vmax.f32 %v361_v12, 0.0  ;;  %v347_v21 = vadd.f32 %v1653_v8, %v308_v13  ;;  %v324_v22 = vmul.f32 %v1649_v5, %v285_v7 }
  0x91   : > { %1150 = vmatprep.mubr.msk.bf16.mxu0 %vm451_vm0, %v405_v10  ;;  %v325_v23 = vmul.f32 %v1649_v5, %v286_v9  ;;  %v406_v25 = vpack.c.bf16 %v378_v16, %v377_v11  ;;  %v394_v26 = vmax.f32 %v362_v17, 0.0  ;;  %v348_v27 = vadd.f32 %v1653_v8, %v309_v18 }
  0x92   : > { %1166 = vmatprep.mubr.msk.bf16.mxu1 %vm451_vm0, %v413_v15  ;;  %v310_v28 = vmul.f32 %v1649_v5, %v271_v14  ;;  %v379_v30 = vmax.f32 %v347_v21, 0.0  ;;  %v363_v31 = vadd.f32 %v1653_v8, %v324_v22  ;;  %v311_v33 = vmul.f32 %v1649_v5, %v272_v19 }
  0x93   : > { %v364_v32 = vadd.f32 %v1653_v8, %v325_v23  ;;  %v414_v35 = vpack.c.bf16 %v394_v26, %v393_v20  ;;  %v380_v36 = vmax.f32 %v348_v27, 0.0  ;;  %v326_v38 = vmul.f32 %v1649_v5, %v287_v24 }
  0x94   : > { %v349_v37 = vadd.f32 %v1653_v8, %v310_v28  ;;  %v395_v40 = vmax.f32 %v363_v31, 0.0  ;;  %v350_v42 = vadd.f32 %v1653_v8, %v311_v33  ;;  %v327_v43 = vmul.f32 %v1649_v5, %v288_v29 }
  0x95   : > { %v396_v41 = vmax.f32 %v364_v32, 0.0  ;;  %v407_v46 = vpack.c.bf16 %v380_v36, %v379_v30  ;;  %v365_v48 = vadd.f32 %v1653_v8, %v326_v38  ;;  %v312_v49 = vmul.f32 %v1649_v5, %v273_v34 }
  0x96   : > { %v381_v47 = vmax.f32 %v349_v37, 0.0  ;;  %v382_v52 = vmax.f32 %v350_v42, 0.0  ;;  %v366_v53 = vadd.f32 %v1653_v8, %v327_v43  ;;  %v313_v54 = vmul.f32 %v1649_v5, %v274_v39 }
  0x97   : > { %v415_v51 = vpack.c.bf16 %v396_v41, %v395_v40  ;;  %v397_v56 = vmax.f32 %v365_v48, 0.0  ;;  %v351_v57 = vadd.f32 %v1653_v8, %v312_v49  ;;  %v328_v58 = vmul.f32 %v1649_v5, %v289_v44 }
  0x98   : > { %1151 = vmatmul.mubr.msk.bf16.gmra.mrb[4].mxu0 %vm451_vm0, %v406_v25  ;;  %1167 = vmatmul.mubr.msk.bf16.gmra.mrb[4].mxu1 %vm451_vm0, %v414_v35  ;;  %v329_v59 = vmul.f32 %v1649_v5, %v290_v45  ;;  %v408_v61 = vpack.c.bf16 %v382_v52, %v381_v47  ;;  %v398_v62 = vmax.f32 %v366_v53, 0.0  ;;  %v352_v63 = vadd.f32 %v1653_v8, %v313_v54 }
  0x99   : > { %1154 = vmatprep.mubr.msk.bf16.mxu0 %vm451_vm0, %v407_v46  ;;  %1170 = vmatprep.mubr.msk.bf16.mxu1 %vm451_vm0, %v415_v51  ;;  %v314_v0 = vmul.f32 %v1649_v5, %v275_v50  ;;  %v383_v2 = vmax.f32 %v351_v57, 0.0  ;;  %v367_v3 = vadd.f32 %v1653_v8, %v328_v58  ;;  %v315_v6 = vmul.f32 %v1649_v5, %v276_v55 }
  0x9a   : > { %v368_v4 = vadd.f32 %v1653_v8, %v329_v59  ;;  %v416_v7 = vpack.c.bf16 %v398_v62, %v397_v56  ;;  %v384_v9 = vmax.f32 %v352_v63, 0.0  ;;  %v330_v11 = vmul.f32 %v1649_v5, %v291_v60 }
  0x9b   : > { %v353_v10 = vadd.f32 %v1653_v8, %v314_v0  ;;  %v399_v12 = vmax.f32 %v367_v3, 0.0  ;;  %v354_v14 = vadd.f32 %v1653_v8, %v315_v6  ;;  %v331_v15 = vmul.f32 %v1649_v5, %v292_v1 }
  0x9c   : > { %v400_v13 = vmax.f32 %v368_v4, 0.0  ;;  %v409_v16 = vpack.c.bf16 %v384_v9, %v383_v2  ;;  %v369_v17 = vadd.f32 %v1653_v8, %v330_v11 }
  0x9d   : > { %v370_v19 = vadd.f32 %v1653_v8, %v331_v15  ;;  %v385_v20 = vmax.f32 %v353_v10, 0.0  ;;  %v386_v21 = vmax.f32 %v354_v14, 0.0 }
  0x9e   : > { %v417_v18 = vpack.c.bf16 %v400_v13, %v399_v12  ;;  %v401_v22 = vmax.f32 %v369_v17, 0.0 }
  0x9f   : > { %v402_v23 = vmax.f32 %v370_v19, 0.0  ;;  %v410_v5 = vpack.c.bf16 %v386_v21, %v385_v20 }
  0xa0   : > { %1155 = vmatmul.mubr.msk.bf16.gmra.mrb[8].mxu0 %vm451_vm0, %v408_v61  ;;  %1171 = vmatmul.mubr.msk.bf16.gmra.mrb[8].mxu1 %vm451_vm0, %v416_v7 }
  0xa1   : > { %1158 = vmatprep.mubr.msk.bf16.mxu0 %vm451_vm0, %v409_v16  ;;  %1174 = vmatprep.mubr.msk.bf16.mxu1 %vm451_vm0, %v417_v18  ;;  %v418_v24 = vpack.c.bf16 %v402_v23, %v401_v22 }
  0xa8   : > { %1159 = vmatmul.mubr.msk.bf16.gmra.mrb[12].mxu0 %vm451_vm0, %v410_v5  ;;  %1175 = vmatmul.mubr.msk.bf16.gmra.mrb[12].mxu1 %vm451_vm0, %v418_v24 }
 0x163   : > { %v1148_v8 = vpop.f32.mrb[0].mxu0  ;;  %v1164_v25 = vpop.f32.mrb[0].mxu1 }
 0x164   : > { %v534_v26 = vpop.f32.mrb[1].mxu0  ;;  %v598_v27 = vpop.f32.mrb[1].mxu1 }
 0x165   : > { %v1149_v28 = vpop.f32.mrb[2].mxu0  ;;  %v1165_v29 = vpop.f32.mrb[2].mxu1 }
 0x166   : > { %v1031_v30 = vpack.c.bf16 %v1149_v28, %v1148_v8  ;;  %v1071_v31 = vpack.c.bf16 %v1165_v29, %v1164_v25  ;;  %v537_v32 = vpop.f32.mrb[3].mxu0  ;;  %v601_v33 = vpop.f32.mrb[3].mxu1 }
 0x167   : > { %v1026_v34 = vpack.c.bf16 %v537_v32, %v534_v26  ;;  %v1066_v35 = vpack.c.bf16 %v601_v33, %v598_v27 }
 0x168   : > { %1103 = vst [vmem:[%s1768_s23 + $0x8] sm:$0xff] %v1031_v30   ;;  %1111 = vst [vmem:[%s1768_s23 + $0x48] sm:$0xff] %v1071_v31  }
 0x169   : > { %1027 = vst [vmem:[%s1768_s23] sm:$0xff] %v1026_v34   ;;  %1110 = vst [vmem:[%s1768_s23 + $0x40] sm:$0xff] %v1066_v35  }
 0x16b   : > { %v1152_v36 = vpop.f32.mrb[4].mxu0  ;;  %v1168_v37 = vpop.f32.mrb[4].mxu1 }
 0x16c   : > { %v550_v38 = vpop.f32.mrb[5].mxu0  ;;  %v614_v39 = vpop.f32.mrb[5].mxu1 }
 0x16d   : > { %v1153_v40 = vpop.f32.mrb[6].mxu0  ;;  %v1169_v41 = vpop.f32.mrb[6].mxu1 }
 0x16e   : > { %v1041_v42 = vpack.c.bf16 %v1153_v40, %v1152_v36  ;;  %v1081_v43 = vpack.c.bf16 %v1169_v41, %v1168_v37  ;;  %v553_v44 = vpop.f32.mrb[7].mxu0  ;;  %v617_v45 = vpop.f32.mrb[7].mxu1 }
 0x16f   : > { %v1036_v46 = vpack.c.bf16 %v553_v44, %v550_v38  ;;  %v1076_v47 = vpack.c.bf16 %v617_v45, %v614_v39 }
 0x170   : > { %1105 = vst [vmem:[%s1768_s23 + $0x18] sm:$0xff] %v1041_v42   ;;  %1113 = vst [vmem:[%s1768_s23 + $0x58] sm:$0xff] %v1081_v43  }
 0x171   : > { %1104 = vst [vmem:[%s1768_s23 + $0x10] sm:$0xff] %v1036_v46   ;;  %1112 = vst [vmem:[%s1768_s23 + $0x50] sm:$0xff] %v1076_v47  }
 0x173   : > { %v1156_v48 = vpop.f32.mrb[8].mxu0  ;;  %v1172_v49 = vpop.f32.mrb[8].mxu1 }
 0x174   : > { %v566_v50 = vpop.f32.mrb[9].mxu0  ;;  %v630_v51 = vpop.f32.mrb[9].mxu1 }
 0x175   : > { %v1157_v52 = vpop.f32.mrb[10].mxu0  ;;  %v1173_v53 = vpop.f32.mrb[10].mxu1 }
 0x176   : > { %v1051_v54 = vpack.c.bf16 %v1157_v52, %v1156_v48  ;;  %v1091_v55 = vpack.c.bf16 %v1173_v53, %v1172_v49  ;;  %v569_v56 = vpop.f32.mrb[11].mxu0  ;;  %v633_v57 = vpop.f32.mrb[11].mxu1 }
 0x177   : > { %v1046_v58 = vpack.c.bf16 %v569_v56, %v566_v50  ;;  %v1086_v59 = vpack.c.bf16 %v633_v57, %v630_v51 }
 0x178   : > { %1107 = vst [vmem:[%s1768_s23 + $0x28] sm:$0xff] %v1051_v54   ;;  %1115 = vst [vmem:[%s1768_s23 + $0x68] sm:$0xff] %v1091_v55  }
 0x179   : > { %1106 = vst [vmem:[%s1768_s23 + $0x20] sm:$0xff] %v1046_v58   ;;  %1114 = vst [vmem:[%s1768_s23 + $0x60] sm:$0xff] %v1086_v59  }
 0x17b   : > { %v1160_v60 = vpop.f32.mrb[12].mxu0  ;;  %v1176_v61 = vpop.f32.mrb[12].mxu1 }
 0x17c   : > { %v582_v62 = vpop.f32.mrb[13].mxu0  ;;  %v646_v63 = vpop.f32.mrb[13].mxu1 }
 0x17d   : > { %v1161_v0 = vpop.f32.mrb[14].mxu0  ;;  %v1177_v1 = vpop.f32.mrb[14].mxu1 }
 0x17e   : > { %v1061_v2 = vpack.c.bf16 %v1161_v0, %v1160_v60  ;;  %v1101_v3 = vpack.c.bf16 %v1177_v1, %v1176_v61  ;;  %v585_v4 = vpop.f32.mrb[15].mxu0  ;;  %v649_v6 = vpop.f32.mrb[15].mxu1 }
 0x17f   : > { %v1056_v7 = vpack.c.bf16 %v585_v4, %v582_v62  ;;  %v1096_v9 = vpack.c.bf16 %v649_v6, %v646_v63 }
 0x180   : > { %1109 = vst [vmem:[%s1768_s23 + $0x38] sm:$0xff] %v1061_v2   ;;  %1117 = vst [vmem:[%s1768_s23 + $0x78] sm:$0xff] %v1101_v3  }
 0x181   : > { %1108 = vst [vmem:[%s1768_s23 + $0x30] sm:$0xff] %v1056_v7   ;;  %1116 = vst [vmem:[%s1768_s23 + $0x70] sm:$0xff] %v1096_v9  }
 0x182 PF: > { %p16_p6 = scmp.ge.s32.totalorder %s1577_s7, 4   ;;  %s1817_s15 = smov %s1412_s16 }
 0x183   : > { %s1818_s16 = smov %s1416_s17  ;;  %s1819_s17 = smov %s1587_s10 }
 0x184   : > { %s1820_s18 = smov %s1577_s7  ;;  %18 = sbr.rel (!%p16_p6) target bundleno = 5 (0x5), region = 88 }
 0x18b   :  { %843 = vsyncpa [#allocation3], 1 }
 0x18c   :  { %845 = vsyncpa [#allocation3 + $0x1], 1 }
 0x18d   :  { %846 = vsyncpa [#allocation5], 1 }
 0x18e   :  { %847 = vsyncpa [#allocation8], 1 }

// kernel: dense_block_forward.10
= control target key start
LH: loop header
LB: loop body
LE: loop exit
PB: predicated region body
PF: predicated region fallthrough
CT: control target
= control target key end

     0   :  { %s1153_s15 = smov 0   ;;  %s1334_s0 = inlined_call_operand.vmem [shape: f32[512,96], index: 0, kind: input, shape index: {}]   ;;  %s1335_s1 = inlined_call_operand.vmem [shape: f32[1,96], index: 1, kind: input, shape index: {}]   ;;  %s1336_s2 = inlined_call_operand.vmem [shape: f32[1,96], index: 2, kind: input, shape index: {}]   ;;  %s1337_s3 = inlined_call_operand.vmem [shape: bf16[96,128], index: 3, kind: input, shape index: {}]   ;;  %s1338_s4 = inlined_call_operand.vmem [shape: bf16[512,128], index: 4, kind: output, shape index: {}]  }
   0x1 LB: > { %s834_s16 = sadd.s32 4294967295, %s1126_s15   ;;  %p838_p0 = scmp.ge.s32.totalorder %s1126_s15, 1  ;;  %s1126_s15 = sphi %s1153_s15, %s14_s15  }
   0x2   : > { %p163_p1 = scmp.lt.s32.totalorder %s1126_s15, 3 }
   0x4   : > { %p164_p2 = pnand %p838_p0, %p163_p1 }
   0x5   : > { %v1114_v0 = vld [vmem:[%s1337_s3] sm:$0xff] (!%p164_p2)   ;;  %s839_s19 = sshll.u32 (!%p164_p2), %s834_s16, 5  ;;  %v1115_v1 = vld [vmem:[%s1337_s3 + $0x8] sm:$0xff] (!%p164_p2)   ;;  %v1116_v2 = vld [vmem:[%s1337_s3 + $0x10] sm:$0xff] (!%p164_p2)   ;;  %vm408_vm0 = vcmask (!%p164_p2), 785408  }
   0x6   : > { %167 = sbr.rel (%p164_p2) target bundleno = 273 (0x111), region = 36  ;;  %p190_p3 = scmp.lt.s32.totalorder (!%p164_p2), %s839_s19, 63  ;;  %1050 = vmatprep.subr.bf16.mxu0 (!%p164_p2), %v1114_v0  ;;  %1094 = vmatprep.subr.bf16.mxu1 (!%p164_p2), %v1114_v0  ;;  %v1117_v3 = vld [vmem:[%s1337_s3 + $0x18] sm:$0xff] (!%p164_p2)   ;;  %v1184_v4 = vld [vmem:[%s1335_s1] ss:$0 sm:$0xff] (!%p164_p2)  ;;  %v1119_v48 = vld [vmem:[%s1337_s3 + $0x28] sm:$0xff] (!%p164_p2)  }
   0x7   : > { %1051 = vmatpush3.bf16.msra.mxu0 (!%p164_p2), %v1114_v0  ;;  %1100 = vmatpush3.bf16.msra.mxu1 (!%p164_p2), %v1114_v0  ;;  %v1189_v5 = vld [vmem:[%s1336_s2] ss:$0 sm:$0xff] (!%p164_p2) }
   0x8   : > { %1052 = vmatprep.subr.bf16.mxu0 (!%p164_p2), %v1115_v1  ;;  %1095 = vmatprep.subr.bf16.mxu1 (!%p164_p2), %v1115_v1  ;;  %v1118_v29 = vld [vmem:[%s1337_s3 + $0x20] sm:$0xff] (!%p164_p2)  }
   0xb   : > { %1053 = vmatpush3.bf16.msra.mxu0 (!%p164_p2), %v1115_v1  ;;  %1101 = vmatpush3.bf16.msra.mxu1 (!%p164_p2), %v1115_v1 }
   0xc   : > { %1054 = vmatprep.subr.bf16.mxu0 (!%p164_p2), %v1116_v2  ;;  %1096 = vmatprep.subr.bf16.mxu1 (!%p164_p2), %v1116_v2 }
   0xd   : > { %s1340_s19 = smov (!%p190_p3, %s839_s19), 63 }
   0xe   : > { %s840_s24 = sshll.u32 %s1340_s19, 3  ;;  %s842_s12 = sshll.u32 %s1340_s19, 2 }
   0xf   : > { %s1179_s29 = scalar_lea.vmem %s1334_s0, %s840_s24  ;;  %1055 = vmatpush3.bf16.msra.mxu0 %v1116_v2  ;;  %1102 = vmatpush3.bf16.msra.mxu1 %v1116_v2  ;;  %s1313_s16 = scalar_lea.vmem %s1338_s4, %s842_s12 }
  0x10   : > { %v202_v6 = vld [vmem:[%s1179_s29] sm:$0xff]  ;;  %v203_v7 = vld [vmem:[%s1179_s29 + $0x8] sm:$0xff]  ;;  %v204_v13 = vld [vmem:[%s1179_s29 + $0x10] sm:$0xff]  ;;  %1056 = vmatprep.subr.bf16.mxu0 %v1117_v3  ;;  %1097 = vmatprep.subr.bf16.mxu1 %v1117_v3 }
  0x11   : > { %v218_v8 = vld [vmem:[%s1179_s29 + $0x80] sm:$0xff]  ;;  %v241_v9 = vmul.f32 %v1184_v4, %v202_v6  ;;  %v242_v10 = vmul.f32 %v1184_v4, %v203_v7  ;;  %v219_v11 = vld [vmem:[%s1179_s29 + $0x88] sm:$0xff]  ;;  %v205_v14 = vld [vmem:[%s1179_s29 + $0x18] sm:$0xff]  ;;  %v243_v16 = vmul.f32 %v1184_v4, %v204_v13 }
  0x12   : > { %v257_v12 = vmul.f32 %v1184_v4, %v218_v8  ;;  %v258_v15 = vmul.f32 %v1184_v4, %v219_v11  ;;  %v244_v17 = vmul.f32 %v1184_v4, %v205_v14  ;;  %v220_v18 = vld [vmem:[%s1179_s29 + $0x90] sm:$0xff]  ;;  %v221_v19 = vld [vmem:[%s1179_s29 + $0x98] sm:$0xff]  ;;  %v206_v27 = vld [vmem:[%s1179_s29 + $0x20] sm:$0xff] }
  0x13   : > { %v280_v20 = vadd.f32 %v1189_v5, %v241_v9  ;;  %v281_v21 = vadd.f32 %v1189_v5, %v242_v10  ;;  %v259_v23 = vmul.f32 %v1184_v4, %v220_v18  ;;  %v282_v25 = vadd.f32 %v1189_v5, %v243_v16  ;;  %v207_v28 = vld [vmem:[%s1179_s29 + $0x28] sm:$0xff]  ;;  %v222_v34 = vld [vmem:[%s1179_s29 + $0xa0] sm:$0xff]  ;;  %v208_v42 = vld [vmem:[%s1179_s29 + $0x30] sm:$0xff]  ;;  %1057 = vmatpush3.bf16.msra.mxu0 %v1117_v3 }
  0x14   : > { %v296_v22 = vadd.f32 %v1189_v5, %v257_v12  ;;  %v297_v24 = vadd.f32 %v1189_v5, %v258_v15  ;;  %v283_v26 = vadd.f32 %v1189_v5, %v244_v17  ;;  %v260_v33 = vmul.f32 %v1184_v4, %v221_v19  ;;  %v223_v37 = vld [vmem:[%s1179_s29 + $0xa8] sm:$0xff]  ;;  %v209_v43 = vld [vmem:[%s1179_s29 + $0x38] sm:$0xff]  ;;  %1103 = vmatpush3.bf16.msra.mxu1 %v1117_v3  ;;  %v224_v53 = vld [vmem:[%s1179_s29 + $0xb0] sm:$0xff] }
  0x15   : > { %v312_v30 = vmax.f32 %v280_v20, 0.0  ;;  %v313_v31 = vmax.f32 %v281_v21, 0.0  ;;  %v298_v36 = vadd.f32 %v1189_v5, %v259_v23  ;;  %v245_v40 = vmul.f32 %v1184_v4, %v206_v27  ;;  %1058 = vmatprep.subr.bf16.mxu0 %v1118_v29  ;;  %1098 = vmatprep.subr.bf16.mxu1 %v1118_v29  ;;  %v225_v58 = vld [vmem:[%s1179_s29 + $0xb8] sm:$0xff]  ;;  %v210_v59 = vld [vmem:[%s1179_s29 + $0x40] sm:$0xff]  ;;  %v211_v63 = vld [vmem:[%s1179_s29 + $0x48] sm:$0xff] }
  0x16   : > { %v328_v32 = vmax.f32 %v296_v22, 0.0  ;;  %v329_v35 = vmax.f32 %v297_v24, 0.0  ;;  %v299_v39 = vadd.f32 %v1189_v5, %v260_v33  ;;  %v246_v41 = vmul.f32 %v1184_v4, %v207_v28  ;;  %v226_v3 = vld [vmem:[%s1179_s29 + $0xc0] sm:$0xff]  ;;  %v227_v10 = vld [vmem:[%s1179_s29 + $0xc8] sm:$0xff]  ;;  %v212_v15 = vld [vmem:[%s1179_s29 + $0x50] sm:$0xff] }
  0x17   : > { %v344_v38 = vpack.c.bf16 %v313_v31, %v312_v30  ;;  %v314_v45 = vmax.f32 %v282_v25, 0.0  ;;  %v315_v46 = vmax.f32 %v283_v26, 0.0  ;;  %v261_v47 = vmul.f32 %v1184_v4, %v222_v34  ;;  %1059 = vmatpush3.bf16.msra.mxu0 %v1118_v29  ;;  %v213_v20 = vld [vmem:[%s1179_s29 + $0x58] sm:$0xff]  ;;  %v228_v21 = vld [vmem:[%s1179_s29 + $0xd0] sm:$0xff]  ;;  %v214_v34 = vld [vmem:[%s1179_s29 + $0x60] sm:$0xff] }
  0x18   : > { %v352_v44 = vpack.c.bf16 %v329_v35, %v328_v32  ;;  %v330_v49 = vmax.f32 %v298_v36, 0.0  ;;  %v284_v50 = vadd.f32 %v1189_v5, %v245_v40  ;;  %v285_v51 = vadd.f32 %v1189_v5, %v246_v41  ;;  %1104 = vmatpush3.bf16.msra.mxu1 %v1118_v29  ;;  %1060 = vmatprep.subr.bf16.mxu0 %v1119_v48  ;;  %v229_v25 = vld [vmem:[%s1179_s29 + $0xd8] sm:$0xff]  ;;  %v215_v35 = vld [vmem:[%s1179_s29 + $0x68] sm:$0xff]  ;;  %v230_v40 = vld [vmem:[%s1179_s29 + $0xe0] sm:$0xff] }
  0x19   : > { %v262_v52 = vmul.f32 %v1184_v4, %v223_v37  ;;  %1062 = vmatprep.mubr.msk.bf16.mxu0 %vm408_vm0, %v344_v38  ;;  %v331_v54 = vmax.f32 %v299_v39, 0.0  ;;  %v300_v55 = vadd.f32 %v1189_v5, %v261_v47  ;;  %v247_v56 = vmul.f32 %v1184_v4, %v208_v42  ;;  %1099 = vmatprep.subr.bf16.mxu1 %v1119_v48 }
  0x1a   : > { %1078 = vmatprep.mubr.msk.bf16.mxu1 %vm408_vm0, %v352_v44  ;;  %v248_v57 = vmul.f32 %v1184_v4, %v209_v43  ;;  %v316_v60 = vmax.f32 %v284_v50, 0.0  ;;  %v317_v61 = vmax.f32 %v285_v51, 0.0  ;;  %v263_v2 = vmul.f32 %v1184_v4, %v224_v53  ;;  %v231_v43 = vld [vmem:[%s1179_s29 + $0xe8] sm:$0xff] }
  0x1b   : > { %v301_v62 = vadd.f32 %v1189_v5, %v262_v52  ;;  %v332_v0 = vmax.f32 %v300_v55, 0.0  ;;  %v286_v1 = vadd.f32 %v1189_v5, %v247_v56  ;;  %v264_v8 = vmul.f32 %v1184_v4, %v225_v58  ;;  %1061 = vmatpush3.bf16.msra.mxu0 %v1119_v48  ;;  %v216_v55 = vld [vmem:[%s1179_s29 + $0x70] sm:$0xff] }
  0x1c   : > { %v287_v7 = vadd.f32 %v1189_v5, %v248_v57  ;;  %v249_v9 = vmul.f32 %v1184_v4, %v210_v59  ;;  %v345_v11 = vpack.c.bf16 %v315_v46, %v314_v45  ;;  %v353_v12 = vpack.c.bf16 %v331_v54, %v330_v49  ;;  %1105 = vmatpush3.bf16.msra.mxu1 %v1119_v48 }
  0x1d   : > { %v333_v6 = vmax.f32 %v301_v62, 0.0  ;;  %v302_v13 = vadd.f32 %v1189_v5, %v263_v2  ;;  %v250_v14 = vmul.f32 %v1184_v4, %v211_v63  ;;  %v346_v16 = vpack.c.bf16 %v317_v61, %v316_v60  ;;  %v217_v60 = vld [vmem:[%s1179_s29 + $0x78] sm:$0xff]  ;;  %v232_v61 = vld [vmem:[%s1179_s29 + $0xf0] sm:$0xff] }
  0x1e   : > { %v303_v17 = vadd.f32 %v1189_v5, %v264_v8  ;;  %v288_v18 = vadd.f32 %v1189_v5, %v249_v9  ;;  %v265_v19 = vmul.f32 %v1184_v4, %v226_v3  ;;  %v266_v24 = vmul.f32 %v1184_v4, %v227_v10  ;;  %1063 = vmatmul.mubr.msk.bf16.vlgmr.msra.gmra.mrb[0].mxu0 %vm408_vm0, %v345_v11  ;;  %v233_v62 = vld [vmem:[%s1179_s29 + $0xf8] sm:$0xff] }
  0x1f   : > { %v354_v22 = vpack.c.bf16 %v333_v6, %v332_v0  ;;  %v289_v23 = vadd.f32 %v1189_v5, %v250_v14  ;;  %v318_v26 = vmax.f32 %v286_v1, 0.0  ;;  %v319_v27 = vmax.f32 %v287_v7, 0.0  ;;  %1079 = vmatmul.mubr.msk.bf16.vlgmr.msra.gmra.mrb[0].mxu1 %vm408_vm0, %v353_v12  ;;  %1066 = vmatprep.mubr.msk.bf16.mxu0 %vm408_vm0, %v346_v16 }
  0x20   : > { %v304_v28 = vadd.f32 %v1189_v5, %v265_v19  ;;  %v251_v29 = vmul.f32 %v1184_v4, %v212_v15  ;;  %v334_v30 = vmax.f32 %v302_v13, 0.0  ;;  %v305_v31 = vadd.f32 %v1189_v5, %v266_v24 }
  0x21   : > { %v252_v32 = vmul.f32 %v1184_v4, %v213_v20  ;;  %v267_v33 = vmul.f32 %v1184_v4, %v228_v21  ;;  %v335_v36 = vmax.f32 %v303_v17, 0.0  ;;  %v320_v37 = vmax.f32 %v288_v18, 0.0  ;;  %1082 = vmatprep.mubr.msk.bf16.mxu1 %vm408_vm0, %v354_v22 }
  0x22   : > { %v321_v38 = vmax.f32 %v289_v23, 0.0  ;;  %v268_v39 = vmul.f32 %v1184_v4, %v229_v25  ;;  %v336_v41 = vmax.f32 %v304_v28, 0.0  ;;  %v337_v42 = vmax.f32 %v305_v31, 0.0 }
  0x23   : > { %v290_v44 = vadd.f32 %v1189_v5, %v251_v29  ;;  %v253_v45 = vmul.f32 %v1184_v4, %v214_v34  ;;  %v254_v46 = vmul.f32 %v1184_v4, %v215_v35  ;;  %v291_v47 = vadd.f32 %v1189_v5, %v252_v32 }
  0x24   : > { %v306_v48 = vadd.f32 %v1189_v5, %v267_v33  ;;  %v307_v49 = vadd.f32 %v1189_v5, %v268_v39  ;;  %v269_v50 = vmul.f32 %v1184_v4, %v230_v40  ;;  %v347_v51 = vpack.c.bf16 %v319_v27, %v318_v26 }
  0x25   : > { %v355_v52 = vpack.c.bf16 %v335_v36, %v334_v30  ;;  %v348_v53 = vpack.c.bf16 %v321_v38, %v320_v37  ;;  %v270_v54 = vmul.f32 %v1184_v4, %v231_v43  ;;  %v356_v56 = vpack.c.bf16 %v337_v42, %v336_v41 }
  0x26   : > { %v292_v57 = vadd.f32 %v1189_v5, %v253_v45  ;;  %v293_v58 = vadd.f32 %v1189_v5, %v254_v46  ;;  %v308_v59 = vadd.f32 %v1189_v5, %v269_v50  ;;  %v322_v63 = vmax.f32 %v290_v44, 0.0  ;;  %1067 = vmatmul.mubr.msk.bf16.gmra.mrb[4].mxu0 %vm408_vm0, %v347_v51 }
  0x27   : > { %v309_v0 = vadd.f32 %v1189_v5, %v270_v54  ;;  %v323_v1 = vmax.f32 %v291_v47, 0.0  ;;  %v338_v2 = vmax.f32 %v306_v48, 0.0  ;;  %v339_v3 = vmax.f32 %v307_v49, 0.0  ;;  %1083 = vmatmul.mubr.msk.bf16.gmra.mrb[4].mxu1 %vm408_vm0, %v355_v52  ;;  %1070 = vmatprep.mubr.msk.bf16.mxu0 %vm408_vm0, %v348_v53 }
  0x28   : > { %v255_v6 = vmul.f32 %v1184_v4, %v216_v55  ;;  %v256_v7 = vmul.f32 %v1184_v4, %v217_v60  ;;  %v271_v8 = vmul.f32 %v1184_v4, %v232_v61  ;;  %v272_v9 = vmul.f32 %v1184_v4, %v233_v62  ;;  %1086 = vmatprep.mubr.msk.bf16.mxu1 %vm408_vm0, %v356_v56 }
  0x29   : > { %v324_v10 = vmax.f32 %v292_v57, 0.0  ;;  %v325_v11 = vmax.f32 %v293_v58, 0.0  ;;  %v340_v12 = vmax.f32 %v308_v59, 0.0  ;;  %v341_v13 = vmax.f32 %v309_v0, 0.0 }
  0x2a   : > { %v349_v14 = vpack.c.bf16 %v323_v1, %v322_v63  ;;  %v357_v15 = vpack.c.bf16 %v339_v3, %v338_v2  ;;  %v294_v16 = vadd.f32 %v1189_v5, %v255_v6  ;;  %v295_v17 = vadd.f32 %v1189_v5, %v256_v7 }
  0x2b   : > { %v310_v18 = vadd.f32 %v1189_v5, %v271_v8  ;;  %v311_v19 = vadd.f32 %v1189_v5, %v272_v9  ;;  %v350_v4 = vpack.c.bf16 %v325_v11, %v324_v10  ;;  %v358_v20 = vpack.c.bf16 %v341_v13, %v340_v12 }
  0x2c   : > { %v326_v21 = vmax.f32 %v294_v16, 0.0  ;;  %v327_v22 = vmax.f32 %v295_v17, 0.0 }
  0x2d   : > { %v342_v23 = vmax.f32 %v310_v18, 0.0  ;;  %v343_v24 = vmax.f32 %v311_v19, 0.0 }
  0x2e   : > { %1071 = vmatmul.mubr.msk.bf16.gmra.mrb[8].mxu0 %vm408_vm0, %v349_v14  ;;  %v351_v25 = vpack.c.bf16 %v327_v22, %v326_v21 }
  0x2f   : > { %1087 = vmatmul.mubr.msk.bf16.gmra.mrb[8].mxu1 %vm408_vm0, %v357_v15  ;;  %1074 = vmatprep.mubr.msk.bf16.mxu0 %vm408_vm0, %v350_v4  ;;  %v359_v26 = vpack.c.bf16 %v343_v24, %v342_v23 }
  0x30   : > { %1090 = vmatprep.mubr.msk.bf16.mxu1 %vm408_vm0, %v358_v20 }
  0x36   : > { %1075 = vmatmul.mubr.msk.bf16.gmra.mrb[12].mxu0 %vm408_vm0, %v351_v25 }
  0x37   : > { %1091 = vmatmul.mubr.msk.bf16.gmra.mrb[12].mxu1 %vm408_vm0, %v359_v26 }
  0xf1   : > { %v1064_v5 = vpop.f32.mrb[0].mxu0 }
  0xf2   : > { %v1080_v27 = vpop.f32.mrb[0].mxu1  ;;  %v491_v28 = vpop.f32.mrb[1].mxu0 }
  0xf3   : > { %v555_v29 = vpop.f32.mrb[1].mxu1  ;;  %v1065_v30 = vpop.f32.mrb[2].mxu0 }
  0xf4   : > { %v1081_v31 = vpop.f32.mrb[2].mxu1  ;;  %v941_v32 = vpack.c.bf16 %v1065_v30, %v1064_v5  ;;  %v494_v34 = vpop.f32.mrb[3].mxu0 }
  0xf5   : > { %v981_v33 = vpack.c.bf16 %v1081_v31, %v1080_v27  ;;  %v558_v35 = vpop.f32.mrb[3].mxu1  ;;  %v936_v36 = vpack.c.bf16 %v494_v34, %v491_v28 }
  0xf6   : > { %v976_v37 = vpack.c.bf16 %v558_v35, %v555_v29  ;;  %1013 = vst [vmem:[%s1313_s16 + $0x8] sm:$0xff] %v941_v32  }
  0xf7   : > { %1021 = vst [vmem:[%s1313_s16 + $0x48] sm:$0xff] %v981_v33   ;;  %937 = vst [vmem:[%s1313_s16] sm:$0xff] %v936_v36  }
  0xf8   : > { %1020 = vst [vmem:[%s1313_s16 + $0x40] sm:$0xff] %v976_v37  }
  0xf9   : > { %v1068_v38 = vpop.f32.mrb[4].mxu0 }
  0xfa   : > { %v1084_v39 = vpop.f32.mrb[4].mxu1  ;;  %v507_v40 = vpop.f32.mrb[5].mxu0 }
  0xfb   : > { %v571_v41 = vpop.f32.mrb[5].mxu1  ;;  %v1069_v42 = vpop.f32.mrb[6].mxu0 }
  0xfc   : > { %v1085_v43 = vpop.f32.mrb[6].mxu1  ;;  %v951_v44 = vpack.c.bf16 %v1069_v42, %v1068_v38  ;;  %v510_v46 = vpop.f32.mrb[7].mxu0 }
  0xfd   : > { %v991_v45 = vpack.c.bf16 %v1085_v43, %v1084_v39  ;;  %v574_v47 = vpop.f32.mrb[7].mxu1  ;;  %v946_v48 = vpack.c.bf16 %v510_v46, %v507_v40 }
  0xfe   : > { %v986_v49 = vpack.c.bf16 %v574_v47, %v571_v41  ;;  %1015 = vst [vmem:[%s1313_s16 + $0x18] sm:$0xff] %v951_v44  }
  0xff   : > { %1023 = vst [vmem:[%s1313_s16 + $0x58] sm:$0xff] %v991_v45   ;;  %1014 = vst [vmem:[%s1313_s16 + $0x10] sm:$0xff] %v946_v48  }
 0x100   : > { %1022 = vst [vmem:[%s1313_s16 + $0x50] sm:$0xff] %v986_v49  }
 0x101   : > { %v1072_v50 = vpop.f32.mrb[8].mxu0 }
 0x102   : > { %v1088_v51 = vpop.f32.mrb[8].mxu1  ;;  %v523_v52 = vpop.f32.mrb[9].mxu0 }
 0x103   : > { %v587_v53 = vpop.f32.mrb[9].mxu1  ;;  %v1073_v54 = vpop.f32.mrb[10].mxu0 }
 0x104   : > { %v1089_v55 = vpop.f32.mrb[10].mxu1  ;;  %v961_v56 = vpack.c.bf16 %v1073_v54, %v1072_v50  ;;  %v526_v58 = vpop.f32.mrb[11].mxu0 }
 0x105   : > { %v1001_v57 = vpack.c.bf16 %v1089_v55, %v1088_v51  ;;  %v590_v59 = vpop.f32.mrb[11].mxu1  ;;  %v956_v60 = vpack.c.bf16 %v526_v58, %v523_v52 }
 0x106   : > { %v996_v61 = vpack.c.bf16 %v590_v59, %v587_v53  ;;  %1017 = vst [vmem:[%s1313_s16 + $0x28] sm:$0xff] %v961_v56  }
 0x107   : > { %1025 = vst [vmem:[%s1313_s16 + $0x68] sm:$0xff] %v1001_v57   ;;  %1016 = vst [vmem:[%s1313_s16 + $0x20] sm:$0xff] %v956_v60  }
 0x108   : > { %1024 = vst [vmem:[%s1313_s16 + $0x60] sm:$0xff] %v996_v61  }
 0x109   : > { %v1076_v62 = vpop.f32.mrb[12].mxu0 }
 0x10a   : > { %v1092_v63 = vpop.f32.mrb[12].mxu1  ;;  %v539_v0 = vpop.f32.mrb[13].mxu0 }
 0x10b   : > { %v603_v1 = vpop.f32.mrb[13].mxu1  ;;  %v1077_v2 = vpop.f32.mrb[14].mxu0 }
 0x10c   : > { %v1093_v3 = vpop.f32.mrb[14].mxu1  ;;  %v971_v6 = vpack.c.bf16 %v1077_v2, %v1076_v62  ;;  %v542_v8 = vpop.f32.mrb[15].mxu0 }
 0x10d   : > { %v1011_v7 = vpack.c.bf16 %v1093_v3, %v1092_v63  ;;  %v606_v9 = vpop.f32.mrb[15].mxu1  ;;  %v966_v10 = vpack.c.bf16 %v542_v8, %v539_v0 }
 0x10e   : > { %v1006_v11 = vpack.c.bf16 %v606_v9, %v603_v1  ;;  %1019 = vst [vmem:[%s1313_s16 + $0x38] sm:$0xff] %v971_v6  }
 0x10f   : > { %1027 = vst [vmem:[%s1313_s16 + $0x78] sm:$0xff] %v1011_v7   ;;  %1018 = vst [vmem:[%s1313_s16 + $0x30] sm:$0xff] %v966_v10  }
 0x110   : > { %1026 = vst [vmem:[%s1313_s16 + $0x70] sm:$0xff] %v1006_v11  }
 0x111 PF: > { %s14_s15 = sadd.s32 1, %s1126_s15  }
 0x112   : > { %p11_p4 = scmp.ge.s32.totalorder %s14_s15, 4  }
 0x114   :  { %13 = sbr.rel (!%p11_p4) target bundleno = 1 (0x1), region = 66 }

// kernel: dense_block_forward.12
= control target key start
LH: loop header
LB: loop body
LE: loop exit
PB: predicated region body
PF: predicated region fallthrough
CT: control target
= control target key end

     0   :  { %s1118_s15 = smov 0   ;;  %s1289_s0 = inlined_call_operand.vmem [shape: f32[512,128], index: 0, kind: input, shape index: {}]   ;;  %s1290_s1 = inlined_call_operand.vmem [shape: f32[1,128], index: 1, kind: input, shape index: {}]   ;;  %s1291_s2 = inlined_call_operand.vmem [shape: f32[1,128], index: 2, kind: input, shape index: {}]   ;;  %s1292_s3 = inlined_call_operand.vmem [shape: bf16[128,128], index: 3, kind: input, shape index: {}]   ;;  %s1293_s4 = inlined_call_operand.vmem [shape: bf16[512,128], index: 4, kind: output, shape index: {}]  }
   0x1 LB: > { %s801_s16 = sadd.s32 4294967295, %s1091_s15   ;;  %p805_p0 = scmp.ge.s32.totalorder %s1091_s15, 1  ;;  %s1091_s15 = sphi %s1118_s15, %s14_s15  }
   0x2   : > { %p163_p1 = scmp.lt.s32.totalorder %s1091_s15, 3 }
   0x4   : > { %p164_p2 = pnand %p805_p0, %p163_p1 }
   0x5   : > { %v1077_v0 = vld [vmem:[%s1292_s3] sm:$0xff] (!%p164_p2)   ;;  %s806_s19 = sshll.u32 (!%p164_p2), %s801_s16, 5  ;;  %v1078_v1 = vld [vmem:[%s1292_s3 + $0x8] sm:$0xff] (!%p164_p2)   ;;  %v1079_v2 = vld [vmem:[%s1292_s3 + $0x10] sm:$0xff] (!%p164_p2)  }
   0x6   : > { %167 = sbr.rel (%p164_p2) target bundleno = 280 (0x118), region = 36  ;;  %p190_p3 = scmp.lt.s32.totalorder (!%p164_p2), %s806_s19, 63  ;;  %1005 = vmatprep.subr.bf16.mxu0 (!%p164_p2), %v1077_v0  ;;  %1053 = vmatprep.subr.bf16.mxu1 (!%p164_p2), %v1077_v0  ;;  %v1080_v3 = vld [vmem:[%s1292_s3 + $0x18] sm:$0xff] (!%p164_p2)   ;;  %v1151_v6 = vld [vmem:[%s1290_s1] ss:$0 sm:$0xff] (!%p164_p2)  ;;  %v1082_v30 = vld [vmem:[%s1292_s3 + $0x28] sm:$0xff] (!%p164_p2)  }
   0x7   : > { %1006 = vmatpush3.bf16.msra.mxu0 (!%p164_p2), %v1077_v0  ;;  %1061 = vmatpush3.bf16.msra.mxu1 (!%p164_p2), %v1077_v0  ;;  %v1158_v9 = vld [vmem:[%s1291_s2] ss:$0 sm:$0xff] (!%p164_p2)  ;;  %v1083_v42 = vld [vmem:[%s1292_s3 + $0x30] sm:$0xff] (!%p164_p2)   ;;  %v1084_v60 = vld [vmem:[%s1292_s3 + $0x38] sm:$0xff] (!%p164_p2)  }
   0x8   : > { %1007 = vmatprep.subr.bf16.mxu0 (!%p164_p2), %v1078_v1  ;;  %1054 = vmatprep.subr.bf16.mxu1 (!%p164_p2), %v1078_v1  ;;  %v1081_v16 = vld [vmem:[%s1292_s3 + $0x20] sm:$0xff] (!%p164_p2)  }
   0xb   : > { %1008 = vmatpush3.bf16.msra.mxu0 (!%p164_p2), %v1078_v1  ;;  %1062 = vmatpush3.bf16.msra.mxu1 (!%p164_p2), %v1078_v1 }
   0xc   : > { %1009 = vmatprep.subr.bf16.mxu0 (!%p164_p2), %v1079_v2  ;;  %1055 = vmatprep.subr.bf16.mxu1 (!%p164_p2), %v1079_v2 }
   0xd   : > { %s1295_s19 = smov (!%p190_p3, %s806_s19), 63 }
   0xe   : > { %s807_s24 = sshll.u32 %s1295_s19, 3  ;;  %s809_s17 = sshll.u32 %s1295_s19, 2 }
   0xf   : > { %s1141_s27 = scalar_lea.vmem %s1289_s0, %s807_s24  ;;  %1010 = vmatpush3.bf16.msra.mxu0 %v1079_v2  ;;  %1063 = vmatpush3.bf16.msra.mxu1 %v1079_v2  ;;  %s1268_s21 = scalar_lea.vmem %s1293_s4, %s809_s17 }
  0x10   : > { %v202_v4 = vld [vmem:[%s1141_s27] sm:$0xff]  ;;  %v203_v5 = vld [vmem:[%s1141_s27 + $0x8] sm:$0xff]  ;;  %1011 = vmatprep.subr.bf16.mxu0 %v1080_v3  ;;  %1056 = vmatprep.subr.bf16.mxu1 %v1080_v3  ;;  %v204_v21 = vld [vmem:[%s1141_s27 + $0x10] sm:$0xff] }
  0x11   : > { %v241_v7 = vmul.f32 %v1151_v6, %v202_v4  ;;  %v242_v8 = vmul.f32 %v1151_v6, %v203_v5  ;;  %v218_v10 = vld [vmem:[%s1141_s27 + $0x80] sm:$0xff]  ;;  %v219_v11 = vld [vmem:[%s1141_s27 + $0x88] sm:$0xff]  ;;  %v205_v24 = vld [vmem:[%s1141_s27 + $0x18] sm:$0xff]  ;;  %v243_v32 = vmul.f32 %v1151_v6, %v204_v21 }
  0x12   : > { %v257_v12 = vmul.f32 %v1151_v6, %v218_v10  ;;  %v258_v13 = vmul.f32 %v1151_v6, %v219_v11  ;;  %v220_v25 = vld [vmem:[%s1141_s27 + $0x90] sm:$0xff]  ;;  %v221_v26 = vld [vmem:[%s1141_s27 + $0x98] sm:$0xff]  ;;  %v206_v28 = vld [vmem:[%s1141_s27 + $0x20] sm:$0xff]  ;;  %v244_v35 = vmul.f32 %v1151_v6, %v205_v24 }
  0x13   : > { %v280_v14 = vadd.f32 %v1158_v9, %v241_v7  ;;  %v281_v15 = vadd.f32 %v1158_v9, %v242_v8  ;;  %1012 = vmatpush3.bf16.msra.mxu0 %v1080_v3  ;;  %1064 = vmatpush3.bf16.msra.mxu1 %v1080_v3  ;;  %v207_v29 = vld [vmem:[%s1141_s27 + $0x28] sm:$0xff]  ;;  %v222_v33 = vld [vmem:[%s1141_s27 + $0xa0] sm:$0xff]  ;;  %v259_v36 = vmul.f32 %v1151_v6, %v220_v25  ;;  %v208_v44 = vld [vmem:[%s1141_s27 + $0x30] sm:$0xff] }
  0x14   : > { %v296_v17 = vadd.f32 %v1158_v9, %v257_v12  ;;  %v297_v18 = vadd.f32 %v1158_v9, %v258_v13  ;;  %1013 = vmatprep.subr.bf16.mxu0 %v1081_v16  ;;  %1057 = vmatprep.subr.bf16.mxu1 %v1081_v16  ;;  %v223_v34 = vld [vmem:[%s1141_s27 + $0xa8] sm:$0xff]  ;;  %v260_v37 = vmul.f32 %v1151_v6, %v221_v26  ;;  %v209_v48 = vld [vmem:[%s1141_s27 + $0x38] sm:$0xff]  ;;  %v224_v49 = vld [vmem:[%s1141_s27 + $0xb0] sm:$0xff] }
  0x15   : > { %v312_v19 = vmax.f32 %v280_v14, 0.0  ;;  %v313_v20 = vmax.f32 %v281_v15, 0.0  ;;  %v245_v38 = vmul.f32 %v1151_v6, %v206_v28  ;;  %v246_v39 = vmul.f32 %v1151_v6, %v207_v29  ;;  %v225_v50 = vld [vmem:[%s1141_s27 + $0xb8] sm:$0xff]  ;;  %v210_v53 = vld [vmem:[%s1141_s27 + $0x40] sm:$0xff]  ;;  %v211_v57 = vld [vmem:[%s1141_s27 + $0x48] sm:$0xff] }
  0x16   : > { %v328_v22 = vmax.f32 %v296_v17, 0.0  ;;  %v329_v23 = vmax.f32 %v297_v18, 0.0  ;;  %v261_v40 = vmul.f32 %v1151_v6, %v222_v33  ;;  %v262_v41 = vmul.f32 %v1151_v6, %v223_v34  ;;  %v226_v58 = vld [vmem:[%s1141_s27 + $0xc0] sm:$0xff]  ;;  %v227_v59 = vld [vmem:[%s1141_s27 + $0xc8] sm:$0xff]  ;;  %v213_v25 = vld [vmem:[%s1141_s27 + $0x58] sm:$0xff] }
  0x17   : > { %v344_v27 = vpack.c.bf16 %v313_v20, %v312_v19  ;;  %1014 = vmatpush3.bf16.msra.mxu0 %v1081_v16  ;;  %1065 = vmatpush3.bf16.msra.mxu1 %v1081_v16  ;;  %v282_v43 = vadd.f32 %v1158_v9, %v243_v32  ;;  %v283_v45 = vadd.f32 %v1158_v9, %v244_v35  ;;  %v212_v20 = vld [vmem:[%s1141_s27 + $0x50] sm:$0xff] }
  0x18   : > { %v352_v31 = vpack.c.bf16 %v329_v23, %v328_v22  ;;  %1015 = vmatprep.subr.bf16.mxu0 %v1082_v30  ;;  %1058 = vmatprep.subr.bf16.mxu1 %v1082_v30  ;;  %v298_v46 = vadd.f32 %v1158_v9, %v259_v36  ;;  %v299_v47 = vadd.f32 %v1158_v9, %v260_v37  ;;  %v228_v26 = vld [vmem:[%s1141_s27 + $0xd0] sm:$0xff]  ;;  %v215_v36 = vld [vmem:[%s1141_s27 + $0x68] sm:$0xff]  ;;  %v230_v37 = vld [vmem:[%s1141_s27 + $0xe0] sm:$0xff] }
  0x19   : > { %1021 = vmatprep.mubr.bf16.mxu0 %v344_v27  ;;  %v284_v51 = vadd.f32 %v1158_v9, %v245_v38  ;;  %v285_v52 = vadd.f32 %v1158_v9, %v246_v39  ;;  %v300_v54 = vadd.f32 %v1158_v9, %v261_v40  ;;  %v301_v55 = vadd.f32 %v1158_v9, %v262_v41  ;;  %v229_v27 = vld [vmem:[%s1141_s27 + $0xd8] sm:$0xff]  ;;  %v231_v38 = vld [vmem:[%s1141_s27 + $0xe8] sm:$0xff] }
  0x1a   : > { %1037 = vmatprep.mubr.bf16.mxu1 %v352_v31  ;;  %v247_v56 = vmul.f32 %v1151_v6, %v208_v44  ;;  %v314_v61 = vmax.f32 %v282_v43, 0.0  ;;  %v248_v62 = vmul.f32 %v1151_v6, %v209_v48  ;;  %v263_v63 = vmul.f32 %v1151_v6, %v224_v49  ;;  %v214_v31 = vld [vmem:[%s1141_s27 + $0x60] sm:$0xff] }
  0x1b   : > { %1016 = vmatpush3.bf16.msra.mxu0 %v1082_v30  ;;  %1066 = vmatpush3.bf16.msra.mxu1 %v1082_v30  ;;  %v264_v0 = vmul.f32 %v1151_v6, %v225_v50  ;;  %v315_v1 = vmax.f32 %v283_v45, 0.0  ;;  %v330_v2 = vmax.f32 %v298_v46, 0.0  ;;  %v331_v3 = vmax.f32 %v299_v47, 0.0 }
  0x1c   : > { %1017 = vmatprep.subr.bf16.mxu0 %v1083_v42  ;;  %1059 = vmatprep.subr.bf16.mxu1 %v1083_v42  ;;  %v249_v4 = vmul.f32 %v1151_v6, %v210_v53  ;;  %v316_v5 = vmax.f32 %v284_v51, 0.0  ;;  %v250_v7 = vmul.f32 %v1151_v6, %v211_v57  ;;  %v265_v8 = vmul.f32 %v1151_v6, %v226_v58  ;;  %v216_v58 = vld [vmem:[%s1141_s27 + $0x70] sm:$0xff] }
  0x1d   : > { %v266_v10 = vmul.f32 %v1151_v6, %v227_v59  ;;  %v317_v11 = vmax.f32 %v285_v52, 0.0  ;;  %v332_v12 = vmax.f32 %v300_v54, 0.0  ;;  %v333_v13 = vmax.f32 %v301_v55, 0.0 }
  0x1e   : > { %v286_v14 = vadd.f32 %v1158_v9, %v247_v56  ;;  %v287_v15 = vadd.f32 %v1158_v9, %v248_v62  ;;  %v302_v16 = vadd.f32 %v1158_v9, %v263_v63  ;;  %v303_v17 = vadd.f32 %v1158_v9, %v264_v0  ;;  %v217_v63 = vld [vmem:[%s1141_s27 + $0x78] sm:$0xff]  ;;  %v232_v0 = vld [vmem:[%s1141_s27 + $0xf0] sm:$0xff] }
  0x1f   : > { %1018 = vmatpush3.bf16.msra.mxu0 %v1083_v42  ;;  %1067 = vmatpush3.bf16.msra.mxu1 %v1083_v42  ;;  %v345_v18 = vpack.c.bf16 %v315_v1, %v314_v61  ;;  %v288_v19 = vadd.f32 %v1158_v9, %v249_v4  ;;  %v353_v21 = vpack.c.bf16 %v331_v3, %v330_v2  ;;  %v233_v1 = vld [vmem:[%s1141_s27 + $0xf8] sm:$0xff] }
  0x20   : > { %1019 = vmatprep.subr.bf16.mxu0 %v1084_v60  ;;  %1060 = vmatprep.subr.bf16.mxu1 %v1084_v60  ;;  %v289_v22 = vadd.f32 %v1158_v9, %v250_v7  ;;  %v304_v23 = vadd.f32 %v1158_v9, %v265_v8  ;;  %v305_v24 = vadd.f32 %v1158_v9, %v266_v10  ;;  %v318_v30 = vmax.f32 %v286_v14, 0.0 }
  0x21   : > { %v346_v28 = vpack.c.bf16 %v317_v11, %v316_v5  ;;  %v354_v29 = vpack.c.bf16 %v333_v13, %v332_v12  ;;  %v319_v32 = vmax.f32 %v287_v15, 0.0  ;;  %v334_v33 = vmax.f32 %v302_v16, 0.0 }
  0x22   : > { %v335_v34 = vmax.f32 %v303_v17, 0.0  ;;  %v251_v35 = vmul.f32 %v1151_v6, %v212_v20  ;;  %v320_v39 = vmax.f32 %v288_v19, 0.0  ;;  %v252_v40 = vmul.f32 %v1151_v6, %v213_v25 }
  0x23   : > { %1020 = vmatpush3.bf16.msra.mxu0 %v1084_v60  ;;  %1068 = vmatpush3.bf16.msra.mxu1 %v1084_v60  ;;  %v267_v41 = vmul.f32 %v1151_v6, %v228_v26  ;;  %v268_v42 = vmul.f32 %v1151_v6, %v229_v27  ;;  %v321_v43 = vmax.f32 %v289_v22, 0.0  ;;  %v336_v44 = vmax.f32 %v304_v23, 0.0 }
  0x24   : > { %v337_v45 = vmax.f32 %v305_v24, 0.0  ;;  %v253_v46 = vmul.f32 %v1151_v6, %v214_v31  ;;  %v254_v47 = vmul.f32 %v1151_v6, %v215_v36  ;;  %v269_v48 = vmul.f32 %v1151_v6, %v230_v37 }
  0x25   : > { %v270_v49 = vmul.f32 %v1151_v6, %v231_v38  ;;  %v290_v50 = vadd.f32 %v1158_v9, %v251_v35  ;;  %v291_v51 = vadd.f32 %v1158_v9, %v252_v40  ;;  %v306_v52 = vadd.f32 %v1158_v9, %v267_v41 }
  0x26   : > { %1022 = vmatmul.mubr.bf16.vlgmr.msra.gmra.mrb[0].mxu0 %v345_v18  ;;  %1038 = vmatmul.mubr.bf16.vlgmr.msra.gmra.mrb[0].mxu1 %v353_v21  ;;  %v307_v53 = vadd.f32 %v1158_v9, %v268_v42  ;;  %v347_v54 = vpack.c.bf16 %v319_v32, %v318_v30  ;;  %v355_v55 = vpack.c.bf16 %v335_v34, %v334_v33 }
  0x27   : > { %1025 = vmatprep.mubr.bf16.mxu0 %v346_v28  ;;  %1041 = vmatprep.mubr.bf16.mxu1 %v354_v29  ;;  %v348_v56 = vpack.c.bf16 %v321_v43, %v320_v39  ;;  %v356_v57 = vpack.c.bf16 %v337_v45, %v336_v44  ;;  %v292_v59 = vadd.f32 %v1158_v9, %v253_v46  ;;  %v322_v2 = vmax.f32 %v290_v50, 0.0 }
  0x28   : > { %v293_v60 = vadd.f32 %v1158_v9, %v254_v47  ;;  %v308_v61 = vadd.f32 %v1158_v9, %v269_v48  ;;  %v309_v62 = vadd.f32 %v1158_v9, %v270_v49  ;;  %v323_v3 = vmax.f32 %v291_v51, 0.0 }
  0x29   : > { %v338_v4 = vmax.f32 %v306_v52, 0.0  ;;  %v339_v5 = vmax.f32 %v307_v53, 0.0  ;;  %v255_v7 = vmul.f32 %v1151_v6, %v216_v58  ;;  %v256_v8 = vmul.f32 %v1151_v6, %v217_v63 }
  0x2a   : > { %v271_v10 = vmul.f32 %v1151_v6, %v232_v0  ;;  %v272_v11 = vmul.f32 %v1151_v6, %v233_v1  ;;  %v324_v12 = vmax.f32 %v292_v59, 0.0  ;;  %v325_v13 = vmax.f32 %v293_v60, 0.0 }
  0x2b   : > { %v340_v14 = vmax.f32 %v308_v61, 0.0  ;;  %v341_v15 = vmax.f32 %v309_v62, 0.0  ;;  %v349_v16 = vpack.c.bf16 %v323_v3, %v322_v2  ;;  %v357_v17 = vpack.c.bf16 %v339_v5, %v338_v4 }
  0x2c   : > { %v294_v18 = vadd.f32 %v1158_v9, %v255_v7  ;;  %v295_v19 = vadd.f32 %v1158_v9, %v256_v8  ;;  %v310_v20 = vadd.f32 %v1158_v9, %v271_v10  ;;  %v311_v21 = vadd.f32 %v1158_v9, %v272_v11 }
  0x2d   : > { %v350_v22 = vpack.c.bf16 %v325_v13, %v324_v12  ;;  %v358_v23 = vpack.c.bf16 %v341_v15, %v340_v14 }
  0x2e   : > { %1026 = vmatmul.mubr.bf16.gmra.mrb[4].mxu0 %v347_v54  ;;  %1042 = vmatmul.mubr.bf16.gmra.mrb[4].mxu1 %v355_v55  ;;  %v326_v6 = vmax.f32 %v294_v18, 0.0  ;;  %v327_v24 = vmax.f32 %v295_v19, 0.0  ;;  %v342_v25 = vmax.f32 %v310_v20, 0.0  ;;  %v343_v26 = vmax.f32 %v311_v21, 0.0 }
  0x2f   : > { %1029 = vmatprep.mubr.bf16.mxu0 %v348_v56  ;;  %1045 = vmatprep.mubr.bf16.mxu1 %v356_v57 }
  0x30   : > { %v351_v27 = vpack.c.bf16 %v327_v24, %v326_v6  ;;  %v359_v28 = vpack.c.bf16 %v343_v26, %v342_v25 }
  0x36   : > { %1030 = vmatmul.mubr.bf16.gmra.mrb[8].mxu0 %v349_v16  ;;  %1046 = vmatmul.mubr.bf16.gmra.mrb[8].mxu1 %v357_v17 }
  0x37   : > { %1033 = vmatprep.mubr.bf16.mxu0 %v350_v22  ;;  %1049 = vmatprep.mubr.bf16.mxu1 %v358_v23 }
  0x3e   : > { %1034 = vmatmul.mubr.bf16.gmra.mrb[12].mxu0 %v351_v27  ;;  %1050 = vmatmul.mubr.bf16.gmra.mrb[12].mxu1 %v359_v28 }
  0xf9   : > { %v1023_v29 = vpop.f32.mrb[0].mxu0  ;;  %v1039_v30 = vpop.f32.mrb[0].mxu1 }
  0xfa   : > { %v458_v31 = vpop.f32.mrb[1].mxu0  ;;  %v522_v32 = vpop.f32.mrb[1].mxu1 }
  0xfb   : > { %v1024_v9 = vpop.f32.mrb[2].mxu0  ;;  %v1040_v33 = vpop.f32.mrb[2].mxu1 }
  0xfc   : > { %v894_v34 = vpack.c.bf16 %v1024_v9, %v1023_v29  ;;  %v934_v35 = vpack.c.bf16 %v1040_v33, %v1039_v30  ;;  %v461_v36 = vpop.f32.mrb[3].mxu0  ;;  %v525_v37 = vpop.f32.mrb[3].mxu1 }
  0xfd   : > { %v889_v38 = vpack.c.bf16 %v461_v36, %v458_v31  ;;  %v929_v39 = vpack.c.bf16 %v525_v37, %v522_v32 }
  0xfe   : > { %966 = vst [vmem:[%s1268_s21 + $0x8] sm:$0xff] %v894_v34   ;;  %974 = vst [vmem:[%s1268_s21 + $0x48] sm:$0xff] %v934_v35  }
  0xff   : > { %890 = vst [vmem:[%s1268_s21] sm:$0xff] %v889_v38   ;;  %973 = vst [vmem:[%s1268_s21 + $0x40] sm:$0xff] %v929_v39  }
 0x101   : > { %v1027_v40 = vpop.f32.mrb[4].mxu0  ;;  %v1043_v41 = vpop.f32.mrb[4].mxu1 }
 0x102   : > { %v474_v42 = vpop.f32.mrb[5].mxu0  ;;  %v538_v43 = vpop.f32.mrb[5].mxu1 }
 0x103   : > { %v1028_v44 = vpop.f32.mrb[6].mxu0  ;;  %v1044_v45 = vpop.f32.mrb[6].mxu1 }
 0x104   : > { %v904_v46 = vpack.c.bf16 %v1028_v44, %v1027_v40  ;;  %v944_v47 = vpack.c.bf16 %v1044_v45, %v1043_v41  ;;  %v477_v48 = vpop.f32.mrb[7].mxu0  ;;  %v541_v49 = vpop.f32.mrb[7].mxu1 }
 0x105   : > { %v899_v50 = vpack.c.bf16 %v477_v48, %v474_v42  ;;  %v939_v51 = vpack.c.bf16 %v541_v49, %v538_v43 }
 0x106   : > { %968 = vst [vmem:[%s1268_s21 + $0x18] sm:$0xff] %v904_v46   ;;  %976 = vst [vmem:[%s1268_s21 + $0x58] sm:$0xff] %v944_v47  }
 0x107   : > { %967 = vst [vmem:[%s1268_s21 + $0x10] sm:$0xff] %v899_v50   ;;  %975 = vst [vmem:[%s1268_s21 + $0x50] sm:$0xff] %v939_v51  }
 0x109   : > { %v1031_v52 = vpop.f32.mrb[8].mxu0  ;;  %v1047_v53 = vpop.f32.mrb[8].mxu1 }
 0x10a   : > { %v490_v54 = vpop.f32.mrb[9].mxu0  ;;  %v554_v55 = vpop.f32.mrb[9].mxu1 }
 0x10b   : > { %v1032_v56 = vpop.f32.mrb[10].mxu0  ;;  %v1048_v57 = vpop.f32.mrb[10].mxu1 }
 0x10c   : > { %v914_v58 = vpack.c.bf16 %v1032_v56, %v1031_v52  ;;  %v954_v59 = vpack.c.bf16 %v1048_v57, %v1047_v53  ;;  %v493_v60 = vpop.f32.mrb[11].mxu0  ;;  %v557_v61 = vpop.f32.mrb[11].mxu1 }
 0x10d   : > { %v909_v62 = vpack.c.bf16 %v493_v60, %v490_v54  ;;  %v949_v63 = vpack.c.bf16 %v557_v61, %v554_v55 }
 0x10e   : > { %970 = vst [vmem:[%s1268_s21 + $0x28] sm:$0xff] %v914_v58   ;;  %978 = vst [vmem:[%s1268_s21 + $0x68] sm:$0xff] %v954_v59  }
 0x10f   : > { %969 = vst [vmem:[%s1268_s21 + $0x20] sm:$0xff] %v909_v62   ;;  %977 = vst [vmem:[%s1268_s21 + $0x60] sm:$0xff] %v949_v63  }
 0x111   : > { %v1035_v0 = vpop.f32.mrb[12].mxu0  ;;  %v1051_v1 = vpop.f32.mrb[12].mxu1 }
 0x112   : > { %v506_v2 = vpop.f32.mrb[13].mxu0  ;;  %v570_v3 = vpop.f32.mrb[13].mxu1 }
 0x113   : > { %v1036_v4 = vpop.f32.mrb[14].mxu0  ;;  %v1052_v5 = vpop.f32.mrb[14].mxu1 }
 0x114   : > { %v924_v7 = vpack.c.bf16 %v1036_v4, %v1035_v0  ;;  %v964_v8 = vpack.c.bf16 %v1052_v5, %v1051_v1  ;;  %v509_v10 = vpop.f32.mrb[15].mxu0  ;;  %v573_v11 = vpop.f32.mrb[15].mxu1 }
 0x115   : > { %v919_v12 = vpack.c.bf16 %v509_v10, %v506_v2  ;;  %v959_v13 = vpack.c.bf16 %v573_v11, %v570_v3 }
 0x116   : > { %972 = vst [vmem:[%s1268_s21 + $0x38] sm:$0xff] %v924_v7   ;;  %980 = vst [vmem:[%s1268_s21 + $0x78] sm:$0xff] %v964_v8  }
 0x117   : > { %971 = vst [vmem:[%s1268_s21 + $0x30] sm:$0xff] %v919_v12   ;;  %979 = vst [vmem:[%s1268_s21 + $0x70] sm:$0xff] %v959_v13  }
 0x118 PF: > { %s14_s15 = sadd.s32 1, %s1091_s15  }
 0x119   : > { %p11_p4 = scmp.ge.s32.totalorder %s14_s15, 4  }
 0x11b   :  { %13 = sbr.rel (!%p11_p4) target bundleno = 1 (0x1), region = 66 }

// kernel: dense_block_forward.9
= control target key start
LH: loop header
LB: loop body
LE: loop exit
PB: predicated region body
PF: predicated region fallthrough
CT: control target
= control target key end

     0   :  { %s3592_s9 = smov 0   ;;  %s4368_s0 = inlined_call_operand.vmem [shape: bf16[512,1152], index: 0, kind: input, shape index: {}]   ;;  %s4369_s1 = inlined_call_operand.vmem [shape: bf16[1152,32], index: 1, kind: input, shape index: {}]   ;;  %s4370_s2 = inlined_call_operand.vmem [shape: f32[512,32], index: 2, kind: output, shape index: {}]  }
   0x1 LB: > { %s2517_s10 = sadd.s32 4294967295, %s3575_s9   ;;  %p2521_p0 = scmp.ge.s32.totalorder %s3575_s9, 1  ;;  %s3575_s9 = sphi %s3592_s9, %s12_s9  }
   0x2   : > { %p114_p1 = scmp.lt.s32.totalorder %s3575_s9, 3 }
   0x4   : > { %p115_p2 = pnand %p2521_p0, %p114_p1 }
   0x5   : > { %v3289_v0 = vld [vmem:[%s4369_s1 + $0x40] sm:$0xff] (!%p115_p2)   ;;  %s2522_s13 = sshll.u32 (!%p115_p2), %s2517_s10, 5  ;;  %v3291_v2 = vld [vmem:[%s4369_s1 + $0x48] sm:$0xff] (!%p115_p2)   ;;  %v3293_v4 = vld [vmem:[%s4369_s1 + $0x50] sm:$0xff] (!%p115_p2)   ;;  %vm2428_vm0 = vcmask (!%p115_p2), 261120  }
   0x6   : > { %118 = sbr.rel (%p115_p2) target bundleno = 540 (0x21c), region = 28  ;;  %v3290_v1 = vld [vmem:[%s4369_s1] sm:$0xff] (!%p115_p2)   ;;  %2744 = vmatprep.subr.bf16.mxu0 (!%p115_p2), %v3289_v0  ;;  %3264 = vmatprep.subr.bf16.mxu1 (!%p115_p2), %v3289_v0  ;;  %p138_p3 = scmp.lt.s32.totalorder (!%p115_p2), %s2522_s13, 63  ;;  %v3292_v3 = vld [vmem:[%s4369_s1 + $0x8] sm:$0xff] (!%p115_p2)   ;;  %v3294_v5 = vld [vmem:[%s4369_s1 + $0x10] sm:$0xff] (!%p115_p2)  }
   0x7   : > { %2745 = vmatpush3.bf16.msra.mxu0 (!%p115_p2), %v3290_v1  ;;  %3272 = vmatpush3.bf16.msra.mxu1 (!%p115_p2), %v3290_v1  ;;  %v3295_v6 = vld [vmem:[%s4369_s1 + $0x58] sm:$0xff] (!%p115_p2)   ;;  %v3297_v8 = vld [vmem:[%s4369_s1 + $0x60] sm:$0xff] (!%p115_p2)   ;;  %v3299_v10 = vld [vmem:[%s4369_s1 + $0x68] sm:$0xff] (!%p115_p2)  }
   0x8   : > { %2746 = vmatprep.subr.bf16.mxu0 (!%p115_p2), %v3291_v2  ;;  %3265 = vmatprep.subr.bf16.mxu1 (!%p115_p2), %v3291_v2  ;;  %v3296_v7 = vld [vmem:[%s4369_s1 + $0x18] sm:$0xff] (!%p115_p2)   ;;  %v3298_v9 = vld [vmem:[%s4369_s1 + $0x20] sm:$0xff] (!%p115_p2)   ;;  %v3300_v13 = vld [vmem:[%s4369_s1 + $0x28] sm:$0xff] (!%p115_p2)  }
   0x9   : > { %v3301_v14 = vld [vmem:[%s4369_s1 + $0x70] sm:$0xff] (!%p115_p2)   ;;  %v3303_v16 = vld [vmem:[%s4369_s1 + $0x78] sm:$0xff] (!%p115_p2)   ;;  %v3311_v18 = vld [vmem:[%s4369_s1 + $0xc0] sm:$0xff] (!%p115_p2)  }
   0xa   : > { %v3302_v15 = vld [vmem:[%s4369_s1 + $0x30] sm:$0xff] (!%p115_p2)   ;;  %v3304_v17 = vld [vmem:[%s4369_s1 + $0x38] sm:$0xff] (!%p115_p2)   ;;  %v3314_v21 = vld [vmem:[%s4369_s1 + $0x140] sm:$0xff] (!%p115_p2)  }
   0xb   : > { %2747 = vmatpush3.bf16.msra.mxu0 (!%p115_p2), %v3292_v3  ;;  %3273 = vmatpush3.bf16.msra.mxu1 (!%p115_p2), %v3292_v3  ;;  %v3312_v22 = vld [vmem:[%s4369_s1 + $0x80] sm:$0xff] (!%p115_p2)   ;;  %v3313_v23 = vld [vmem:[%s4369_s1 + $0xc8] sm:$0xff] (!%p115_p2)   ;;  %v3323_v31 = vld [vmem:[%s4369_s1 + $0xd0] sm:$0xff] (!%p115_p2)  }
   0xc   : > { %2748 = vmatprep.subr.bf16.mxu0 (!%p115_p2), %v3293_v4  ;;  %3266 = vmatprep.subr.bf16.mxu1 (!%p115_p2), %v3293_v4  ;;  %v3316_v24 = vld [vmem:[%s4369_s1 + $0x100] sm:$0xff] (!%p115_p2)   ;;  %v3315_v27 = vld [vmem:[%s4369_s1 + $0x88] sm:$0xff] (!%p115_p2)   ;;  %v3324_v32 = vld [vmem:[%s4369_s1 + $0x90] sm:$0xff] (!%p115_p2)  }
   0xd   : > { %s4372_s13 = smov (!%p138_p3, %s2522_s13), 63  ;;  %v3334_v28 = vld [vmem:[%s4369_s1 + $0x148] sm:$0xff]   ;;  %v3325_v34 = vld [vmem:[%s4369_s1 + $0xd8] sm:$0xff]   ;;  %v3333_v40 = vld [vmem:[%s4369_s1 + $0xe0] sm:$0xff]  }
   0xe   : > { %s3280_s26 = smul.u32 36, %s4372_s13  ;;  %v3336_v33 = vld [vmem:[%s4369_s1 + $0x108] sm:$0xff]   ;;  %v3326_v37 = vld [vmem:[%s4369_s1 + $0x98] sm:$0xff]   ;;  %v3335_v41 = vld [vmem:[%s4369_s1 + $0xa0] sm:$0xff]  }
   0xf   : > { %2749 = vmatpush3.bf16.msra.mxu0 %v3294_v5  ;;  %3274 = vmatpush3.bf16.msra.mxu1 %v3294_v5  ;;  %v3337_v42 = vld [vmem:[%s4369_s1 + $0xe8] sm:$0xff]   ;;  %v3348_v43 = vld [vmem:[%s4369_s1 + $0x150] sm:$0xff]   ;;  %v3347_v52 = vld [vmem:[%s4369_s1 + $0xf8] sm:$0xff]  }
  0x10   : > { %2750 = vmatprep.subr.bf16.mxu0 %v3295_v6  ;;  %3267 = vmatprep.subr.bf16.mxu1 %v3295_v6  ;;  %s3633_s5 = scalar_lea.vmem %s4368_s0, %s3280_s26  ;;  %v3350_v46 = vld [vmem:[%s4369_s1 + $0x110] sm:$0xff]   ;;  %v3338_v47 = vld [vmem:[%s4369_s1 + $0xa8] sm:$0xff]   ;;  %v3365_v55 = vld [vmem:[%s4369_s1 + $0x158] sm:$0xff]  }
  0x11   : > { %v3307_v11 = vld [vmem:[%s3633_s5 + $0x4] ss:$36 sps:$4 sm:$0xff]   ;;  %v3317_v25 = vld [vmem:[%s3633_s5 + $0x4c] ss:$36 sps:$4 sm:$0xff]   ;;  %v3327_v35 = vld [vmem:[%s3633_s5 + $0x94] ss:$36 sps:$4 sm:$0xff]  }
  0x12   : > { %v3310_v12 = vld [vmem:[%s3633_s5 + $0x364] ss:$36 sps:$4 sm:$0xff]   ;;  %1655 = vmatprep.mubr.bf16.mxu0 %v3307_v11  ;;  %v3319_v26 = vld [vmem:[%s3633_s5 + $0x3ac] ss:$36 sps:$4 sm:$0xff]   ;;  %v3329_v36 = vld [vmem:[%s3633_s5 + $0x3f4] ss:$36 sps:$4 sm:$0xff]  }
  0x13   : > { %2751 = vmatpush3.bf16.msra.mxu0 %v3296_v7  ;;  %3275 = vmatpush3.bf16.msra.mxu1 %v3296_v7  ;;  %v3305_v19 = vld [vmem:[%s3633_s5] ss:$36 sps:$4 sm:$0xff]   ;;  %v3321_v29 = vld [vmem:[%s3633_s5 + $0x48] ss:$36 sps:$4 sm:$0xff]   ;;  %v3331_v38 = vld [vmem:[%s3633_s5 + $0x90] ss:$36 sps:$4 sm:$0xff]  }
  0x14   : > { %2752 = vmatprep.subr.bf16.mxu0 %v3297_v8  ;;  %3268 = vmatprep.subr.bf16.mxu1 %v3297_v8  ;;  %v3308_v20 = vld [vmem:[%s3633_s5 + $0x360] ss:$36 sps:$4 sm:$0xff]   ;;  %v3322_v30 = vld [vmem:[%s3633_s5 + $0x3a8] ss:$36 sps:$4 sm:$0xff]   ;;  %v3332_v39 = vld [vmem:[%s3633_s5 + $0x3f0] ss:$36 sps:$4 sm:$0xff]  }
  0x15   : > { %1751 = vmatprep.mubr.bf16.mxu1 %v3310_v12  ;;  %v3339_v44 = vld [vmem:[%s3633_s5 + $0xdc] ss:$36 sps:$4 sm:$0xff]   ;;  %v3345_v48 = vld [vmem:[%s4369_s1 + $0xf0] sm:$0xff]   ;;  %v3351_v53 = vld [vmem:[%s3633_s5 + $0x124] ss:$36 sps:$4 sm:$0xff]  }
  0x16   : > { %v3341_v45 = vld [vmem:[%s3633_s5 + $0x43c] ss:$36 sps:$4 sm:$0xff]   ;;  %v3346_v51 = vld [vmem:[%s4369_s1 + $0xb0] sm:$0xff]   ;;  %v3353_v58 = vld [vmem:[%s3633_s5 + $0x8] ss:$36 sps:$4 sm:$0xff]  }
  0x17   : > { %2753 = vmatpush3.bf16.msra.mxu0 %v3298_v9  ;;  %3276 = vmatpush3.bf16.msra.mxu1 %v3298_v9  ;;  %v3343_v49 = vld [vmem:[%s3633_s5 + $0xd8] ss:$36 sps:$4 sm:$0xff]   ;;  %v3355_v54 = vld [vmem:[%s3633_s5 + $0xc] ss:$36 sps:$4 sm:$0xff]   ;;  %v3356_v59 = vld [vmem:[%s3633_s5 + $0x120] ss:$36 sps:$4 sm:$0xff]  }
  0x18   : > { %2754 = vmatprep.subr.bf16.mxu0 %v3299_v10  ;;  %3269 = vmatprep.subr.bf16.mxu1 %v3299_v10  ;;  %v3344_v50 = vld [vmem:[%s3633_s5 + $0x438] ss:$36 sps:$4 sm:$0xff]   ;;  %v3357_v60 = vld [vmem:[%s4369_s1 + $0x1c0] sm:$0xff]   ;;  %v3359_v62 = vld [vmem:[%s3633_s5 + $0x16c] ss:$36 sps:$4 sm:$0xff]  }
  0x19   : > { %v3366_v56 = vld [vmem:[%s4369_s1 + $0x118] sm:$0xff]   ;;  %v3358_v61 = vld [vmem:[%s4369_s1 + $0x180] sm:$0xff]   ;;  %v3373_v1 = vld [vmem:[%s4369_s1 + $0x1c8] sm:$0xff]  }
  0x1a   : > { %v3349_v57 = vld [vmem:[%s4369_s1 + $0xb8] sm:$0xff]   ;;  %v3375_v0 = vld [vmem:[%s4369_s1 + $0x160] sm:$0xff]   ;;  %v3374_v3 = vld [vmem:[%s4369_s1 + $0x188] sm:$0xff]  }
  0x1b   : > { %2755 = vmatpush3.bf16.msra.mxu0 %v3300_v13  ;;  %3277 = vmatpush3.bf16.msra.mxu1 %v3300_v13  ;;  %v3361_v63 = vld [vmem:[%s3633_s5 + $0x54] ss:$36 sps:$4 sm:$0xff]   ;;  %v3376_v2 = vld [vmem:[%s4369_s1 + $0x120] sm:$0xff]   ;;  %v3363_v4 = vld [vmem:[%s3633_s5 + $0x168] ss:$36 sps:$4 sm:$0xff]  }
  0x1c   : > { %2756 = vmatprep.subr.bf16.mxu0 %v3301_v14  ;;  %3270 = vmatprep.subr.bf16.mxu1 %v3301_v14  ;;  %v3364_v5 = vld [vmem:[%s3633_s5 + $0x50] ss:$36 sps:$4 sm:$0xff]   ;;  %v3369_v7 = vld [vmem:[%s3633_s5 + $0x9c] ss:$36 sps:$4 sm:$0xff]   ;;  %v3389_v8 = vld [vmem:[%s4369_s1 + $0x168] sm:$0xff]  }
  0x1d   : > { %v3367_v6 = vld [vmem:[%s3633_s5 + $0x1b4] ss:$36 sps:$4 sm:$0xff]   ;;  %v3391_v10 = vld [vmem:[%s4369_s1 + $0x128] sm:$0xff]   ;;  %v3377_v14 = vld [vmem:[%s3633_s5 + $0x1fc] ss:$36 sps:$4 sm:$0xff]  }
  0x1e   : > { %v3390_v9 = vld [vmem:[%s4369_s1 + $0x1d0] sm:$0xff]   ;;  %v3372_v13 = vld [vmem:[%s3633_s5 + $0x98] ss:$36 sps:$4 sm:$0xff]  }
  0x1f   : > { %2757 = vmatpush3.bf16.msra.mxu0 %v3302_v15  ;;  %3278 = vmatpush3.bf16.msra.mxu1 %v3302_v15  ;;  %v3392_v11 = vld [vmem:[%s4369_s1 + $0x190] sm:$0xff]  }
  0x20   : > { %2758 = vmatprep.subr.bf16.mxu0 %v3303_v16  ;;  %3271 = vmatprep.subr.bf16.mxu1 %v3303_v16  ;;  %v3371_v12 = vld [vmem:[%s3633_s5 + $0x1b0] ss:$36 sps:$4 sm:$0xff]  }
  0x21   : > { %v3399_v15 = vld [vmem:[%s4369_s1 + $0x170] sm:$0xff]  }
  0x22   : > { %v3400_v16 = vld [vmem:[%s4369_s1 + $0x130] sm:$0xff]  }
  0x23   : > { %2759 = vmatpush3.bf16.msra.mxu0 %v3304_v17  ;;  %3279 = vmatpush3.bf16.msra.mxu1 %v3304_v17  ;;  %v3379_v17 = vld [vmem:[%s3633_s5 + $0xe4] ss:$36 sps:$4 sm:$0xff]  }
  0x24   : > { %2856 = vmatprep.subr.bf16.mxu1 %v3311_v18  ;;  %2968 = vmatprep.subr.bf16.mxu0 %v3314_v21  ;;  %v3407_v18 = vld [vmem:[%s4369_s1 + $0x1d8] sm:$0xff]   ;;  %v3382_v21 = vld [vmem:[%s3633_s5 + $0xe0] ss:$36 sps:$4 sm:$0xff]  }
  0x26   : > { %1656 = vmatmul.mubr.bf16.vlgmr.msra.gmra.mrb[0].mxu0 %v3305_v19  ;;  %1752 = vmatmul.mubr.bf16.vlgmr.msra.gmra.mrb[0].mxu1 %v3308_v20  ;;  %v3408_v19 = vld [vmem:[%s4369_s1 + $0x198] sm:$0xff]  }
  0x27   : > { %2857 = vmatpush3.bf16.msra.mxu1 %v3312_v22  ;;  %2969 = vmatpush3.bf16.msra.mxu0 %v3316_v24  ;;  %v3381_v20 = vld [vmem:[%s3633_s5 + $0x1f8] ss:$36 sps:$4 sm:$0xff]   ;;  %v3383_v22 = vld [vmem:[%s3633_s5 + $0x244] ss:$36 sps:$4 sm:$0xff]  }
  0x28   : > { %2858 = vmatprep.subr.bf16.mxu1 %v3313_v23  ;;  %1663 = vmatprep.mubr.bf16.mxu0 %v3317_v25  ;;  %v3385_v23 = vld [vmem:[%s3633_s5 + $0x12c] ss:$36 sps:$4 sm:$0xff]   ;;  %v3415_v24 = vld [vmem:[%s4369_s1 + $0x178] sm:$0xff]  }
  0x29   : > { %1759 = vmatprep.mubr.bf16.mxu1 %v3319_v26  ;;  %2970 = vmatprep.subr.bf16.mxu0 %v3334_v28  ;;  %v3416_v25 = vld [vmem:[%s4369_s1 + $0x138] sm:$0xff]   ;;  %v3423_v26 = vld [vmem:[%s4369_s1 + $0x1e0] sm:$0xff]  }
  0x2a   : > { %v3424_v28 = vld [vmem:[%s4369_s1 + $0x1a0] sm:$0xff]  }
  0x2b   : > { %2859 = vmatpush3.bf16.msra.mxu1 %v3315_v27  ;;  %2971 = vmatpush3.bf16.msra.mxu0 %v3336_v33  ;;  %v3387_v27 = vld [vmem:[%s3633_s5 + $0x240] ss:$36 sps:$4 sm:$0xff]   ;;  %v3438_v33 = vld [vmem:[%s4369_s1 + $0x1e8] sm:$0xff]  }
  0x2c   : > { %2860 = vmatprep.subr.bf16.mxu1 %v3323_v31  ;;  %2972 = vmatprep.subr.bf16.mxu0 %v3348_v43  ;;  %v3393_v31 = vld [vmem:[%s3633_s5 + $0x28c] ss:$36 sps:$4 sm:$0xff]   ;;  %v3409_v43 = vld [vmem:[%s3633_s5 + $0x31c] ss:$36 sps:$4 sm:$0xff]  }
  0x2e   : > { %1664 = vmatmul.mubr.bf16.gmra.mrb[4].mxu0 %v3321_v29  ;;  %1760 = vmatmul.mubr.bf16.gmra.mrb[4].mxu1 %v3322_v30  ;;  %v3425_v29 = vld [vmem:[%s4369_s1 + $0x200] sm:$0xff]   ;;  %v3388_v30 = vld [vmem:[%s3633_s5 + $0x128] ss:$36 sps:$4 sm:$0xff]  }
  0x2f   : > { %2861 = vmatpush3.bf16.msra.mxu1 %v3324_v32  ;;  %1671 = vmatprep.mubr.bf16.mxu0 %v3327_v35  ;;  %v3395_v32 = vld [vmem:[%s3633_s5 + $0x174] ss:$36 sps:$4 sm:$0xff]   ;;  %v3439_v35 = vld [vmem:[%s4369_s1 + $0x1a8] sm:$0xff]  }
  0x30   : > { %2862 = vmatprep.subr.bf16.mxu1 %v3325_v34  ;;  %1767 = vmatprep.mubr.bf16.mxu1 %v3329_v36  ;;  %v3397_v34 = vld [vmem:[%s3633_s5 + $0x288] ss:$36 sps:$4 sm:$0xff]   ;;  %v3398_v36 = vld [vmem:[%s3633_s5 + $0x170] ss:$36 sps:$4 sm:$0xff]  }
  0x31   : > { %2973 = vmatpush3.bf16.msra.mxu0 %v3350_v46  ;;  %v3414_v46 = vld [vmem:[%s3633_s5 + $0x200] ss:$36 sps:$4 sm:$0xff]  }
  0x32   : > { %2974 = vmatprep.subr.bf16.mxu0 %v3365_v55  ;;  %v3440_v55 = vld [vmem:[%s4369_s1 + $0x208] sm:$0xff]  }
  0x33   : > { %2863 = vmatpush3.bf16.msra.mxu1 %v3326_v37  ;;  %v3401_v37 = vld [vmem:[%s3633_s5 + $0x2d4] ss:$36 sps:$4 sm:$0xff]  }
  0x34   : > { %2864 = vmatprep.subr.bf16.mxu1 %v3333_v40  ;;  %v3406_v40 = vld [vmem:[%s3633_s5 + $0x1b8] ss:$36 sps:$4 sm:$0xff]  }
  0x35   : > { %2975 = vmatpush3.bf16.msra.mxu0 %v3366_v56  ;;  %v3455_v56 = vld [vmem:[%s4369_s1 + $0x210] sm:$0xff]  }
  0x36   : > { %1672 = vmatmul.mubr.bf16.gmra.mrb[8].mxu0 %v3331_v38  ;;  %1768 = vmatmul.mubr.bf16.gmra.mrb[8].mxu1 %v3332_v39  ;;  %v3403_v38 = vld [vmem:[%s3633_s5 + $0x1bc] ss:$36 sps:$4 sm:$0xff]   ;;  %v3405_v39 = vld [vmem:[%s3633_s5 + $0x2d0] ss:$36 sps:$4 sm:$0xff]  }
  0x37   : > { %2865 = vmatpush3.bf16.msra.mxu1 %v3335_v41  ;;  %1679 = vmatprep.mubr.bf16.mxu0 %v3339_v44  ;;  %v3453_v41 = vld [vmem:[%s4369_s1 + $0x1f0] sm:$0xff]   ;;  %v3411_v44 = vld [vmem:[%s3633_s5 + $0x204] ss:$36 sps:$4 sm:$0xff]  }
  0x38   : > { %2866 = vmatprep.subr.bf16.mxu1 %v3337_v42  ;;  %1775 = vmatprep.mubr.bf16.mxu1 %v3341_v45  ;;  %v3454_v42 = vld [vmem:[%s4369_s1 + $0x1b0] sm:$0xff]   ;;  %v3413_v45 = vld [vmem:[%s3633_s5 + $0x318] ss:$36 sps:$4 sm:$0xff]  }
  0x39   : > { %2976 = vmatprep.subr.bf16.mxu0 %v3375_v0  ;;  %v3437_v0 = vld [vmem:[%s3633_s5 + $0xa0] ss:$36 sps:$4 sm:$0xff]  }
  0x3a   : > { %2977 = vmatpush3.bf16.msra.mxu0 %v3376_v2  ;;  %v3443_v2 = vld [vmem:[%s3633_s5 + $0xec] ss:$36 sps:$4 sm:$0xff]  }
  0x3b   : > { %2867 = vmatpush3.bf16.msra.mxu1 %v3338_v47  ;;  %2978 = vmatprep.subr.bf16.mxu0 %v3389_v8  ;;  %v3468_v47 = vld [vmem:[%s4369_s1 + $0x1f8] sm:$0xff]  }
  0x3c   : > { %2868 = vmatprep.subr.bf16.mxu1 %v3345_v48  ;;  %v3469_v48 = vld [vmem:[%s4369_s1 + $0x1b8] sm:$0xff]  }
  0x3d   : > { %v3449_v8 = vld [vmem:[%s3633_s5 + $0x134] ss:$36 sps:$4 sm:$0xff]  }
  0x3e   : > { %1680 = vmatmul.mubr.bf16.gmra.mrb[12].mxu0 %v3343_v49  ;;  %1776 = vmatmul.mubr.bf16.gmra.mrb[12].mxu1 %v3344_v50  ;;  %v3417_v49 = vld [vmem:[%s3633_s5 + $0x24c] ss:$36 sps:$4 sm:$0xff]   ;;  %v3421_v50 = vld [vmem:[%s3633_s5 + $0x14] ss:$36 sps:$4 sm:$0xff]  }
  0x3f   : > { %2869 = vmatpush3.bf16.msra.mxu1 %v3346_v51  ;;  %1687 = vmatprep.mubr.bf16.mxu0 %v3351_v53  ;;  %v3419_v51 = vld [vmem:[%s3633_s5 + $0x10] ss:$36 sps:$4 sm:$0xff]  }
  0x40   : > { %2870 = vmatprep.subr.bf16.mxu1 %v3347_v52  ;;  %1816 = vmatprep.mubr.bf16.mxu1 %v3355_v54  ;;  %v3422_v52 = vld [vmem:[%s3633_s5 + $0x248] ss:$36 sps:$4 sm:$0xff]   ;;  %v3426_v53 = vld [vmem:[%s3633_s5 + $0x294] ss:$36 sps:$4 sm:$0xff]   ;;  %v3428_v54 = vld [vmem:[%s3633_s5 + $0x5c] ss:$36 sps:$4 sm:$0xff]  }
  0x41   : > { %2979 = vmatpush3.bf16.msra.mxu0 %v3391_v10  ;;  %v3451_v10 = vld [vmem:[%s3633_s5 + $0x368] ss:$36 sps:$4 sm:$0xff]  }
  0x42   : > { %2980 = vmatprep.subr.bf16.mxu0 %v3399_v15  ;;  %v3461_v15 = vld [vmem:[%s3633_s5 + $0x178] ss:$36 sps:$4 sm:$0xff]  }
  0x43   : > { %2871 = vmatpush3.bf16.msra.mxu1 %v3349_v57  ;;  %v3430_v57 = vld [vmem:[%s3633_s5 + $0x290] ss:$36 sps:$4 sm:$0xff]  }
  0x44   : > { %3080 = vmatprep.subr.bf16.mxu1 %v3357_v60  ;;  %v3434_v60 = vld [vmem:[%s3633_s5 + $0xa4] ss:$36 sps:$4 sm:$0xff]  }
  0x45   : > { %2981 = vmatpush3.bf16.msra.mxu0 %v3400_v16  ;;  %v3462_v16 = vld [vmem:[%s3633_s5 + $0x3fc] ss:$36 sps:$4 sm:$0xff]  }
  0x46   : > { %1688 = vmatmul.mubr.bf16.gmra.mrb[16].mxu0 %v3356_v59  ;;  %1817 = vmatmul.mubr.bf16.vlgmr.msra.gmra.mrb[16].mxu1 %v3353_v58  ;;  %v3431_v58 = vld [vmem:[%s3633_s5 + $0x58] ss:$36 sps:$4 sm:$0xff]  }
  0x47   : > { %3081 = vmatpush3.bf16.msra.mxu1 %v3358_v61  ;;  %1695 = vmatprep.mubr.bf16.mxu0 %v3359_v62  ;;  %v3432_v59 = vld [vmem:[%s3633_s5 + $0x2dc] ss:$36 sps:$4 sm:$0xff]  }
  0x48   : > { %1824 = vmatprep.mubr.bf16.mxu1 %v3361_v63  ;;  %3082 = vmatprep.subr.bf16.mxu1 %v3373_v1  ;;  %v3470_v61 = vld [vmem:[%s4369_s1 + $0x218] sm:$0xff]   ;;  %v3483_v62 = vld [vmem:[%s4369_s1 + $0x220] sm:$0xff]  }
  0x49   : > { %2982 = vmatprep.subr.bf16.mxu0 %v3415_v24  ;;  %v3436_v63 = vld [vmem:[%s3633_s5 + $0x2d8] ss:$36 sps:$4 sm:$0xff]   ;;  %v3441_v1 = vld [vmem:[%s3633_s5 + $0x324] ss:$36 sps:$4 sm:$0xff]  }
  0x4a   : > { %2983 = vmatpush3.bf16.msra.mxu0 %v3416_v25  ;;  %v3477_v24 = vld [vmem:[%s3633_s5 + $0x254] ss:$36 sps:$4 sm:$0xff]   ;;  %v3481_v25 = vld [vmem:[%s3633_s5 + $0x1c] ss:$36 sps:$4 sm:$0xff]  }
  0x4b   : > { %3083 = vmatpush3.bf16.msra.mxu1 %v3374_v3  ;;  %3216 = vmatprep.subr.bf16.mxu0 %v3425_v29  ;;  %v3496_v3 = vld [vmem:[%s4369_s1 + $0x228] sm:$0xff]  }
  0x4c   : > { %3084 = vmatprep.subr.bf16.mxu1 %v3390_v9  ;;  %v3522_v9 = vld [vmem:[%s4369_s1 + $0x238] sm:$0xff]  }
  0x4e   : > { %1696 = vmatmul.mubr.bf16.gmra.mrb[20].mxu0 %v3363_v4  ;;  %1825 = vmatmul.mubr.bf16.gmra.mrb[20].mxu1 %v3364_v5  ;;  %v3445_v4 = vld [vmem:[%s3633_s5 + $0x320] ss:$36 sps:$4 sm:$0xff]   ;;  %v3446_v5 = vld [vmem:[%s3633_s5 + $0xe8] ss:$36 sps:$4 sm:$0xff]  }
  0x4f   : > { %1703 = vmatprep.mubr.bf16.mxu0 %v3367_v6  ;;  %1832 = vmatprep.mubr.bf16.mxu1 %v3369_v7  ;;  %v3509_v6 = vld [vmem:[%s4369_s1 + $0x230] sm:$0xff]  }
  0x50   : > { %3085 = vmatpush3.bf16.msra.mxu1 %v3392_v11  ;;  %v3447_v7 = vld [vmem:[%s3633_s5 + $0x36c] ss:$36 sps:$4 sm:$0xff]  }
  0x51   : > { %3086 = vmatprep.subr.bf16.mxu1 %v3407_v18  ;;  %v3452_v11 = vld [vmem:[%s3633_s5 + $0x130] ss:$36 sps:$4 sm:$0xff]   ;;  %v3466_v18 = vld [vmem:[%s3633_s5 + $0x3f8] ss:$36 sps:$4 sm:$0xff]  }
  0x54   : > { %3087 = vmatpush3.bf16.msra.mxu1 %v3408_v19  ;;  %v3467_v19 = vld [vmem:[%s3633_s5 + $0x1c0] ss:$36 sps:$4 sm:$0xff]  }
  0x55   : > { %3088 = vmatprep.subr.bf16.mxu1 %v3423_v26  ;;  %v3479_v26 = vld [vmem:[%s3633_s5 + $0x18] ss:$36 sps:$4 sm:$0xff]  }
  0x56   : > { %1704 = vmatmul.mubr.bf16.gmra.mrb[24].mxu0 %v3371_v12  ;;  %1833 = vmatmul.mubr.bf16.gmra.mrb[24].mxu1 %v3372_v13  ;;  %v3456_v12 = vld [vmem:[%s3633_s5 + $0x3b4] ss:$36 sps:$4 sm:$0xff]   ;;  %v3458_v13 = vld [vmem:[%s3633_s5 + $0x17c] ss:$36 sps:$4 sm:$0xff]  }
  0x57   : > { %1711 = vmatprep.mubr.bf16.mxu0 %v3377_v14  ;;  %1840 = vmatprep.mubr.bf16.mxu1 %v3379_v17  ;;  %v3460_v14 = vld [vmem:[%s3633_s5 + $0x3b0] ss:$36 sps:$4 sm:$0xff]   ;;  %v3464_v17 = vld [vmem:[%s3633_s5 + $0x1c4] ss:$36 sps:$4 sm:$0xff]  }
  0x58   : > { %3089 = vmatpush3.bf16.msra.mxu1 %v3424_v28  ;;  %v3484_v28 = vld [vmem:[%s3633_s5 + $0x29c] ss:$36 sps:$4 sm:$0xff]  }
  0x59   : > { %3090 = vmatprep.subr.bf16.mxu1 %v3438_v33  ;;  %v3492_v33 = vld [vmem:[%s3633_s5 + $0xac] ss:$36 sps:$4 sm:$0xff]  }
  0x5c   : > { %3091 = vmatpush3.bf16.msra.mxu1 %v3439_v35  ;;  %v3495_v35 = vld [vmem:[%s3633_s5 + $0xa8] ss:$36 sps:$4 sm:$0xff]  }
  0x5d   : > { %3092 = vmatprep.subr.bf16.mxu1 %v3453_v41  ;;  %v3505_v41 = vld [vmem:[%s3633_s5 + $0x13c] ss:$36 sps:$4 sm:$0xff]  }
  0x5e   : > { %1712 = vmatmul.mubr.bf16.gmra.mrb[28].mxu0 %v3381_v20  ;;  %1841 = vmatmul.mubr.bf16.gmra.mrb[28].mxu1 %v3382_v21  ;;  %v3471_v20 = vld [vmem:[%s3633_s5 + $0x444] ss:$36 sps:$4 sm:$0xff]   ;;  %v3473_v21 = vld [vmem:[%s3633_s5 + $0x20c] ss:$36 sps:$4 sm:$0xff]  }
  0x5f   : > { %1719 = vmatprep.mubr.bf16.mxu0 %v3383_v22  ;;  %1848 = vmatprep.mubr.bf16.mxu1 %v3385_v23  ;;  %v3475_v22 = vld [vmem:[%s3633_s5 + $0x440] ss:$36 sps:$4 sm:$0xff]   ;;  %v3476_v23 = vld [vmem:[%s3633_s5 + $0x208] ss:$36 sps:$4 sm:$0xff]  }
  0x60   : > { %3093 = vmatpush3.bf16.msra.mxu1 %v3454_v42  ;;  %v3507_v42 = vld [vmem:[%s3633_s5 + $0x370] ss:$36 sps:$4 sm:$0xff]  }
  0x61   : > { %3094 = vmatprep.subr.bf16.mxu1 %v3468_v47  ;;  %v3515_v47 = vld [vmem:[%s3633_s5 + $0x180] ss:$36 sps:$4 sm:$0xff]  }
  0x64   : > { %3095 = vmatpush3.bf16.msra.mxu1 %v3469_v48  ;;  %v3516_v48 = vld [vmem:[%s3633_s5 + $0x404] ss:$36 sps:$4 sm:$0xff]  }
  0x66   : > { %1720 = vmatmul.mubr.bf16.gmra.mrb[32].mxu0 %v3387_v27  ;;  %1849 = vmatmul.mubr.bf16.gmra.mrb[32].mxu1 %v3388_v30  ;;  %v3482_v27 = vld [vmem:[%s3633_s5 + $0x250] ss:$36 sps:$4 sm:$0xff]   ;;  %v3488_v30 = vld [vmem:[%s3633_s5 + $0x298] ss:$36 sps:$4 sm:$0xff]  }
  0x67   : > { %1727 = vmatprep.mubr.bf16.mxu0 %v3393_v31  ;;  %1856 = vmatprep.mubr.bf16.mxu1 %v3395_v32  ;;  %v3489_v31 = vld [vmem:[%s3633_s5 + $0x60] ss:$36 sps:$4 sm:$0xff]  }
  0x68   : > { %v3490_v32 = vld [vmem:[%s3633_s5 + $0x2e4] ss:$36 sps:$4 sm:$0xff]  }
  0x6e   : > { %1728 = vmatmul.mubr.bf16.gmra.mrb[36].mxu0 %v3397_v34  ;;  %1857 = vmatmul.mubr.bf16.gmra.mrb[36].mxu1 %v3398_v36  ;;  %v3494_v34 = vld [vmem:[%s3633_s5 + $0x2e0] ss:$36 sps:$4 sm:$0xff]   ;;  %v3497_v36 = vld [vmem:[%s3633_s5 + $0x32c] ss:$36 sps:$4 sm:$0xff]  }
  0x6f   : > { %1735 = vmatprep.mubr.bf16.mxu0 %v3401_v37  ;;  %1864 = vmatprep.mubr.bf16.mxu1 %v3403_v38  ;;  %v3499_v37 = vld [vmem:[%s3633_s5 + $0xf4] ss:$36 sps:$4 sm:$0xff]   ;;  %v3501_v38 = vld [vmem:[%s3633_s5 + $0x328] ss:$36 sps:$4 sm:$0xff]  }
  0x76   : > { %1736 = vmatmul.mubr.bf16.gmra.mrb[40].mxu0 %v3405_v39  ;;  %1865 = vmatmul.mubr.bf16.gmra.mrb[40].mxu1 %v3406_v40  ;;  %v3502_v39 = vld [vmem:[%s3633_s5 + $0xf0] ss:$36 sps:$4 sm:$0xff]  }
  0x77   : > { %1743 = vmatprep.mubr.bf16.mxu0 %v3409_v43  ;;  %1872 = vmatprep.mubr.bf16.mxu1 %v3411_v44  ;;  %v3503_v40 = vld [vmem:[%s3633_s5 + $0x374] ss:$36 sps:$4 sm:$0xff]   ;;  %v3510_v44 = vld [vmem:[%s3633_s5 + $0x3bc] ss:$36 sps:$4 sm:$0xff]  }
  0x78   : > { %v3508_v43 = vld [vmem:[%s3633_s5 + $0x138] ss:$36 sps:$4 sm:$0xff]  }
  0x7e   : > { %1744 = vmatmul.mubr.bf16.gmra.mrb[44].mxu0 %v3413_v45  ;;  %1873 = vmatmul.mubr.bf16.gmra.mrb[44].mxu1 %v3414_v46  ;;  %v3512_v45 = vld [vmem:[%s3633_s5 + $0x184] ss:$36 sps:$4 sm:$0xff]   ;;  %v3514_v46 = vld [vmem:[%s3633_s5 + $0x3b8] ss:$36 sps:$4 sm:$0xff]  }
  0x7f   : > { %1880 = vmatprep.mubr.bf16.mxu1 %v3417_v49  ;;  %1977 = vmatprep.mubr.bf16.mxu0 %v3421_v50  ;;  %v3518_v49 = vld [vmem:[%s3633_s5 + $0x1cc] ss:$36 sps:$4 sm:$0xff]   ;;  %v3520_v50 = vld [vmem:[%s3633_s5 + $0x400] ss:$36 sps:$4 sm:$0xff]  }
  0x86   : > { %1881 = vmatmul.mubr.bf16.gmra.mrb[48].mxu1 %v3422_v52  ;;  %1978 = vmatmul.mubr.bf16.vlgmr.msra.gmra.mrb[48].mxu0 %v3419_v51  ;;  %v3521_v51 = vld [vmem:[%s3633_s5 + $0x1c8] ss:$36 sps:$4 sm:$0xff]  }
  0x87   : > { %3217 = vmatpush3.bf16.msra.mxu0 %v3425_v29  ;;  %1888 = vmatprep.mubr.bf16.mxu1 %v3426_v53  ;;  %v3486_v29 = vld [vmem:[%s3633_s5 + $0x64] ss:$36 sps:$4 sm:$0xff]   ;;  %v3523_v52 = vld [vmem:[%s3633_s5 + $0x44c] ss:$36 sps:$4 sm:$0xff]   ;;  %v3525_v53 = vld [vmem:[%s3633_s5 + $0x214] ss:$36 sps:$4 sm:$0xff]  }
  0x88   : > { %1985 = vmatprep.mubr.bf16.mxu0 %v3428_v54  ;;  %3218 = vmatprep.subr.bf16.mxu0 %v3440_v55 }
  0x8b   : > { %3219 = vmatpush3.bf16.msra.mxu0 %v3440_v55 }
  0x8c   : > { %3220 = vmatprep.subr.bf16.mxu0 %v3455_v56 }
  0x8e   : > { %1889 = vmatmul.mubr.bf16.gmra.mrb[52].mxu1 %v3430_v57  ;;  %1986 = vmatmul.mubr.bf16.gmra.mrb[52].mxu0 %v3431_v58  ;;  %v3527_v58 = vld [vmem:[%s3633_s5 + $0x448] ss:$36 sps:$4 sm:$0xff]  }
  0x8f   : > { %1896 = vmatprep.mubr.bf16.mxu1 %v3432_v59  ;;  %1993 = vmatprep.mubr.bf16.mxu0 %v3434_v60  ;;  %v3528_v59 = vld [vmem:[%s3633_s5 + $0x210] ss:$36 sps:$4 sm:$0xff]  }
  0x90   : > { %3221 = vmatpush3.bf16.msra.mxu0 %v3455_v56 }
  0x91   : > { %3222 = vmatprep.subr.bf16.mxu0 %v3470_v61 }
  0x94   : > { %3223 = vmatpush3.bf16.msra.mxu0 %v3470_v61 }
  0x95   : > { %3224 = vmatprep.subr.bf16.mxu0 %v3483_v62 }
  0x96   : > { %1897 = vmatmul.mubr.bf16.gmra.mrb[56].mxu1 %v3436_v63  ;;  %1994 = vmatmul.mubr.bf16.gmra.mrb[56].mxu0 %v3437_v0  ;;  %v3529_v0 = vld [vmem:[%s3633_s5 + $0x25c] ss:$36 sps:$4 sm:$0xff]  }
  0x97   : > { %1904 = vmatprep.mubr.bf16.mxu1 %v3441_v1  ;;  %2001 = vmatprep.mubr.bf16.mxu0 %v3443_v2  ;;  %v3531_v1 = vld [vmem:[%s3633_s5 + $0x20] ss:$36 sps:$4 sm:$0xff]  }
  0x98   : > { %3225 = vmatpush3.bf16.msra.mxu0 %v3483_v62 }
  0x99   : > { %3226 = vmatprep.subr.bf16.mxu0 %v3496_v3 }
  0x9c   : > { %3227 = vmatpush3.bf16.msra.mxu0 %v3496_v3 }
  0x9d   : > { %3228 = vmatprep.subr.bf16.mxu0 %v3509_v6 }
  0x9e   : > { %1905 = vmatmul.mubr.bf16.gmra.mrb[60].mxu1 %v3445_v4  ;;  %2002 = vmatmul.mubr.bf16.gmra.mrb[60].mxu0 %v3446_v5 }
  0x9f   : > { %1912 = vmatprep.mubr.bf16.mxu1 %v3447_v7  ;;  %2009 = vmatprep.mubr.bf16.mxu0 %v3449_v8 }
  0xa0   : > { %3229 = vmatpush3.bf16.msra.mxu0 %v3509_v6 }
  0xa1   : > { %3230 = vmatprep.subr.bf16.mxu0 %v3522_v9 }
  0xa4   : > { %3231 = vmatpush3.bf16.msra.mxu0 %v3522_v9 }
  0xa6   : > { %1913 = vmatmul.mubr.bf16.gmra.mrb[64].mxu1 %v3451_v10  ;;  %2010 = vmatmul.mubr.bf16.gmra.mrb[64].mxu0 %v3452_v11  ;;  %v3532_v10 = vld [vmem:[%s3633_s5 + $0x258] ss:$36 sps:$4 sm:$0xff]   ;;  %v3533_v11 = vld [vmem:[%s3633_s5 + $0x68] ss:$36 sps:$4 sm:$0xff]  }
  0xa7   : > { %1920 = vmatprep.mubr.bf16.mxu1 %v3456_v12  ;;  %2017 = vmatprep.mubr.bf16.mxu0 %v3458_v13 }
  0xae   : > { %1921 = vmatmul.mubr.bf16.gmra.mrb[68].mxu1 %v3460_v14  ;;  %2018 = vmatmul.mubr.bf16.gmra.mrb[68].mxu0 %v3461_v15 }
  0xaf   : > { %1928 = vmatprep.mubr.bf16.mxu1 %v3462_v16  ;;  %2025 = vmatprep.mubr.bf16.mxu0 %v3464_v17  ;;  %v3534_v16 = vld [vmem:[%s3633_s5 + $0x2a4] ss:$36 sps:$4 sm:$0xff]   ;;  %v3536_v17 = vld [vmem:[%s3633_s5 + $0xb0] ss:$36 sps:$4 sm:$0xff]  }
  0xb6   : > { %1929 = vmatmul.mubr.bf16.gmra.mrb[72].mxu1 %v3466_v18  ;;  %2026 = vmatmul.mubr.bf16.gmra.mrb[72].mxu0 %v3467_v19 }
  0xb7   : > { %1936 = vmatprep.mubr.bf16.mxu1 %v3471_v20  ;;  %2033 = vmatprep.mubr.bf16.mxu0 %v3473_v21 }
  0xbe   : > { %1937 = vmatmul.mubr.bf16.gmra.mrb[76].mxu1 %v3475_v22  ;;  %2034 = vmatmul.mubr.bf16.gmra.mrb[76].mxu0 %v3476_v23 }
  0xbf   : > { %2041 = vmatprep.mubr.bf16.mxu0 %v3477_v24  ;;  %2138 = vmatprep.mubr.bf16.mxu1 %v3481_v25 }
  0xc6   : > { %2042 = vmatmul.mubr.bf16.gmra.mrb[80].mxu0 %v3482_v27  ;;  %2139 = vmatmul.mubr.bf16.vlgmr.msra.gmra.mrb[80].mxu1 %v3479_v26  ;;  %v3537_v26 = vld [vmem:[%s3633_s5 + $0x2a0] ss:$36 sps:$4 sm:$0xff]   ;;  %v3538_v27 = vld [vmem:[%s3633_s5 + $0xf8] ss:$36 sps:$4 sm:$0xff]  }
  0xc7   : > { %2049 = vmatprep.mubr.bf16.mxu0 %v3484_v28  ;;  %2146 = vmatprep.mubr.bf16.mxu1 %v3486_v29 }
  0xce   : > { %2050 = vmatmul.mubr.bf16.gmra.mrb[84].mxu0 %v3488_v30  ;;  %2147 = vmatmul.mubr.bf16.gmra.mrb[84].mxu1 %v3489_v31 }
  0xcf   : > { %2057 = vmatprep.mubr.bf16.mxu0 %v3490_v32  ;;  %2154 = vmatprep.mubr.bf16.mxu1 %v3492_v33  ;;  %v3539_v32 = vld [vmem:[%s3633_s5 + $0x2ec] ss:$36 sps:$4 sm:$0xff]   ;;  %v3541_v33 = vld [vmem:[%s3633_s5 + $0x140] ss:$36 sps:$4 sm:$0xff]  }
  0xd6   : > { %2058 = vmatmul.mubr.bf16.gmra.mrb[88].mxu0 %v3494_v34  ;;  %2155 = vmatmul.mubr.bf16.gmra.mrb[88].mxu1 %v3495_v35 }
  0xd7   : > { %2065 = vmatprep.mubr.bf16.mxu0 %v3497_v36  ;;  %2162 = vmatprep.mubr.bf16.mxu1 %v3499_v37 }
  0xde   : > { %2066 = vmatmul.mubr.bf16.gmra.mrb[92].mxu0 %v3501_v38  ;;  %2163 = vmatmul.mubr.bf16.gmra.mrb[92].mxu1 %v3502_v39 }
  0xdf   : > { %2073 = vmatprep.mubr.bf16.mxu0 %v3503_v40  ;;  %2170 = vmatprep.mubr.bf16.mxu1 %v3505_v41 }
  0xe6   : > { %2074 = vmatmul.mubr.bf16.gmra.mrb[96].mxu0 %v3507_v42  ;;  %2171 = vmatmul.mubr.bf16.gmra.mrb[96].mxu1 %v3508_v43  ;;  %v3542_v42 = vld [vmem:[%s3633_s5 + $0x2e8] ss:$36 sps:$4 sm:$0xff]  }
  0xe7   : > { %2081 = vmatprep.mubr.bf16.mxu0 %v3510_v44  ;;  %2178 = vmatprep.mubr.bf16.mxu1 %v3512_v45  ;;  %v3543_v43 = vld [vmem:[%s3633_s5 + $0x188] ss:$36 sps:$4 sm:$0xff]  }
  0xee   : > { %2082 = vmatmul.mubr.bf16.gmra.mrb[100].mxu0 %v3514_v46  ;;  %2179 = vmatmul.mubr.bf16.gmra.mrb[100].mxu1 %v3515_v47 }
  0xef   : > { %2089 = vmatprep.mubr.bf16.mxu0 %v3516_v48  ;;  %2186 = vmatprep.mubr.bf16.mxu1 %v3518_v49  ;;  %v3544_v48 = vld [vmem:[%s3633_s5 + $0x334] ss:$36 sps:$4 sm:$0xff]  }
  0xf0   : > { %v3546_v49 = vld [vmem:[%s3633_s5 + $0x1d0] ss:$36 sps:$4 sm:$0xff]  }
  0xf6   : > { %2090 = vmatmul.mubr.bf16.gmra.mrb[104].mxu0 %v3520_v50  ;;  %2187 = vmatmul.mubr.bf16.gmra.mrb[104].mxu1 %v3521_v51 }
  0xf7   : > { %2097 = vmatprep.mubr.bf16.mxu0 %v3523_v52  ;;  %2194 = vmatprep.mubr.bf16.mxu1 %v3525_v53 }
  0xf9   : > { %v2832_v54 = vpop.f32.mrb[0].mxu1  ;;  %v2760_v55 = vpop.f32.mrb[0].mxu0 }
  0xfa   : > { %v2833_v56 = vpop.f32.mrb[1].mxu1  ;;  %v2761_v57 = vpop.f32.mrb[1].mxu0 }
  0xfb   : > { %v3936_v60 = vadd.f32 %v2833_v56, %v2832_v54  ;;  %v2835_v61 = vpop.f32.mrb[2].mxu1  ;;  %v3938_v62 = vadd.f32 %v2761_v57, %v2760_v55  ;;  %v2763_v63 = vpop.f32.mrb[2].mxu0 }
  0xfc   : > { %v2836_v2 = vpop.f32.mrb[3].mxu1  ;;  %v2764_v3 = vpop.f32.mrb[3].mxu0 }
  0xfd   : > { %v3942_v4 = vadd.f32 %v2836_v2, %v2835_v61  ;;  %v3944_v5 = vadd.f32 %v2764_v3, %v2763_v63  ;;  %v3549_v2 = vld [vmem:[%s3633_s5 + $0x37c] ss:$36 sps:$4 sm:$0xff]  }
  0xfe   : > { %2098 = vmatmul.mubr.bf16.gmra.mrb[108].mxu0 %v3527_v58  ;;  %2195 = vmatmul.mubr.bf16.gmra.mrb[108].mxu1 %v3528_v59  ;;  %v3547_v58 = vld [vmem:[%s3633_s5 + $0x330] ss:$36 sps:$4 sm:$0xff]   ;;  %v3548_v59 = vld [vmem:[%s3633_s5 + $0x218] ss:$36 sps:$4 sm:$0xff]   ;;  %v3551_v3 = vld [vmem:[%s3633_s5 + $0x260] ss:$36 sps:$4 sm:$0xff]  }
  0xff   : > { %2202 = vmatprep.mubr.bf16.mxu1 %v3529_v0  ;;  %3232 = vmatprep.mubr.bf16.mxu0 %v3531_v1 }
 0x101   : > { %v2838_v6 = vpop.f32.mrb[4].mxu1  ;;  %v2766_v7 = vpop.f32.mrb[4].mxu0 }
 0x102   : > { %v2839_v8 = vpop.f32.mrb[5].mxu1  ;;  %v2767_v9 = vpop.f32.mrb[5].mxu0 }
 0x103   : > { %v3948_v12 = vadd.f32 %v2839_v8, %v2838_v6  ;;  %v2841_v13 = vpop.f32.mrb[6].mxu1  ;;  %v3950_v14 = vadd.f32 %v2767_v9, %v2766_v7  ;;  %v2769_v15 = vpop.f32.mrb[6].mxu0 }
 0x104   : > { %v2842_v18 = vpop.f32.mrb[7].mxu1  ;;  %v2770_v19 = vpop.f32.mrb[7].mxu0 }
 0x105   : > { %v3954_v20 = vadd.f32 %v2842_v18, %v2841_v13  ;;  %v3956_v21 = vadd.f32 %v2770_v19, %v2769_v15  ;;  %v3552_v18 = vld [vmem:[%s3633_s5 + $0x378] ss:$36 sps:$4 sm:$0xff]   ;;  %v3553_v19 = vld [vmem:[%s3633_s5 + $0x2a8] ss:$36 sps:$4 sm:$0xff]  }
 0x106   : > { %2203 = vmatmul.mubr.bf16.gmra.mrb[112].mxu1 %v3532_v10  ;;  %3233 = vmatmul.mubr.bf16.vlgmr.msra.gmra.mrb[112].mxu0 %v3533_v11 }
 0x107   : > { %2210 = vmatprep.mubr.bf16.mxu1 %v3534_v16  ;;  %3236 = vmatprep.mubr.bf16.mxu0 %v3536_v17 }
 0x109   : > { %v2844_v22 = vpop.f32.mrb[8].mxu1  ;;  %v2772_v23 = vpop.f32.mrb[8].mxu0 }
 0x10a   : > { %v2845_v24 = vpop.f32.mrb[9].mxu1  ;;  %v2773_v25 = vpop.f32.mrb[9].mxu0 }
 0x10b   : > { %v3960_v28 = vadd.f32 %v2845_v24, %v2844_v22  ;;  %v2847_v29 = vpop.f32.mrb[10].mxu1  ;;  %v3962_v30 = vadd.f32 %v2773_v25, %v2772_v23  ;;  %v2775_v31 = vpop.f32.mrb[10].mxu0  ;;  %v3554_v25 = vld [vmem:[%s3633_s5 + $0x3c4] ss:$36 sps:$4 sm:$0xff]  }
 0x10c   : > { %v2848_v34 = vpop.f32.mrb[11].mxu1  ;;  %v2776_v35 = vpop.f32.mrb[11].mxu0 }
 0x10d   : > { %v3966_v36 = vadd.f32 %v2848_v34, %v2847_v29  ;;  %v3968_v37 = vadd.f32 %v2776_v35, %v2775_v31 }
 0x10e   : > { %2211 = vmatmul.mubr.bf16.gmra.mrb[116].mxu1 %v3537_v26  ;;  %3237 = vmatmul.mubr.bf16.gmra.mrb[116].mxu0 %v3538_v27  ;;  %v3556_v26 = vld [vmem:[%s3633_s5 + $0x2f0] ss:$36 sps:$4 sm:$0xff]  }
 0x10f   : > { %2218 = vmatprep.mubr.bf16.mxu1 %v3539_v32  ;;  %3240 = vmatprep.mubr.bf16.mxu0 %v3541_v33 }
 0x111   : > { %v2850_v38 = vpop.f32.mrb[12].mxu1  ;;  %v2778_v39 = vpop.f32.mrb[12].mxu0 }
 0x112   : > { %v2851_v40 = vpop.f32.mrb[13].mxu1  ;;  %v2779_v41 = vpop.f32.mrb[13].mxu0 }
 0x113   : > { %v3972_v44 = vadd.f32 %v2851_v40, %v2850_v38  ;;  %v2853_v45 = vpop.f32.mrb[14].mxu1  ;;  %v3974_v46 = vadd.f32 %v2779_v41, %v2778_v39  ;;  %v2781_v47 = vpop.f32.mrb[14].mxu0  ;;  %v3557_v40 = vld [vmem:[%s3633_s5 + $0x3c0] ss:$36 sps:$4 sm:$0xff]   ;;  %v3558_v41 = vld [vmem:[%s3633_s5 + $0x338] ss:$36 sps:$4 sm:$0xff]  }
 0x114   : > { %v2854_v50 = vpop.f32.mrb[15].mxu1  ;;  %v2782_v51 = vpop.f32.mrb[15].mxu0 }
 0x115   : > { %v3978_v52 = vadd.f32 %v2854_v50, %v2853_v45  ;;  %v3980_v53 = vadd.f32 %v2782_v51, %v2781_v47  ;;  %v3559_v47 = vld [vmem:[%s3633_s5 + $0x40c] ss:$36 sps:$4 sm:$0xff]  }
 0x116   : > { %2219 = vmatmul.mubr.bf16.gmra.mrb[120].mxu1 %v3542_v42  ;;  %3241 = vmatmul.mubr.bf16.gmra.mrb[120].mxu0 %v3543_v43 }
 0x117   : > { %2226 = vmatprep.mubr.bf16.mxu1 %v3544_v48  ;;  %3244 = vmatprep.mubr.bf16.mxu0 %v3546_v49  ;;  %v3561_v48 = vld [vmem:[%s3633_s5 + $0x380] ss:$36 sps:$4 sm:$0xff]  }
 0x119   : > { %v2872_v54 = vpop.f32.mrb[16].mxu1  ;;  %v2784_v55 = vpop.f32.mrb[16].mxu0 }
 0x11a   : > { %v2873_v56 = vpop.f32.mrb[17].mxu1  ;;  %v2785_v57 = vpop.f32.mrb[17].mxu0 }
 0x11b   : > { %v2874_v61 = vadd.f32 %v2873_v56, %v2872_v54  ;;  %v2875_v63 = vpop.f32.mrb[18].mxu1  ;;  %v3984_v0 = vadd.f32 %v2785_v57, %v2784_v55  ;;  %v2787_v1 = vpop.f32.mrb[18].mxu0 }
 0x11c   : > { %v2876_v6 = vpop.f32.mrb[19].mxu1  ;;  %v2788_v7 = vpop.f32.mrb[19].mxu0 }
 0x11d   : > { %v3989_v8 = vadd.f32 %v2874_v61, %v3938_v62  ;;  %v2877_v9 = vadd.f32 %v2876_v6, %v2875_v63  ;;  %v3991_v10 = vadd.f32 %v2788_v7, %v2787_v1  ;;  %v3562_v61 = vld [vmem:[%s3633_s5 + $0x408] ss:$36 sps:$4 sm:$0xff]   ;;  %v3564_v6 = vld [vmem:[%s3633_s5 + $0x454] ss:$36 sps:$4 sm:$0xff]  }
 0x11e   : > { %2227 = vmatmul.mubr.bf16.gmra.mrb[124].mxu1 %v3547_v58  ;;  %3245 = vmatmul.mubr.bf16.gmra.mrb[124].mxu0 %v3548_v59  ;;  %v3563_v63 = vld [vmem:[%s3633_s5 + $0x3c8] ss:$36 sps:$4 sm:$0xff]   ;;  %v3566_v7 = vld [vmem:[%s3633_s5 + $0x410] ss:$36 sps:$4 sm:$0xff]  }
 0x11f   : > { %v3994_v11 = vadd.f32 %v2877_v9, %v3944_v5  ;;  %2234 = vmatprep.mubr.bf16.mxu1 %v3549_v2  ;;  %3248 = vmatprep.mubr.bf16.mxu0 %v3551_v3 }
 0x121   : > { %v2878_v13 = vpop.f32.mrb[20].mxu1  ;;  %v2790_v15 = vpop.f32.mrb[20].mxu0 }
 0x122   : > { %v2879_v16 = vpop.f32.mrb[21].mxu1  ;;  %v2791_v17 = vpop.f32.mrb[21].mxu0 }
 0x123   : > { %v2880_v62 = vadd.f32 %v2879_v16, %v2878_v13  ;;  %v2881_v22 = vpop.f32.mrb[22].mxu1  ;;  %v3998_v23 = vadd.f32 %v2791_v17, %v2790_v15  ;;  %v2793_v24 = vpop.f32.mrb[22].mxu0 }
 0x124   : > { %v2882_v27 = vpop.f32.mrb[23].mxu1  ;;  %v2794_v5 = vpop.f32.mrb[23].mxu0 }
 0x125   : > { %v4003_v29 = vadd.f32 %v2880_v62, %v3950_v14  ;;  %v2883_v31 = vadd.f32 %v2882_v27, %v2881_v22  ;;  %v4005_v32 = vadd.f32 %v2794_v5, %v2793_v24  ;;  %v3567_v24 = vld [vmem:[%s3633_s5 + $0x450] ss:$36 sps:$4 sm:$0xff]  }
 0x126   : > { %2235 = vmatmul.mubr.bf16.gmra.mrb[128].mxu1 %v3552_v18  ;;  %3249 = vmatmul.mubr.bf16.gmra.mrb[128].mxu0 %v3553_v19 }
 0x127   : > { %v4008_v33 = vadd.f32 %v2883_v31, %v3956_v21  ;;  %2242 = vmatprep.mubr.bf16.mxu1 %v3554_v25  ;;  %3252 = vmatprep.mubr.bf16.mxu0 %v3556_v26  ;;  %v3568_v25 = vld [vmem:[%s3633_s5 + $0x458] ss:$36 sps:$4 sm:$0xff]   ;;  %s2525_s5 = sshll.u32 %s4372_s13, 3 }
 0x128   : > { %s4261_s10 = scalar_lea.vmem %s4370_s2, %s2525_s5 }
 0x129   : > { %v2884_v34 = vpop.f32.mrb[24].mxu1  ;;  %v2796_v35 = vpop.f32.mrb[24].mxu0 }
 0x12a   : > { %v2885_v38 = vpop.f32.mrb[25].mxu1  ;;  %v2797_v39 = vpop.f32.mrb[25].mxu0 }
 0x12b   : > { %v2886_v14 = vadd.f32 %v2885_v38, %v2884_v34  ;;  %v2887_v42 = vpop.f32.mrb[26].mxu1  ;;  %v4012_v43 = vadd.f32 %v2797_v39, %v2796_v35  ;;  %v2799_v45 = vpop.f32.mrb[26].mxu0 }
 0x12c   : > { %v2888_v49 = vpop.f32.mrb[27].mxu1  ;;  %v2800_v21 = vpop.f32.mrb[27].mxu0 }
 0x12d   : > { %v4017_v50 = vadd.f32 %v2886_v14, %v3962_v30  ;;  %v2889_v51 = vadd.f32 %v2888_v49, %v2887_v42  ;;  %v4019_v54 = vadd.f32 %v2800_v21, %v2799_v45 }
 0x12e   : > { %2243 = vmatmul.mubr.bf16.gmra.mrb[132].mxu1 %v3557_v40  ;;  %3253 = vmatmul.mubr.bf16.gmra.mrb[132].mxu0 %v3558_v41 }
 0x12f   : > { %v4022_v55 = vadd.f32 %v2889_v51, %v3968_v37  ;;  %2250 = vmatprep.mubr.bf16.mxu1 %v3559_v47  ;;  %3256 = vmatprep.mubr.bf16.mxu0 %v3561_v48 }
 0x131   : > { %v2890_v56 = vpop.f32.mrb[28].mxu1  ;;  %v2802_v57 = vpop.f32.mrb[28].mxu0 }
 0x132   : > { %v2891_v58 = vpop.f32.mrb[29].mxu1  ;;  %v2803_v59 = vpop.f32.mrb[29].mxu0 }
 0x133   : > { %v2892_v30 = vadd.f32 %v2891_v58, %v2890_v56  ;;  %v2893_v1 = vpop.f32.mrb[30].mxu1  ;;  %v4026_v2 = vadd.f32 %v2803_v59, %v2802_v57  ;;  %v2805_v3 = vpop.f32.mrb[30].mxu0 }
 0x134   : > { %v2894_v9 = vpop.f32.mrb[31].mxu1  ;;  %v2806_v37 = vpop.f32.mrb[31].mxu0 }
 0x135   : > { %v4031_v13 = vadd.f32 %v2892_v30, %v3974_v46  ;;  %v2895_v15 = vadd.f32 %v2894_v9, %v2893_v1  ;;  %v4033_v16 = vadd.f32 %v2806_v37, %v2805_v3 }
 0x136   : > { %2251 = vmatmul.mubr.bf16.gmra.mrb[136].mxu1 %v3562_v61  ;;  %3257 = vmatmul.mubr.bf16.gmra.mrb[136].mxu0 %v3563_v63 }
 0x137   : > { %v4036_v17 = vadd.f32 %v2895_v15, %v3980_v53  ;;  %2258 = vmatprep.mubr.bf16.mxu1 %v3564_v6  ;;  %3260 = vmatprep.mubr.bf16.mxu0 %v3566_v7 }
 0x139   : > { %v2896_v18 = vpop.f32.mrb[32].mxu1  ;;  %v2808_v19 = vpop.f32.mrb[32].mxu0 }
 0x13a   : > { %v2897_v62 = vpop.f32.mrb[33].mxu1  ;;  %v2809_v22 = vpop.f32.mrb[33].mxu0 }
 0x13b   : > { %v2898_v26 = vadd.f32 %v2897_v62, %v2896_v18  ;;  %v2899_v27 = vpop.f32.mrb[34].mxu1  ;;  %v2810_v46 = vadd.f32 %v2809_v22, %v2808_v19  ;;  %v2811_v5 = vpop.f32.mrb[34].mxu0 }
 0x13c   : > { %v2900_v31 = vpop.f32.mrb[35].mxu1  ;;  %v2812_v34 = vpop.f32.mrb[35].mxu0 }
 0x13d   : > { %v4041_v35 = vadd.f32 %v2898_v26, %v3984_v0  ;;  %v2901_v38 = vadd.f32 %v2900_v31, %v2899_v27  ;;  %v2813_v53 = vadd.f32 %v2812_v34, %v2811_v5 }
 0x13e   : > { %2259 = vmatmul.mubr.bf16.gmra.mrb[140].mxu1 %v3567_v24  ;;  %3261 = vmatmul.mubr.bf16.gmra.mrb[140].mxu0 %v3568_v25 }
 0x13f   : > { %v4044_v39 = vadd.f32 %v2901_v38, %v3991_v10 }
 0x141   : > { %v2902_v40 = vpop.f32.mrb[36].mxu1  ;;  %v2814_v41 = vpop.f32.mrb[36].mxu0 }
 0x142   : > { %v2903_v14 = vpop.f32.mrb[37].mxu1  ;;  %v2815_v42 = vpop.f32.mrb[37].mxu0 }
 0x143   : > { %v2904_v45 = vadd.f32 %v2903_v14, %v2902_v40  ;;  %v2905_v47 = vpop.f32.mrb[38].mxu1  ;;  %v2816_v48 = vadd.f32 %v2815_v42, %v2814_v41  ;;  %v2817_v49 = vpop.f32.mrb[38].mxu0 }
 0x144   : > { %v2906_v21 = vpop.f32.mrb[39].mxu1  ;;  %v2818_v51 = vpop.f32.mrb[39].mxu0 }
 0x145   : > { %v4047_v0 = vadd.f32 %v2904_v45, %v3998_v23  ;;  %v2907_v56 = vadd.f32 %v2906_v21, %v2905_v47  ;;  %v2819_v57 = vadd.f32 %v2818_v51, %v2817_v49 }
 0x147   : > { %v4050_v58 = vadd.f32 %v2907_v56, %v4005_v32 }
 0x149   : > { %v2908_v10 = vpop.f32.mrb[40].mxu1  ;;  %v2820_v59 = vpop.f32.mrb[40].mxu0 }
 0x14a   : > { %v2909_v61 = vpop.f32.mrb[41].mxu1  ;;  %v2821_v63 = vpop.f32.mrb[41].mxu0 }
 0x14b   : > { %v2910_v30 = vadd.f32 %v2909_v61, %v2908_v10  ;;  %v2911_v1 = vpop.f32.mrb[42].mxu1  ;;  %v4052_v3 = vadd.f32 %v2821_v63, %v2820_v59  ;;  %v2823_v6 = vpop.f32.mrb[42].mxu0 }
 0x14c   : > { %v2912_v7 = vpop.f32.mrb[43].mxu1  ;;  %v2824_v9 = vpop.f32.mrb[43].mxu0 }
 0x14d   : > { %v4055_v37 = vadd.f32 %v2910_v30, %v4012_v43  ;;  %v2913_v23 = vadd.f32 %v2912_v7, %v2911_v1  ;;  %v2825_v15 = vadd.f32 %v2824_v9, %v2823_v6 }
 0x14f   : > { %v4058_v18 = vadd.f32 %v2913_v23, %v4019_v54 }
 0x151   : > { %v2914_v32 = vpop.f32.mrb[44].mxu1  ;;  %v2826_v19 = vpop.f32.mrb[44].mxu0 }
 0x152   : > { %v2915_v62 = vpop.f32.mrb[45].mxu1  ;;  %v2827_v22 = vpop.f32.mrb[45].mxu0 }
 0x153   : > { %v2916_v24 = vadd.f32 %v2915_v62, %v2914_v32  ;;  %v2917_v25 = vpop.f32.mrb[46].mxu1  ;;  %v4060_v26 = vadd.f32 %v2827_v22, %v2826_v19  ;;  %v2829_v27 = vpop.f32.mrb[46].mxu0 }
 0x154   : > { %v2918_v5 = vpop.f32.mrb[47].mxu1  ;;  %v2830_v31 = vpop.f32.mrb[47].mxu0 }
 0x155   : > { %v4063_v34 = vadd.f32 %v2916_v24, %v4026_v2  ;;  %v2919_v43 = vadd.f32 %v2918_v5, %v2917_v25  ;;  %v4065_v38 = vadd.f32 %v2830_v31, %v2829_v27 }
 0x157   : > { %v4068_v54 = vadd.f32 %v2919_v43, %v4033_v16 }
 0x159   : > { %v2920_v40 = vpop.f32.mrb[48].mxu1  ;;  %v2984_v41 = vpop.f32.mrb[48].mxu0 }
 0x15a   : > { %v2921_v14 = vpop.f32.mrb[49].mxu1  ;;  %v2985_v42 = vpop.f32.mrb[49].mxu0 }
 0x15b   : > { %v2922_v45 = vadd.f32 %v2921_v14, %v2920_v40  ;;  %v2986_v47 = vadd.f32 %v2985_v42, %v2984_v41  ;;  %v2923_v49 = vpop.f32.mrb[50].mxu1  ;;  %v2987_v21 = vpop.f32.mrb[50].mxu0 }
 0x15c   : > { %v2924_v51 = vpop.f32.mrb[51].mxu1  ;;  %v2988_v56 = vpop.f32.mrb[51].mxu0 }
 0x15d   : > { %v4070_v10 = vadd.f32 %v2922_v45, %v2810_v46  ;;  %v4073_v2 = vadd.f32 %v2986_v47, %v3989_v8  ;;  %v2925_v59 = vadd.f32 %v2924_v51, %v2923_v49  ;;  %v2989_v61 = vadd.f32 %v2988_v56, %v2987_v21 }
 0x15f   : > { %v4075_v63 = vadd.f32 %v2925_v59, %v2813_v53  ;;  %v4078_v16 = vadd.f32 %v2989_v61, %v3994_v11 }
 0x161   : > { %v2926_v30 = vpop.f32.mrb[52].mxu1  ;;  %v2990_v1 = vpop.f32.mrb[52].mxu0 }
 0x162   : > { %v2927_v6 = vpop.f32.mrb[53].mxu1  ;;  %v2991_v7 = vpop.f32.mrb[53].mxu0 }
 0x163   : > { %v2928_v9 = vadd.f32 %v2927_v6, %v2926_v30  ;;  %v2992_v23 = vadd.f32 %v2991_v7, %v2990_v1  ;;  %v2929_v32 = vpop.f32.mrb[54].mxu1  ;;  %v2993_v19 = vpop.f32.mrb[54].mxu0 }
 0x164   : > { %v2930_v46 = vpop.f32.mrb[55].mxu1  ;;  %v2994_v62 = vpop.f32.mrb[55].mxu0 }
 0x165   : > { %v4080_v22 = vadd.f32 %v2928_v9, %v2816_v48  ;;  %v4083_v8 = vadd.f32 %v2992_v23, %v4003_v29  ;;  %v2931_v53 = vadd.f32 %v2930_v46, %v2929_v32  ;;  %v2995_v24 = vadd.f32 %v2994_v62, %v2993_v19 }
 0x167   : > { %v4085_v25 = vadd.f32 %v2931_v53, %v2819_v57  ;;  %v4088_v11 = vadd.f32 %v2995_v24, %v4008_v33 }
 0x169   : > { %v2932_v27 = vpop.f32.mrb[56].mxu1  ;;  %v2996_v5 = vpop.f32.mrb[56].mxu0 }
 0x16a   : > { %v2933_v31 = vpop.f32.mrb[57].mxu1  ;;  %v2997_v43 = vpop.f32.mrb[57].mxu0 }
 0x16b   : > { %v2934_v40 = vadd.f32 %v2933_v31, %v2932_v27  ;;  %v2998_v41 = vadd.f32 %v2997_v43, %v2996_v5  ;;  %v2935_v14 = vpop.f32.mrb[58].mxu1  ;;  %v2999_v42 = vpop.f32.mrb[58].mxu0 }
 0x16c   : > { %v2936_v48 = vpop.f32.mrb[59].mxu1  ;;  %v3000_v45 = vpop.f32.mrb[59].mxu0 }
 0x16d   : > { %v4091_v29 = vadd.f32 %v2934_v40, %v4052_v3  ;;  %v4094_v47 = vadd.f32 %v2998_v41, %v4017_v50  ;;  %v2937_v57 = vadd.f32 %v2936_v48, %v2935_v14  ;;  %v3001_v49 = vadd.f32 %v3000_v45, %v2999_v42 }
 0x16f   : > { %v4096_v33 = vadd.f32 %v2937_v57, %v2825_v15  ;;  %v4099_v21 = vadd.f32 %v3001_v49, %v4022_v55 }
 0x171   : > { %v2938_v51 = vpop.f32.mrb[60].mxu1  ;;  %v3002_v56 = vpop.f32.mrb[60].mxu0 }
 0x172   : > { %v2939_v59 = vpop.f32.mrb[61].mxu1  ;;  %v3003_v61 = vpop.f32.mrb[61].mxu0 }
 0x173   : > { %v2940_v30 = vadd.f32 %v2939_v59, %v2938_v51  ;;  %v3004_v1 = vadd.f32 %v3003_v61, %v3002_v56  ;;  %v2941_v6 = vpop.f32.mrb[62].mxu1  ;;  %v3005_v7 = vpop.f32.mrb[62].mxu0 }
 0x174   : > { %v2942_v3 = vpop.f32.mrb[63].mxu1  ;;  %v3006_v9 = vpop.f32.mrb[63].mxu0 }
 0x175   : > { %v4102_v50 = vadd.f32 %v2940_v30, %v4060_v26  ;;  %v4105_v23 = vadd.f32 %v3004_v1, %v4031_v13  ;;  %v2943_v15 = vadd.f32 %v2942_v3, %v2941_v6  ;;  %v3007_v32 = vadd.f32 %v3006_v9, %v3005_v7 }
 0x177   : > { %v4108_v55 = vadd.f32 %v2943_v15, %v4065_v38  ;;  %v4111_v19 = vadd.f32 %v3007_v32, %v4036_v17 }
 0x179   : > { %v2944_v46 = vpop.f32.mrb[64].mxu1  ;;  %v3008_v62 = vpop.f32.mrb[64].mxu0 }
 0x17a   : > { %v2945_v53 = vpop.f32.mrb[65].mxu1  ;;  %v3009_v24 = vpop.f32.mrb[65].mxu0 }
 0x17b   : > { %v2946_v27 = vadd.f32 %v2945_v53, %v2944_v46  ;;  %v3010_v5 = vadd.f32 %v3009_v24, %v3008_v62  ;;  %v2947_v31 = vpop.f32.mrb[66].mxu1  ;;  %v3011_v26 = vpop.f32.mrb[66].mxu0 }
 0x17c   : > { %v2948_v43 = vpop.f32.mrb[67].mxu1  ;;  %v3012_v40 = vpop.f32.mrb[67].mxu0 }
 0x17d   : > { %v4114_v13 = vadd.f32 %v2946_v27, %v3936_v60  ;;  %v4117_v41 = vadd.f32 %v3010_v5, %v4041_v35  ;;  %v2949_v38 = vadd.f32 %v2948_v43, %v2947_v31  ;;  %v3013_v14 = vadd.f32 %v3012_v40, %v3011_v26 }
 0x17f   : > { %v4120_v17 = vadd.f32 %v2949_v38, %v3942_v4  ;;  %v4123_v42 = vadd.f32 %v3013_v14, %v4044_v39 }
 0x181   : > { %v2950_v48 = vpop.f32.mrb[68].mxu1  ;;  %v3014_v45 = vpop.f32.mrb[68].mxu0 }
 0x182   : > { %v2951_v57 = vpop.f32.mrb[69].mxu1  ;;  %v3015_v49 = vpop.f32.mrb[69].mxu0 }
 0x183   : > { %v2952_v51 = vadd.f32 %v2951_v57, %v2950_v48  ;;  %v3016_v56 = vadd.f32 %v3015_v49, %v3014_v45  ;;  %v2953_v59 = vpop.f32.mrb[70].mxu1  ;;  %v3017_v60 = vpop.f32.mrb[70].mxu0 }
 0x184   : > { %v2954_v61 = vpop.f32.mrb[71].mxu1  ;;  %v3018_v30 = vpop.f32.mrb[71].mxu0 }
 0x185   : > { %v4126_v35 = vadd.f32 %v2952_v51, %v3948_v12  ;;  %v4129_v1 = vadd.f32 %v3016_v56, %v4047_v0  ;;  %v2955_v4 = vadd.f32 %v2954_v61, %v2953_v59  ;;  %v3019_v6 = vadd.f32 %v3018_v30, %v3017_v60 }
 0x187   : > { %v4132_v39 = vadd.f32 %v2955_v4, %v3954_v20  ;;  %v4135_v7 = vadd.f32 %v3019_v6, %v4050_v58 }
 0x189   : > { %v2956_v3 = vpop.f32.mrb[72].mxu1  ;;  %v3020_v9 = vpop.f32.mrb[72].mxu0 }
 0x18a   : > { %v2957_v15 = vpop.f32.mrb[73].mxu1  ;;  %v3021_v32 = vpop.f32.mrb[73].mxu0 }
 0x18b   : > { %v2958_v46 = vadd.f32 %v2957_v15, %v2956_v3  ;;  %v3022_v62 = vadd.f32 %v3021_v32, %v3020_v9  ;;  %v2959_v53 = vpop.f32.mrb[74].mxu1  ;;  %v3023_v12 = vpop.f32.mrb[74].mxu0 }
 0x18c   : > { %v2960_v24 = vpop.f32.mrb[75].mxu1  ;;  %v3024_v27 = vpop.f32.mrb[75].mxu0 }
 0x18d   : > { %v4138_v0 = vadd.f32 %v2958_v46, %v3960_v28  ;;  %v4141_v5 = vadd.f32 %v3022_v62, %v4055_v37  ;;  %v2961_v20 = vadd.f32 %v2960_v24, %v2959_v53  ;;  %v3025_v31 = vadd.f32 %v3024_v27, %v3023_v12 }
 0x18f   : > { %v4144_v58 = vadd.f32 %v2961_v20, %v3966_v36  ;;  %v4147_v26 = vadd.f32 %v3025_v31, %v4058_v18 }
 0x191   : > { %v2962_v43 = vpop.f32.mrb[76].mxu1  ;;  %v3026_v40 = vpop.f32.mrb[76].mxu0 }
 0x192   : > { %v2963_v38 = vpop.f32.mrb[77].mxu1  ;;  %v3027_v14 = vpop.f32.mrb[77].mxu0 }
 0x193   : > { %v2964_v48 = vadd.f32 %v2963_v38, %v2962_v43  ;;  %v3028_v45 = vadd.f32 %v3027_v14, %v3026_v40  ;;  %v2965_v57 = vpop.f32.mrb[78].mxu1  ;;  %v3029_v28 = vpop.f32.mrb[78].mxu0 }
 0x194   : > { %v2966_v49 = vpop.f32.mrb[79].mxu1  ;;  %v3030_v51 = vpop.f32.mrb[79].mxu0 }
 0x195   : > { %v4150_v37 = vadd.f32 %v2964_v48, %v3972_v44  ;;  %v4153_v56 = vadd.f32 %v3028_v45, %v4063_v34  ;;  %v2967_v36 = vadd.f32 %v2966_v49, %v2965_v57  ;;  %v3031_v59 = vadd.f32 %v3030_v51, %v3029_v28 }
 0x197   : > { %v4156_v18 = vadd.f32 %v2967_v36, %v3978_v52  ;;  %v4159_v60 = vadd.f32 %v3031_v59, %v4068_v54 }
 0x199   : > { %v3032_v61 = vpop.f32.mrb[80].mxu0  ;;  %v3096_v30 = vpop.f32.mrb[80].mxu1 }
 0x19a   : > { %v3033_v4 = vpop.f32.mrb[81].mxu0  ;;  %v3097_v6 = vpop.f32.mrb[81].mxu1 }
 0x19b   : > { %v3034_v3 = vadd.f32 %v3033_v4, %v3032_v61  ;;  %v3098_v9 = vadd.f32 %v3097_v6, %v3096_v30  ;;  %v3035_v15 = vpop.f32.mrb[82].mxu0  ;;  %v3099_v44 = vpop.f32.mrb[82].mxu1 }
 0x19c   : > { %v3036_v32 = vpop.f32.mrb[83].mxu0  ;;  %v3100_v46 = vpop.f32.mrb[83].mxu1 }
 0x19d   : > { %v4162_v34 = vadd.f32 %v3034_v3, %v4070_v10  ;;  %v3037_v62 = vadd.f32 %v3036_v32, %v3035_v15  ;;  %v3101_v53 = vadd.f32 %v3100_v46, %v3099_v44  ;;  %v4165_v52 = vadd.f32 %v3098_v9, %v4073_v2 }
 0x19f   : > { %v4168_v54 = vadd.f32 %v3037_v62, %v4075_v63  ;;  %v4171_v12 = vadd.f32 %v3101_v53, %v4078_v16 }
 0x1a1   : > { %v3038_v24 = vpop.f32.mrb[84].mxu0  ;;  %v3102_v27 = vpop.f32.mrb[84].mxu1 }
 0x1a2   : > { %v3039_v20 = vpop.f32.mrb[85].mxu0  ;;  %v3103_v31 = vpop.f32.mrb[85].mxu1 }
 0x1a3   : > { %v3040_v43 = vadd.f32 %v3039_v20, %v3038_v24  ;;  %v3104_v40 = vadd.f32 %v3103_v31, %v3102_v27  ;;  %v3041_v38 = vpop.f32.mrb[86].mxu0  ;;  %v3105_v10 = vpop.f32.mrb[86].mxu1 }
 0x1a4   : > { %v3042_v14 = vpop.f32.mrb[87].mxu0  ;;  %v3106_v48 = vpop.f32.mrb[87].mxu1 }
 0x1a5   : > { %v4174_v45 = vadd.f32 %v3040_v43, %v4080_v22  ;;  %v3043_v2 = vadd.f32 %v3042_v14, %v3041_v38  ;;  %v3107_v57 = vadd.f32 %v3106_v48, %v3105_v10  ;;  %v4177_v63 = vadd.f32 %v3104_v40, %v4083_v8 }
 0x1a7   : > { %v4180_v16 = vadd.f32 %v3043_v2, %v4085_v25  ;;  %v4183_v28 = vadd.f32 %v3107_v57, %v4088_v11 }
 0x1a9   : > { %v3044_v49 = vpop.f32.mrb[88].mxu0  ;;  %v3108_v51 = vpop.f32.mrb[88].mxu1 }
 0x1aa   : > { %v3045_v36 = vpop.f32.mrb[89].mxu0  ;;  %v3109_v59 = vpop.f32.mrb[89].mxu1 }
 0x1ab   : > { %v3046_v61 = vadd.f32 %v3045_v36, %v3044_v49  ;;  %v3110_v30 = vadd.f32 %v3109_v59, %v3108_v51  ;;  %v3047_v4 = vpop.f32.mrb[90].mxu0  ;;  %v3111_v22 = vpop.f32.mrb[90].mxu1 }
 0x1ac   : > { %v3048_v6 = vpop.f32.mrb[91].mxu0  ;;  %v3112_v3 = vpop.f32.mrb[91].mxu1 }
 0x1ad   : > { %v4186_v9 = vadd.f32 %v3046_v61, %v4091_v29  ;;  %v3049_v8 = vadd.f32 %v3048_v6, %v3047_v4  ;;  %v3113_v15 = vadd.f32 %v3112_v3, %v3111_v22  ;;  %v4189_v25 = vadd.f32 %v3110_v30, %v4094_v47 }
 0x1af   : > { %v4192_v11 = vadd.f32 %v3049_v8, %v4096_v33  ;;  %v4195_v44 = vadd.f32 %v3113_v15, %v4099_v21 }
 0x1b1   : > { %v3050_v32 = vpop.f32.mrb[92].mxu0  ;;  %v3114_v46 = vpop.f32.mrb[92].mxu1 }
 0x1b2   : > { %v3051_v62 = vpop.f32.mrb[93].mxu0  ;;  %v3115_v53 = vpop.f32.mrb[93].mxu1 }
 0x1b3   : > { %v3052_v24 = vadd.f32 %v3051_v62, %v3050_v32  ;;  %v3116_v27 = vadd.f32 %v3115_v53, %v3114_v46  ;;  %v3053_v20 = vpop.f32.mrb[94].mxu0  ;;  %v3117_v29 = vpop.f32.mrb[94].mxu1 }
 0x1b4   : > { %v3054_v31 = vpop.f32.mrb[95].mxu0  ;;  %v3118_v43 = vpop.f32.mrb[95].mxu1 }
 0x1b5   : > { %v4198_v40 = vadd.f32 %v3052_v24, %v4102_v50  ;;  %v3055_v47 = vadd.f32 %v3054_v31, %v3053_v20  ;;  %v3119_v38 = vadd.f32 %v3118_v43, %v3117_v29  ;;  %v4201_v33 = vadd.f32 %v3116_v27, %v4105_v23 }
 0x1b7   : > { %v4204_v21 = vadd.f32 %v3055_v47, %v4108_v55  ;;  %v4207_v10 = vadd.f32 %v3119_v38, %v4111_v19 }
 0x1b9   : > { %v3056_v14 = vpop.f32.mrb[96].mxu0  ;;  %v3120_v48 = vpop.f32.mrb[96].mxu1 }
 0x1ba   : > { %v3057_v2 = vpop.f32.mrb[97].mxu0  ;;  %v3121_v57 = vpop.f32.mrb[97].mxu1 }
 0x1bb   : > { %v3058_v49 = vadd.f32 %v3057_v2, %v3056_v14  ;;  %v3122_v51 = vadd.f32 %v3121_v57, %v3120_v48  ;;  %v3059_v36 = vpop.f32.mrb[98].mxu0  ;;  %v3123_v50 = vpop.f32.mrb[98].mxu1 }
 0x1bc   : > { %v3060_v59 = vpop.f32.mrb[99].mxu0  ;;  %v3124_v61 = vpop.f32.mrb[99].mxu1 }
 0x1bd   : > { %v4210_v30 = vadd.f32 %v3058_v49, %v4114_v13  ;;  %v3061_v23 = vadd.f32 %v3060_v59, %v3059_v36  ;;  %v3125_v4 = vadd.f32 %v3124_v61, %v3123_v50  ;;  %v4213_v55 = vadd.f32 %v3122_v51, %v4117_v41 }
 0x1bf   : > { %v4216_v19 = vadd.f32 %v3061_v23, %v4120_v17  ;;  %v4219_v22 = vadd.f32 %v3125_v4, %v4123_v42 }
 0x1c1   : > { %v3062_v6 = vpop.f32.mrb[100].mxu0  ;;  %v3126_v3 = vpop.f32.mrb[100].mxu1 }
 0x1c2   : > { %v3063_v8 = vpop.f32.mrb[101].mxu0  ;;  %v3127_v15 = vpop.f32.mrb[101].mxu1 }
 0x1c3   : > { %v3064_v32 = vadd.f32 %v3063_v8, %v3062_v6  ;;  %v3128_v46 = vadd.f32 %v3127_v15, %v3126_v3  ;;  %v3065_v62 = vpop.f32.mrb[102].mxu0  ;;  %v3129_v13 = vpop.f32.mrb[102].mxu1 }
 0x1c4   : > { %v3066_v53 = vpop.f32.mrb[103].mxu0  ;;  %v3130_v24 = vpop.f32.mrb[103].mxu1 }
 0x1c5   : > { %v4222_v27 = vadd.f32 %v3064_v32, %v4126_v35  ;;  %v3067_v41 = vadd.f32 %v3066_v53, %v3065_v62  ;;  %v3131_v20 = vadd.f32 %v3130_v24, %v3129_v13  ;;  %v4225_v17 = vadd.f32 %v3128_v46, %v4129_v1 }
 0x1c7   : > { %v4228_v42 = vadd.f32 %v3067_v41, %v4132_v39  ;;  %v4231_v29 = vadd.f32 %v3131_v20, %v4135_v7 }
 0x1c9   : > { %v3068_v31 = vpop.f32.mrb[104].mxu0  ;;  %v3132_v43 = vpop.f32.mrb[104].mxu1 }
 0x1ca   : > { %v3069_v47 = vpop.f32.mrb[105].mxu0  ;;  %v3133_v38 = vpop.f32.mrb[105].mxu1 }
 0x1cb   : > { %v3070_v14 = vadd.f32 %v3069_v47, %v3068_v31  ;;  %v3134_v48 = vadd.f32 %v3133_v38, %v3132_v43  ;;  %v3071_v2 = vpop.f32.mrb[106].mxu0  ;;  %v3135_v35 = vpop.f32.mrb[106].mxu1 }
 0x1cc   : > { %v3072_v57 = vpop.f32.mrb[107].mxu0  ;;  %v3136_v49 = vpop.f32.mrb[107].mxu1 }
 0x1cd   : > { %v4234_v51 = vadd.f32 %v3070_v14, %v4138_v0  ;;  %v3073_v1 = vadd.f32 %v3072_v57, %v3071_v2  ;;  %v3137_v36 = vadd.f32 %v3136_v49, %v3135_v35  ;;  %v4237_v39 = vadd.f32 %v3134_v48, %v4141_v5 }
 0x1cf   : > { %v4240_v7 = vadd.f32 %v3073_v1, %v4144_v58  ;;  %v4243_v50 = vadd.f32 %v3137_v36, %v4147_v26 }
 0x1d1   : > { %v3074_v59 = vpop.f32.mrb[108].mxu0  ;;  %v3138_v61 = vpop.f32.mrb[108].mxu1 }
 0x1d2   : > { %v3075_v23 = vpop.f32.mrb[109].mxu0  ;;  %v3139_v4 = vpop.f32.mrb[109].mxu1 }
 0x1d3   : > { %v3076_v6 = vadd.f32 %v3075_v23, %v3074_v59  ;;  %v3140_v3 = vadd.f32 %v3139_v4, %v3138_v61  ;;  %v3077_v0 = vpop.f32.mrb[110].mxu0  ;;  %v3141_v8 = vpop.f32.mrb[110].mxu1 }
 0x1d4   : > { %v3078_v15 = vpop.f32.mrb[111].mxu0  ;;  %v3142_v32 = vpop.f32.mrb[111].mxu1 }
 0x1d5   : > { %v4246_v5 = vadd.f32 %v3076_v6, %v4150_v37  ;;  %v3079_v46 = vadd.f32 %v3078_v15, %v3077_v0  ;;  %v3143_v58 = vadd.f32 %v3142_v32, %v3141_v8  ;;  %v4249_v62 = vadd.f32 %v3140_v3, %v4153_v56 }
 0x1d7   : > { %v4253_v26 = vadd.f32 %v3079_v46, %v4156_v18  ;;  %v4256_v13 = vadd.f32 %v3143_v58, %v4159_v60 }
 0x1d9   : > { %v3144_v53 = vpop.f32.mrb[112].mxu1  ;;  %v3234_v37 = vpop.f32.mrb[112].mxu0 }
 0x1da   : > { %v2310_v56 = vadd.f32 %v3234_v37, %v4177_v63  ;;  %v3145_v24 = vpop.f32.mrb[113].mxu1  ;;  %v2301_v18 = vpop.f32.mrb[113].mxu0 }
 0x1db   : > { %v3146_v41 = vadd.f32 %v3145_v24, %v3144_v53  ;;  %v2302_v60 = vadd.f32 %v2301_v18, %v4165_v52  ;;  %v3147_v20 = vpop.f32.mrb[114].mxu1  ;;  %v3235_v31 = vpop.f32.mrb[114].mxu0 }
 0x1dc   : > { %2431 = vst.msk [vmem:[%s4261_s10 + $0x10] sm:$0xff] %vm2428_vm0, %v2310_v56  ;;  %v2313_v43 = vadd.f32 %v3235_v31, %v4183_v28  ;;  %v3148_v47 = vpop.f32.mrb[115].mxu1  ;;  %v2304_v38 = vpop.f32.mrb[115].mxu0 }
 0x1dd   : > { %2429 = vst.msk [vmem:[%s4261_s10] sm:$0xff] %vm2428_vm0, %v2302_v60  ;;  %v3149_v14 = vadd.f32 %v3148_v47, %v3147_v20  ;;  %v2305_v63 = vadd.f32 %v2304_v38, %v4171_v12  ;;  %v4272_v48 = vadd.f32 %v3146_v41, %v4162_v34 }
 0x1de   : > { %2432 = vst.msk [vmem:[%s4261_s10 + $0x18] sm:$0xff] %vm2428_vm0, %v2313_v43 }
 0x1df   : > { %2430 = vst.msk [vmem:[%s4261_s10 + $0x8] sm:$0xff] %vm2428_vm0, %v2305_v63  ;;  %v4279_v52 = vadd.f32 %v3149_v14, %v4168_v54 }
 0x1e1   : > { %v3150_v28 = vpop.f32.mrb[116].mxu1  ;;  %v3238_v2 = vpop.f32.mrb[116].mxu0 }
 0x1e2   : > { %v2326_v35 = vadd.f32 %v3238_v2, %v4201_v33  ;;  %v3151_v57 = vpop.f32.mrb[117].mxu1  ;;  %v2317_v49 = vpop.f32.mrb[117].mxu0 }
 0x1e3   : > { %v3152_v12 = vadd.f32 %v3151_v57, %v3150_v28  ;;  %v2318_v34 = vadd.f32 %v2317_v49, %v4189_v25  ;;  %v3153_v1 = vpop.f32.mrb[118].mxu1  ;;  %v3239_v36 = vpop.f32.mrb[118].mxu0 }
 0x1e4   : > { %2435 = vst.msk [vmem:[%s4261_s10 + $0x30] sm:$0xff] %vm2428_vm0, %v2326_v35  ;;  %v2329_v59 = vadd.f32 %v3239_v36, %v4207_v10  ;;  %v3154_v61 = vpop.f32.mrb[119].mxu1  ;;  %v2320_v54 = vpop.f32.mrb[119].mxu0 }
 0x1e5   : > { %2433 = vst.msk [vmem:[%s4261_s10 + $0x20] sm:$0xff] %vm2428_vm0, %v2318_v34  ;;  %v3155_v23 = vadd.f32 %v3154_v61, %v3153_v1  ;;  %v2321_v33 = vadd.f32 %v2320_v54, %v4195_v44  ;;  %v2213_v4 = vadd.f32 %v3152_v12, %v4174_v45 }
 0x1e6   : > { %2436 = vst.msk [vmem:[%s4261_s10 + $0x38] sm:$0xff] %vm2428_vm0, %v2329_v59 }
 0x1e7   : > { %2434 = vst.msk [vmem:[%s4261_s10 + $0x28] sm:$0xff] %vm2428_vm0, %v2321_v33  ;;  %v2216_v25 = vadd.f32 %v3155_v23, %v4180_v16 }
 0x1e9   : > { %v3156_v6 = vpop.f32.mrb[120].mxu1  ;;  %v3242_v3 = vpop.f32.mrb[120].mxu0 }
 0x1ea   : > { %v2342_v10 = vadd.f32 %v3242_v3, %v4225_v17  ;;  %v3157_v0 = vpop.f32.mrb[121].mxu1  ;;  %v2333_v8 = vpop.f32.mrb[121].mxu0 }
 0x1eb   : > { %v3158_v15 = vadd.f32 %v3157_v0, %v3156_v6  ;;  %v2334_v44 = vadd.f32 %v2333_v8, %v4213_v55  ;;  %v3159_v32 = vpop.f32.mrb[122].mxu1  ;;  %v3243_v45 = vpop.f32.mrb[122].mxu0 }
 0x1ec   : > { %2439 = vst.msk [vmem:[%s4261_s10 + $0x50] sm:$0xff] %vm2428_vm0, %v2342_v10  ;;  %v2345_v46 = vadd.f32 %v3243_v45, %v4231_v29  ;;  %v3160_v58 = vpop.f32.mrb[123].mxu1  ;;  %v2336_v53 = vpop.f32.mrb[123].mxu0 }
 0x1ed   : > { %2437 = vst.msk [vmem:[%s4261_s10 + $0x40] sm:$0xff] %vm2428_vm0, %v2334_v44  ;;  %v3161_v16 = vadd.f32 %v3160_v58, %v3159_v32  ;;  %v2337_v17 = vadd.f32 %v2336_v53, %v4219_v22  ;;  %v2221_v37 = vadd.f32 %v3158_v15, %v4186_v9 }
 0x1ee   : > { %2440 = vst.msk [vmem:[%s4261_s10 + $0x58] sm:$0xff] %vm2428_vm0, %v2345_v46 }
 0x1ef   : > { %2438 = vst.msk [vmem:[%s4261_s10 + $0x48] sm:$0xff] %vm2428_vm0, %v2337_v17  ;;  %v2224_v55 = vadd.f32 %v3161_v16, %v4192_v11 }
 0x1f1   : > { %v3162_v56 = vpop.f32.mrb[124].mxu1  ;;  %v3246_v24 = vpop.f32.mrb[124].mxu0 }
 0x1f2   : > { %v2358_v29 = vadd.f32 %v3246_v24, %v4249_v62  ;;  %v3163_v18 = vpop.f32.mrb[125].mxu1  ;;  %v2349_v41 = vpop.f32.mrb[125].mxu0 }
 0x1f3   : > { %v3164_v60 = vadd.f32 %v3163_v18, %v3162_v56  ;;  %v2350_v22 = vadd.f32 %v2349_v41, %v4237_v39  ;;  %v3165_v20 = vpop.f32.mrb[126].mxu1  ;;  %v3247_v9 = vpop.f32.mrb[126].mxu0 }
 0x1f4   : > { %2443 = vst.msk [vmem:[%s4261_s10 + $0x70] sm:$0xff] %vm2428_vm0, %v2358_v29  ;;  %v2361_v31 = vadd.f32 %v3247_v9, %v4256_v13  ;;  %v3166_v43 = vpop.f32.mrb[127].mxu1  ;;  %v2352_v47 = vpop.f32.mrb[127].mxu0 }
 0x1f5   : > { %2441 = vst.msk [vmem:[%s4261_s10 + $0x60] sm:$0xff] %vm2428_vm0, %v2350_v22  ;;  %v3167_v11 = vadd.f32 %v3166_v43, %v3165_v20  ;;  %v2353_v62 = vadd.f32 %v2352_v47, %v4243_v50  ;;  %v2229_v38 = vadd.f32 %v3164_v60, %v4198_v40 }
 0x1f6   : > { %2444 = vst.msk [vmem:[%s4261_s10 + $0x78] sm:$0xff] %vm2428_vm0, %v2361_v31 }
 0x1f7   : > { %2442 = vst.msk [vmem:[%s4261_s10 + $0x68] sm:$0xff] %vm2428_vm0, %v2353_v62  ;;  %v2232_v39 = vadd.f32 %v3167_v11, %v4204_v21 }
 0x1f9   : > { %v3168_v14 = vpop.f32.mrb[128].mxu1  ;;  %v3250_v63 = vpop.f32.mrb[128].mxu0 }
 0x1fa   : > { %v2374_v13 = vadd.f32 %v3250_v63, %v2213_v4  ;;  %v3169_v28 = vpop.f32.mrb[129].mxu1  ;;  %v2365_v2 = vpop.f32.mrb[129].mxu0 }
 0x1fb   : > { %v3170_v35 = vadd.f32 %v3169_v28, %v3168_v14  ;;  %v2366_v57 = vadd.f32 %v2365_v2, %v4272_v48  ;;  %v3171_v50 = vpop.f32.mrb[130].mxu1  ;;  %v3251_v49 = vpop.f32.mrb[130].mxu0 }
 0x1fc   : > { %2447 = vst.msk [vmem:[%s4261_s10 + $0x90] sm:$0xff] %vm2428_vm0, %v2374_v13  ;;  %v2377_v40 = vadd.f32 %v3251_v49, %v2216_v25  ;;  %v3172_v12 = vpop.f32.mrb[131].mxu1  ;;  %v2368_v34 = vpop.f32.mrb[131].mxu0 }
 0x1fd   : > { %2445 = vst.msk [vmem:[%s4261_s10 + $0x80] sm:$0xff] %vm2428_vm0, %v2366_v57  ;;  %v3173_v21 = vadd.f32 %v3172_v12, %v3171_v50  ;;  %v2369_v1 = vadd.f32 %v2368_v34, %v4279_v52  ;;  %v2237_v36 = vadd.f32 %v3170_v35, %v4210_v30 }
 0x1fe   : > { %2448 = vst.msk [vmem:[%s4261_s10 + $0x98] sm:$0xff] %vm2428_vm0, %v2377_v40 }
 0x1ff   : > { %2446 = vst.msk [vmem:[%s4261_s10 + $0x88] sm:$0xff] %vm2428_vm0, %v2369_v1  ;;  %v2240_v48 = vadd.f32 %v3173_v21, %v4216_v19 }
 0x201   : > { %v3174_v59 = vpop.f32.mrb[132].mxu1  ;;  %v3254_v61 = vpop.f32.mrb[132].mxu0 }
 0x202   : > { %v2390_v54 = vadd.f32 %v3254_v61, %v2229_v38  ;;  %v3175_v23 = vpop.f32.mrb[133].mxu1  ;;  %v2381_v33 = vpop.f32.mrb[133].mxu0 }
 0x203   : > { %v3176_v4 = vadd.f32 %v3175_v23, %v3174_v59  ;;  %v2382_v25 = vadd.f32 %v2381_v33, %v2221_v37  ;;  %v3177_v6 = vpop.f32.mrb[134].mxu1  ;;  %v3255_v52 = vpop.f32.mrb[134].mxu0 }
 0x204   : > { %2451 = vst.msk [vmem:[%s4261_s10 + $0xb0] sm:$0xff] %vm2428_vm0, %v2390_v54  ;;  %v2393_v30 = vadd.f32 %v3255_v52, %v2232_v39  ;;  %v3178_v3 = vpop.f32.mrb[135].mxu1  ;;  %v2384_v10 = vpop.f32.mrb[135].mxu0 }
 0x205   : > { %2449 = vst.msk [vmem:[%s4261_s10 + $0xa0] sm:$0xff] %vm2428_vm0, %v2382_v25  ;;  %v3179_v19 = vadd.f32 %v3178_v3, %v3177_v6  ;;  %v2385_v0 = vadd.f32 %v2384_v10, %v2224_v55  ;;  %v2245_v8 = vadd.f32 %v3176_v4, %v4222_v27 }
 0x206   : > { %2452 = vst.msk [vmem:[%s4261_s10 + $0xb8] sm:$0xff] %vm2428_vm0, %v2393_v30 }
 0x207   : > { %2450 = vst.msk [vmem:[%s4261_s10 + $0xa8] sm:$0xff] %vm2428_vm0, %v2385_v0  ;;  %v2248_v15 = vadd.f32 %v3179_v19, %v4228_v42 }
 0x209   : > { %v3180_v44 = vpop.f32.mrb[136].mxu1  ;;  %v3258_v32 = vpop.f32.mrb[136].mxu0 }
 0x20a   : > { %v2406_v45 = vadd.f32 %v3258_v32, %v2245_v8  ;;  %v3181_v46 = vpop.f32.mrb[137].mxu1  ;;  %v2397_v58 = vpop.f32.mrb[137].mxu0 }
 0x20b   : > { %v3182_v53 = vadd.f32 %v3181_v46, %v3180_v44  ;;  %v2398_v16 = vadd.f32 %v2397_v58, %v2237_v36  ;;  %v3183_v17 = vpop.f32.mrb[138].mxu1  ;;  %v3259_v37 = vpop.f32.mrb[138].mxu0 }
 0x20c   : > { %2455 = vst.msk [vmem:[%s4261_s10 + $0xd0] sm:$0xff] %vm2428_vm0, %v2406_v45  ;;  %v2409_v27 = vadd.f32 %v3259_v37, %v2248_v15  ;;  %v3184_v55 = vpop.f32.mrb[139].mxu1  ;;  %v2400_v56 = vpop.f32.mrb[139].mxu0 }
 0x20d   : > { %2453 = vst.msk [vmem:[%s4261_s10 + $0xc0] sm:$0xff] %vm2428_vm0, %v2398_v16  ;;  %v3185_v24 = vadd.f32 %v3184_v55, %v3183_v17  ;;  %v2401_v42 = vadd.f32 %v2400_v56, %v2240_v48  ;;  %v2253_v29 = vadd.f32 %v3182_v53, %v4234_v51 }
 0x20e   : > { %2456 = vst.msk [vmem:[%s4261_s10 + $0xd8] sm:$0xff] %vm2428_vm0, %v2409_v27 }
 0x20f   : > { %2454 = vst.msk [vmem:[%s4261_s10 + $0xc8] sm:$0xff] %vm2428_vm0, %v2401_v42  ;;  %v2256_v18 = vadd.f32 %v3185_v24, %v4240_v7 }
 0x211   : > { %v3186_v41 = vpop.f32.mrb[140].mxu1  ;;  %v3262_v60 = vpop.f32.mrb[140].mxu0 }
 0x212   : > { %v3187_v22 = vpop.f32.mrb[141].mxu1  ;;  %v2413_v20 = vpop.f32.mrb[141].mxu0 }
 0x213   : > { %v3188_v9 = vadd.f32 %v3187_v22, %v3186_v41  ;;  %v2414_v31 = vadd.f32 %v2413_v20, %v2253_v29  ;;  %v3189_v43 = vpop.f32.mrb[142].mxu1  ;;  %v3263_v47 = vpop.f32.mrb[142].mxu0 }
 0x214   : > { %v3190_v11 = vpop.f32.mrb[143].mxu1  ;;  %v2416_v62 = vpop.f32.mrb[143].mxu0 }
 0x215   : > { %v2261_v51 = vadd.f32 %v3188_v9, %v4246_v5  ;;  %2457 = vst.msk [vmem:[%s4261_s10 + $0xe0] sm:$0xff] %vm2428_vm0, %v2414_v31  ;;  %v3191_v38 = vadd.f32 %v3190_v11, %v3189_v43  ;;  %v2417_v39 = vadd.f32 %v2416_v62, %v2256_v18 }
 0x217   : > { %v2422_v7 = vadd.f32 %v3262_v60, %v2261_v51  ;;  %v2264_v14 = vadd.f32 %v3191_v38, %v4253_v26  ;;  %2458 = vst.msk [vmem:[%s4261_s10 + $0xe8] sm:$0xff] %vm2428_vm0, %v2417_v39 }
 0x219   : > { %2459 = vst.msk [vmem:[%s4261_s10 + $0xf0] sm:$0xff] %vm2428_vm0, %v2422_v7  ;;  %v2425_v63 = vadd.f32 %v3263_v47, %v2264_v14 }
 0x21b   : > { %2460 = vst.msk [vmem:[%s4261_s10 + $0xf8] sm:$0xff] %vm2428_vm0, %v2425_v63 }
 0x21c PF: > { %s12_s9 = sadd.s32 1, %s3575_s9  }
 0x21d   : > { %p9_p4 = scmp.ge.s32.totalorder %s12_s9, 4  }
 0x21f   :  { %11 = sbr.rel (!%p9_p4) target bundleno = 1 (0x1), region = 58 }

// kernel: dense_block_forward.14
= control target key start
LH: loop header
LB: loop body
LE: loop exit
PB: predicated region body
PF: predicated region fallthrough
CT: control target
= control target key end

     0   :  { %s1294_s15 = smov 0   ;;  %s1613_s0 = inlined_call_operand.vmem [shape: f32[512,160], index: 0, kind: input, shape index: {}]   ;;  %s1614_s1 = inlined_call_operand.vmem [shape: f32[1,160], index: 1, kind: input, shape index: {}]   ;;  %s1615_s2 = inlined_call_operand.vmem [shape: f32[1,160], index: 2, kind: input, shape index: {}]   ;;  %s1616_s3 = inlined_call_operand.vmem [shape: bf16[160,128], index: 3, kind: input, shape index: {}]   ;;  %s1617_s4 = inlined_call_operand.vmem [shape: bf16[512,128], index: 4, kind: output, shape index: {}]  }
   0x1 LB: > { %s1023_s16 = sadd.s32 4294967295, %s1266_s15   ;;  %p1027_p0 = scmp.ge.s32.totalorder %s1266_s15, 1  ;;  %s1266_s15 = sphi %s1294_s15, %s14_s15  }
   0x2   : > { %p164_p1 = scmp.lt.s32.totalorder %s1266_s15, 3 }
   0x4   : > { %p165_p2 = pnand %p1027_p0, %p164_p1 }
   0x5   : > { %v1250_v0 = vld [vmem:[%s1616_s3] sm:$0xff] (!%p165_p2)   ;;  %v271_v1 = vlaneseq (!%p165_p2)  ;;  %v1268_v2 = vmov (!%p165_p2), 0   ;;  %s1028_s19 = sshll.u32 (!%p165_p2), %s1023_s16, 5  ;;  %v1251_v3 = vld [vmem:[%s1616_s3 + $0x8] sm:$0xff] (!%p165_p2)   ;;  %v1252_v5 = vld [vmem:[%s1616_s3 + $0x10] sm:$0xff] (!%p165_p2)   ;;  %vm597_vm0 = vcmask (!%p165_p2), 261120  }
   0x6   : > { %168 = sbr.rel (%p165_p2) target bundleno = 319 (0x13f), region = 36  ;;  %646 = vmatprep.subr.bf16.mxu0 (!%p165_p2), %v1268_v2  ;;  %1221 = vmatprep.subr.bf16.mxu1 (!%p165_p2), %v1268_v2  ;;  %p192_p3 = scmp.lt.s32.totalorder (!%p165_p2), %s1028_s19, 63  ;;  %v1253_v7 = vld [vmem:[%s1616_s3 + $0x18] sm:$0xff] (!%p165_p2)   ;;  %v269_v10 = vld [vmem:[%s1614_s1] sm:$0x3] (!%p165_p2)  ;;  %v1255_v32 = vld [vmem:[%s1616_s3 + $0x28] sm:$0xff] (!%p165_p2)  }
   0x7   : > { %647 = vmatpush1.bf16.msra.mxu0 (!%p165_p2), %v1250_v0  ;;  %1231 = vmatpush1.bf16.msra.mxu1 (!%p165_p2), %v1250_v0  ;;  %v272_v4 = vshrl.u32 (!%p165_p2), %v271_v1, 7  ;;  %v345_v12 = vld [vmem:[%s1615_s2] sm:$0x3] (!%p165_p2)  ;;  %v1256_v42 = vld [vmem:[%s1616_s3 + $0x30] sm:$0xff] (!%p165_p2)   ;;  %v1257_v53 = vld [vmem:[%s1616_s3 + $0x38] sm:$0xff] (!%p165_p2)  }
   0x8   : > { %648 = vmatprep.subr.bf16.mxu0 (!%p165_p2), %v1268_v2  ;;  %1222 = vmatprep.subr.bf16.mxu1 (!%p165_p2), %v1268_v2  ;;  %v1254_v21 = vld [vmem:[%s1616_s3 + $0x20] sm:$0xff] (!%p165_p2)  }
   0x9   : > { %v277_v6 = vsub.s32 (!%p165_p2), 1, %v272_v4  ;;  %v273_v15 = vsub.s32 (!%p165_p2), 0, %v272_v4 }
   0xb   : > { %649 = vmatpush1.bf16.msra.mxu0 (!%p165_p2), %v1251_v3  ;;  %1232 = vmatpush1.bf16.msra.mxu1 (!%p165_p2), %v1251_v3  ;;  %v1335_v11 = vrot.slane (!%p165_p2), %v269_v10, %v277_v6  ;;  %v1342_v16 = vrot.slane (!%p165_p2), %v345_v12, %v277_v6  ;;  %v1356_v25 = vrot.slane (!%p165_p2), %v269_v10, %v273_v15 }
   0xc   : > { %650 = vmatprep.subr.bf16.mxu0 (!%p165_p2), %v1268_v2  ;;  %1223 = vmatprep.subr.bf16.mxu1 (!%p165_p2), %v1268_v2  ;;  %v1366_v35 = vrot.slane (!%p165_p2), %v345_v12, %v273_v15 }
   0xd   : > { %s1619_s19 = smov (!%p192_p3, %s1028_s19), 63 }
   0xe   : > { %s1093_s24 = sshll.u32 %s1619_s19, 4  ;;  %s1032_s22 = sshll.u32 %s1619_s19, 2 }
   0xf   : > { %s1323_s27 = scalar_lea.vmem %s1613_s0, %s1093_s24  ;;  %651 = vmatpush1.bf16.msra.mxu0 %v1252_v5  ;;  %1233 = vmatpush1.bf16.msra.mxu1 %v1252_v5  ;;  %s1592_s25 = scalar_lea.vmem %s1617_s4, %s1032_s22 }
  0x10   : > { %v206_v8 = vld [vmem:[%s1323_s27 + $0x8] sm:$0xff]  ;;  %v208_v9 = vld [vmem:[%s1323_s27 + $0x18] sm:$0xff]  ;;  %652 = vmatprep.subr.bf16.mxu0 %v1268_v2  ;;  %1224 = vmatprep.subr.bf16.mxu1 %v1268_v2  ;;  %v205_v30 = vld [vmem:[%s1323_s27] sm:$0xff] }
  0x11   : > { %v238_v13 = vld [vmem:[%s1323_s27 + $0x108] sm:$0xff]  ;;  %v240_v14 = vld [vmem:[%s1323_s27 + $0x118] sm:$0xff]  ;;  %v282_v17 = vmul.f32 %v1335_v11, %v206_v8  ;;  %v284_v18 = vmul.f32 %v1335_v11, %v208_v9  ;;  %v207_v31 = vld [vmem:[%s1323_s27 + $0x10] sm:$0xff]  ;;  %v281_v37 = vmul.f32 %v1356_v25, %v205_v30 }
  0x12   : > { %v314_v19 = vmul.f32 %v1335_v11, %v238_v13  ;;  %v316_v20 = vmul.f32 %v1335_v11, %v240_v14  ;;  %v283_v38 = vmul.f32 %v1356_v25, %v207_v31  ;;  %v237_v39 = vld [vmem:[%s1323_s27 + $0x100] sm:$0xff]  ;;  %v239_v40 = vld [vmem:[%s1323_s27 + $0x110] sm:$0xff]  ;;  %v210_v41 = vld [vmem:[%s1323_s27 + $0x28] sm:$0xff] }
  0x13   : > { %653 = vmatpush1.bf16.msra.mxu0 %v1253_v7  ;;  %1234 = vmatpush1.bf16.msra.mxu1 %v1253_v7  ;;  %v358_v22 = vadd.f32 %v1342_v16, %v282_v17  ;;  %v360_v23 = vadd.f32 %v1342_v16, %v284_v18  ;;  %v212_v43 = vld [vmem:[%s1323_s27 + $0x38] sm:$0xff]  ;;  %v242_v44 = vld [vmem:[%s1323_s27 + $0x128] sm:$0xff]  ;;  %v313_v45 = vmul.f32 %v1356_v25, %v237_v39  ;;  %v209_v55 = vld [vmem:[%s1323_s27 + $0x20] sm:$0xff] }
  0x14   : > { %654 = vmatprep.subr.bf16.mxu0 %v1268_v2  ;;  %1225 = vmatprep.subr.bf16.mxu1 %v1268_v2  ;;  %v390_v24 = vadd.f32 %v1342_v16, %v314_v19  ;;  %v392_v26 = vadd.f32 %v1342_v16, %v316_v20  ;;  %v315_v46 = vmul.f32 %v1356_v25, %v239_v40  ;;  %v244_v47 = vld [vmem:[%s1323_s27 + $0x138] sm:$0xff]  ;;  %v211_v56 = vld [vmem:[%s1323_s27 + $0x30] sm:$0xff]  ;;  %v241_v59 = vld [vmem:[%s1323_s27 + $0x120] sm:$0xff] }
  0x15   : > { %v422_v27 = vmax.f32 %v358_v22, 0.0  ;;  %v424_v28 = vmax.f32 %v360_v23, 0.0  ;;  %v357_v48 = vadd.f32 %v1366_v35, %v281_v37  ;;  %v359_v49 = vadd.f32 %v1366_v35, %v283_v38  ;;  %v243_v63 = vld [vmem:[%s1323_s27 + $0x130] sm:$0xff]  ;;  %v214_v0 = vld [vmem:[%s1323_s27 + $0x48] sm:$0xff]  ;;  %v216_v6 = vld [vmem:[%s1323_s27 + $0x58] sm:$0xff] }
  0x16   : > { %v454_v29 = vmax.f32 %v390_v24, 0.0  ;;  %v456_v33 = vmax.f32 %v392_v26, 0.0  ;;  %v286_v50 = vmul.f32 %v1335_v11, %v210_v41  ;;  %v288_v51 = vmul.f32 %v1335_v11, %v212_v43  ;;  %v1258_v7 = vld [vmem:[%s1616_s3 + $0x40] sm:$0xff]   ;;  %v246_v15 = vld [vmem:[%s1323_s27 + $0x148] sm:$0xff]  ;;  %v248_v17 = vld [vmem:[%s1323_s27 + $0x158] sm:$0xff] }
  0x17   : > { %655 = vmatpush1.bf16.msra.mxu0 %v1254_v21  ;;  %1235 = vmatpush1.bf16.msra.mxu1 %v1254_v21  ;;  %v486_v34 = vpack.c.bf16 %v424_v28, %v422_v27  ;;  %v318_v52 = vmul.f32 %v1335_v11, %v242_v44  ;;  %v320_v54 = vmul.f32 %v1335_v11, %v244_v47  ;;  %v421_v60 = vmax.f32 %v357_v48, 0.0  ;;  %v213_v26 = vld [vmem:[%s1323_s27 + $0x40] sm:$0xff]  ;;  %v215_v27 = vld [vmem:[%s1323_s27 + $0x50] sm:$0xff]  ;;  %v218_v43 = vld [vmem:[%s1323_s27 + $0x68] sm:$0xff] }
  0x18   : > { %656 = vmatprep.subr.bf16.mxu0 %v1268_v2  ;;  %1226 = vmatprep.subr.bf16.mxu1 %v1268_v2  ;;  %v502_v36 = vpack.c.bf16 %v456_v33, %v454_v29  ;;  %v389_v57 = vadd.f32 %v1366_v35, %v313_v45  ;;  %v391_v58 = vadd.f32 %v1366_v35, %v315_v46  ;;  %v423_v61 = vmax.f32 %v359_v49, 0.0  ;;  %v245_v28 = vld [vmem:[%s1323_s27 + $0x140] sm:$0xff]  ;;  %v1259_v29 = vld [vmem:[%s1616_s3 + $0x48] sm:$0xff]   ;;  %v220_v44 = vld [vmem:[%s1323_s27 + $0x78] sm:$0xff] }
  0x19   : > { %1043 = vmatprep.mubr.msk.bf16.mxu0 %vm597_vm0, %v486_v34  ;;  %v362_v62 = vadd.f32 %v1342_v16, %v286_v50  ;;  %v364_v1 = vadd.f32 %v1342_v16, %v288_v51  ;;  %v394_v3 = vadd.f32 %v1342_v16, %v318_v52  ;;  %v285_v4 = vmul.f32 %v1356_v25, %v209_v55  ;;  %v247_v34 = vld [vmem:[%s1323_s27 + $0x150] sm:$0xff]  ;;  %v250_v52 = vld [vmem:[%s1323_s27 + $0x168] sm:$0xff] }
  0x1a   : > { %1051 = vmatprep.mubr.msk.bf16.mxu1 %vm597_vm0, %v502_v36  ;;  %v287_v5 = vmul.f32 %v1356_v25, %v211_v56  ;;  %v396_v8 = vadd.f32 %v1342_v16, %v320_v54  ;;  %v317_v9 = vmul.f32 %v1356_v25, %v241_v59  ;;  %v453_v10 = vmax.f32 %v389_v57, 0.0 }
  0x1b   : > { %657 = vmatpush1.bf16.msra.mxu0 %v1255_v32  ;;  %1236 = vmatpush1.bf16.msra.mxu1 %v1255_v32  ;;  %v455_v12 = vmax.f32 %v391_v58, 0.0  ;;  %v319_v13 = vmul.f32 %v1356_v25, %v243_v63  ;;  %v290_v14 = vmul.f32 %v1335_v11, %v214_v0  ;;  %v485_v18 = vpack.c.bf16 %v423_v61, %v421_v60 }
  0x1c   : > { %658 = vmatprep.subr.bf16.mxu0 %v1268_v2  ;;  %1227 = vmatprep.subr.bf16.mxu1 %v1268_v2  ;;  %v426_v19 = vmax.f32 %v362_v62, 0.0  ;;  %v292_v20 = vmul.f32 %v1335_v11, %v216_v6  ;;  %v428_v21 = vmax.f32 %v364_v1, 0.0  ;;  %v458_v22 = vmax.f32 %v394_v3, 0.0 }
  0x1d   : > { %v361_v23 = vadd.f32 %v1366_v35, %v285_v4  ;;  %v363_v24 = vadd.f32 %v1366_v35, %v287_v5  ;;  %v460_v30 = vmax.f32 %v396_v8, 0.0  ;;  %v393_v31 = vadd.f32 %v1366_v35, %v317_v9  ;;  %v217_v4 = vld [vmem:[%s1323_s27 + $0x60] sm:$0xff]  ;;  %v219_v9 = vld [vmem:[%s1323_s27 + $0x70] sm:$0xff] }
  0x1e   : > { %v322_v32 = vmul.f32 %v1335_v11, %v246_v15  ;;  %v324_v33 = vmul.f32 %v1335_v11, %v248_v17  ;;  %v501_v36 = vpack.c.bf16 %v455_v12, %v453_v10  ;;  %v395_v37 = vadd.f32 %v1366_v35, %v319_v13  ;;  %v249_v10 = vld [vmem:[%s1323_s27 + $0x160] sm:$0xff]  ;;  %v251_v12 = vld [vmem:[%s1323_s27 + $0x170] sm:$0xff] }
  0x1f   : > { %659 = vmatpush1.bf16.msra.mxu0 %v1256_v42  ;;  %1237 = vmatpush1.bf16.msra.mxu1 %v1256_v42  ;;  %v366_v38 = vadd.f32 %v1342_v16, %v290_v14  ;;  %v368_v39 = vadd.f32 %v1342_v16, %v292_v20  ;;  %v289_v40 = vmul.f32 %v1356_v25, %v213_v26  ;;  %v425_v46 = vmax.f32 %v361_v23, 0.0  ;;  %v256_v26 = vld [vmem:[%s1323_s27 + $0x198] sm:$0xff] }
  0x20   : > { %660 = vmatprep.subr.bf16.mxu0 %v1268_v2  ;;  %1228 = vmatprep.subr.bf16.mxu1 %v1268_v2  ;;  %v291_v41 = vmul.f32 %v1356_v25, %v215_v27  ;;  %v321_v42 = vmul.f32 %v1356_v25, %v245_v28  ;;  %v488_v45 = vpack.c.bf16 %v428_v21, %v426_v19  ;;  %v457_v49 = vmax.f32 %v393_v31, 0.0  ;;  %v224_v19 = vld [vmem:[%s1323_s27 + $0x98] sm:$0xff] }
  0x21   : > { %v323_v47 = vmul.f32 %v1356_v25, %v247_v34  ;;  %v504_v48 = vpack.c.bf16 %v460_v30, %v458_v22  ;;  %v398_v50 = vadd.f32 %v1342_v16, %v322_v32  ;;  %v400_v51 = vadd.f32 %v1342_v16, %v324_v33 }
  0x22   : > { %v459_v54 = vmax.f32 %v395_v37, 0.0  ;;  %v430_v55 = vmax.f32 %v366_v38, 0.0  ;;  %v294_v56 = vmul.f32 %v1335_v11, %v218_v43  ;;  %v296_v57 = vmul.f32 %v1335_v11, %v220_v44  ;;  %v223_v44 = vld [vmem:[%s1323_s27 + $0x90] sm:$0xff] }
  0x23   : > { %661 = vmatpush1.bf16.msra.mxu0 %v1257_v53  ;;  %1238 = vmatpush1.bf16.msra.mxu1 %v1257_v53  ;;  %v252_v53 = vld [vmem:[%s1323_s27 + $0x178] sm:$0xff]  ;;  %v432_v58 = vmax.f32 %v368_v39, 0.0  ;;  %v365_v59 = vadd.f32 %v1366_v35, %v289_v40  ;;  %v367_v60 = vadd.f32 %v1366_v35, %v291_v41  ;;  %v397_v61 = vadd.f32 %v1366_v35, %v321_v42  ;;  %v221_v39 = vld [vmem:[%s1323_s27 + $0x80] sm:$0xff] }
  0x24   : > { %662 = vmatprep.subr.bf16.mxu0 %v1268_v2  ;;  %1229 = vmatprep.subr.bf16.mxu1 %v1268_v2  ;;  %v399_v62 = vadd.f32 %v1366_v35, %v323_v47  ;;  %v326_v63 = vmul.f32 %v1335_v11, %v250_v52  ;;  %v328_v0 = vmul.f32 %v1335_v11, %v252_v53  ;;  %v462_v1 = vmax.f32 %v398_v50, 0.0 }
  0x25   : > { %v464_v3 = vmax.f32 %v400_v51, 0.0  ;;  %v503_v6 = vpack.c.bf16 %v459_v54, %v457_v49  ;;  %v372_v8 = vadd.f32 %v1342_v16, %v296_v57  ;;  %v490_v13 = vpack.c.bf16 %v432_v58, %v430_v55  ;;  %v226_v49 = vld [vmem:[%s1323_s27 + $0xa8] sm:$0xff]  ;;  %v228_v54 = vld [vmem:[%s1323_s27 + $0xb8] sm:$0xff] }
  0x26   : > { %v429_v14 = vmax.f32 %v365_v59, 0.0  ;;  %v431_v15 = vmax.f32 %v367_v60, 0.0  ;;  %v461_v17 = vmax.f32 %v397_v61, 0.0  ;;  %v463_v20 = vmax.f32 %v399_v62, 0.0  ;;  %v258_v59 = vld [vmem:[%s1323_s27 + $0x1a8] sm:$0xff] }
  0x27   : > { %663 = vmatpush1.bf16.msra.mxu0 %v1258_v7  ;;  %1239 = vmatpush1.bf16.msra.mxu1 %v1258_v7  ;;  %v370_v7 = vadd.f32 %v1342_v16, %v294_v56  ;;  %v402_v21 = vadd.f32 %v1342_v16, %v326_v63  ;;  %v404_v22 = vadd.f32 %v1342_v16, %v328_v0  ;;  %v436_v32 = vmax.f32 %v372_v8, 0.0 }
  0x28   : > { %664 = vmatprep.subr.bf16.mxu0 %v1268_v2  ;;  %1230 = vmatprep.subr.bf16.mxu1 %v1268_v2  ;;  %v427_v2 = vmax.f32 %v363_v24, 0.0  ;;  %v293_v23 = vmul.f32 %v1356_v25, %v217_v4  ;;  %v254_v24 = vld [vmem:[%s1323_s27 + $0x188] sm:$0xff]  ;;  %v506_v27 = vpack.c.bf16 %v464_v3, %v462_v1  ;;  %v295_v28 = vmul.f32 %v1356_v25, %v219_v9 }
  0x29   : > { %v327_v30 = vmul.f32 %v1356_v25, %v251_v12  ;;  %v434_v31 = vmax.f32 %v370_v7, 0.0  ;;  %v300_v34 = vmul.f32 %v1335_v11, %v224_v19  ;;  %v330_v37 = vmul.f32 %v1335_v11, %v254_v24  ;;  %v234_v19 = vld [vmem:[%s1323_s27 + $0xe8] sm:$0xff] }
  0x2a   : > { %v487_v5 = vpack.c.bf16 %v427_v2, %v425_v46  ;;  %v332_v38 = vmul.f32 %v1335_v11, %v256_v26  ;;  %v505_v40 = vpack.c.bf16 %v463_v20, %v461_v17  ;;  %v466_v41 = vmax.f32 %v402_v21, 0.0 }
  0x2b   : > { %665 = vmatpush1.bf16.msra.mxu0 %v1259_v29  ;;  %1240 = vmatpush1.bf16.msra.mxu1 %v1259_v29  ;;  %v325_v29 = vmul.f32 %v1356_v25, %v249_v10  ;;  %v468_v42 = vmax.f32 %v404_v22, 0.0  ;;  %v369_v43 = vadd.f32 %v1366_v35, %v293_v23  ;;  %v371_v46 = vadd.f32 %v1366_v35, %v295_v28  ;;  %v236_v22 = vld [vmem:[%s1323_s27 + $0xf8] sm:$0xff]  ;;  %v225_v28 = vld [vmem:[%s1323_s27 + $0xa0] sm:$0xff] }
  0x2c   : > { %v403_v47 = vadd.f32 %v1366_v35, %v327_v30  ;;  %v492_v50 = vpack.c.bf16 %v436_v32, %v434_v31  ;;  %v376_v52 = vadd.f32 %v1342_v16, %v300_v34  ;;  %v297_v53 = vmul.f32 %v1356_v25, %v221_v39 }
  0x2d   : > { %v401_v2 = vadd.f32 %v1366_v35, %v325_v29  ;;  %v406_v55 = vadd.f32 %v1342_v16, %v330_v37  ;;  %v408_v56 = vadd.f32 %v1342_v16, %v332_v38  ;;  %v299_v57 = vmul.f32 %v1356_v25, %v223_v44  ;;  %v266_v29 = vld [vmem:[%s1323_s27 + $0x1e8] sm:$0xff] }
  0x2e   : > { %679 = vmatmul.mubr.bf16.vlgmr.msra.gmra.mrb[0].mxu0 %v485_v18  ;;  %743 = vmatmul.mubr.bf16.vlgmr.msra.gmra.mrb[0].mxu1 %v501_v36  ;;  %v222_v18 = vld [vmem:[%s1323_s27 + $0x88] sm:$0xff]  ;;  %v489_v36 = vpack.c.bf16 %v431_v15, %v429_v14  ;;  %v508_v60 = vpack.c.bf16 %v468_v42, %v466_v41  ;;  %v433_v61 = vmax.f32 %v369_v43, 0.0  ;;  %v302_v63 = vmul.f32 %v1335_v11, %v226_v49  ;;  %v259_v41 = vld [vmem:[%s1323_s27 + $0x1b0] sm:$0xff]  ;;  %v232_v49 = vld [vmem:[%s1323_s27 + $0xd8] sm:$0xff] }
  0x2f   : > { %1044 = vmatprep.mubr.msk.bf16.mxu0 %vm597_vm0, %v488_v45  ;;  %1052 = vmatprep.mubr.msk.bf16.mxu1 %vm597_vm0, %v504_v48  ;;  %v298_v33 = vmul.f32 %v1335_v11, %v222_v18  ;;  %v253_v45 = vld [vmem:[%s1323_s27 + $0x180] sm:$0xff]  ;;  %v255_v48 = vld [vmem:[%s1323_s27 + $0x190] sm:$0xff]  ;;  %v435_v0 = vmax.f32 %v371_v46, 0.0  ;;  %v465_v1 = vmax.f32 %v401_v2, 0.0  ;;  %v467_v3 = vmax.f32 %v403_v47, 0.0 }
  0x30   : > { %v329_v58 = vmul.f32 %v1356_v25, %v253_v45  ;;  %v331_v62 = vmul.f32 %v1356_v25, %v255_v48  ;;  %v304_v4 = vmul.f32 %v1335_v11, %v228_v54  ;;  %v440_v7 = vmax.f32 %v376_v52, 0.0  ;;  %v230_v45 = vld [vmem:[%s1323_s27 + $0xc8] sm:$0xff] }
  0x31   : > { %v374_v51 = vadd.f32 %v1342_v16, %v298_v33  ;;  %v1503_v8 = vadd.f32 %v1366_v35, %v297_v53  ;;  %v334_v9 = vmul.f32 %v1335_v11, %v258_v59  ;;  %v470_v10 = vmax.f32 %v406_v55, 0.0  ;;  %v227_v33 = vld [vmem:[%s1323_s27 + $0xb0] sm:$0xff] }
  0x32   : > { %v472_v12 = vmax.f32 %v408_v56, 0.0  ;;  %v405_v14 = vadd.f32 %v1366_v35, %v329_v58  ;;  %v407_v15 = vadd.f32 %v1366_v35, %v331_v62  ;;  %v378_v17 = vadd.f32 %v1342_v16, %v302_v63 }
  0x33   : > { %v491_v20 = vpack.c.bf16 %v435_v0, %v433_v61  ;;  %v380_v21 = vadd.f32 %v1342_v16, %v304_v4  ;;  %v507_v23 = vpack.c.bf16 %v467_v3, %v465_v1  ;;  %v437_v26 = vmax.f32 %v1503_v8, 0.0 }
  0x34   : > { %v510_v30 = vpack.c.bf16 %v472_v12, %v470_v10  ;;  %v469_v32 = vmax.f32 %v405_v14, 0.0  ;;  %v310_v34 = vmul.f32 %v1335_v11, %v234_v19  ;;  %v471_v37 = vmax.f32 %v407_v15, 0.0  ;;  %v229_v10 = vld [vmem:[%s1323_s27 + $0xc0] sm:$0xff]  ;;  %v231_v15 = vld [vmem:[%s1323_s27 + $0xd0] sm:$0xff] }
  0x35   : > { %v442_v38 = vmax.f32 %v378_v17, 0.0  ;;  %v312_v42 = vmul.f32 %v1335_v11, %v236_v22  ;;  %v444_v43 = vmax.f32 %v380_v21, 0.0  ;;  %v301_v44 = vmul.f32 %v1356_v25, %v225_v28  ;;  %v261_v17 = vld [vmem:[%s1323_s27 + $0x1c0] sm:$0xff] }
  0x36   : > { %687 = vmatmul.mubr.bf16.gmra.mrb[4].mxu0 %v487_v5  ;;  %751 = vmatmul.mubr.bf16.gmra.mrb[4].mxu1 %v503_v6  ;;  %v260_v5 = vld [vmem:[%s1323_s27 + $0x1b8] sm:$0xff]  ;;  %v438_v6 = vmax.f32 %v374_v51, 0.0  ;;  %v386_v46 = vadd.f32 %v1342_v16, %v310_v34  ;;  %v342_v2 = vmul.f32 %v1335_v11, %v266_v29  ;;  %v303_v48 = vmul.f32 %v1356_v25, %v227_v33 }
  0x37   : > { %1045 = vmatprep.mubr.msk.bf16.mxu0 %vm597_vm0, %v490_v13  ;;  %1053 = vmatprep.mubr.msk.bf16.mxu1 %vm597_vm0, %v506_v27  ;;  %v375_v13 = vadd.f32 %v1366_v35, %v299_v57  ;;  %v336_v18 = vmul.f32 %v1335_v11, %v260_v5  ;;  %v410_v27 = vadd.f32 %v1342_v16, %v334_v9  ;;  %v264_v51 = vld [vmem:[%s1323_s27 + $0x1d8] sm:$0xff] }
  0x38   : > { %v494_v24 = vpack.c.bf16 %v440_v7, %v438_v6  ;;  %v388_v52 = vadd.f32 %v1342_v16, %v312_v42  ;;  %v335_v55 = vmul.f32 %v1356_v25, %v259_v41  ;;  %v450_v56 = vmax.f32 %v386_v46, 0.0  ;;  %v233_v42 = vld [vmem:[%s1323_s27 + $0xe0] sm:$0xff] }
  0x39   : > { %v439_v31 = vmax.f32 %v375_v13, 0.0  ;;  %v412_v39 = vadd.f32 %v1342_v16, %v336_v18  ;;  %v474_v47 = vmax.f32 %v410_v27, 0.0  ;;  %v418_v57 = vadd.f32 %v1342_v16, %v342_v2  ;;  %v265_v46 = vld [vmem:[%s1323_s27 + $0x1e0] sm:$0xff]  ;;  %v267_v2 = vld [vmem:[%s1323_s27 + $0x1f0] sm:$0xff] }
  0x3a   : > { %v306_v59 = vmul.f32 %v1335_v11, %v230_v45  ;;  %v308_v62 = vmul.f32 %v1335_v11, %v232_v49  ;;  %v340_v0 = vmul.f32 %v1335_v11, %v264_v51  ;;  %v509_v6 = vpack.c.bf16 %v471_v37, %v469_v32  ;;  %v235_v45 = vld [vmem:[%s1323_s27 + $0xf0] sm:$0xff] }
  0x3b   : > { %v476_v58 = vmax.f32 %v412_v39, 0.0  ;;  %v482_v1 = vmax.f32 %v418_v57, 0.0  ;;  %v493_v3 = vpack.c.bf16 %v439_v31, %v437_v26  ;;  %v496_v7 = vpack.c.bf16 %v444_v43, %v442_v38 }
  0x3c   : > { %v377_v8 = vadd.f32 %v1366_v35, %v301_v44  ;;  %v379_v9 = vadd.f32 %v1366_v35, %v303_v48  ;;  %v411_v14 = vadd.f32 %v1366_v35, %v335_v55  ;;  %v382_v19 = vadd.f32 %v1342_v16, %v306_v59 }
  0x3d   : > { %v512_v12 = vpack.c.bf16 %v476_v58, %v474_v47  ;;  %v416_v22 = vadd.f32 %v1342_v16, %v340_v0  ;;  %v337_v26 = vmul.f32 %v1356_v25, %v261_v17  ;;  %v309_v51 = vmul.f32 %v1356_v25, %v233_v42 }
  0x3e   : > { %695 = vmatmul.mubr.bf16.gmra.mrb[8].mxu0 %v489_v36  ;;  %759 = vmatmul.mubr.bf16.gmra.mrb[8].mxu1 %v505_v40  ;;  %v268_v36 = vld [vmem:[%s1323_s27 + $0x1f8] sm:$0xff]  ;;  %v257_v40 = vld [vmem:[%s1323_s27 + $0x1a0] sm:$0xff]  ;;  %v441_v28 = vmax.f32 %v377_v8, 0.0  ;;  %v443_v29 = vmax.f32 %v379_v9, 0.0  ;;  %v475_v31 = vmax.f32 %v411_v14, 0.0 }
  0x3f   : > { %1046 = vmatprep.mubr.msk.bf16.mxu0 %vm597_vm0, %v492_v50  ;;  %1054 = vmatprep.mubr.msk.bf16.mxu1 %vm597_vm0, %v508_v60  ;;  %v262_v50 = vld [vmem:[%s1323_s27 + $0x1c8] sm:$0xff]  ;;  %v344_v53 = vmul.f32 %v1335_v11, %v268_v36  ;;  %v333_v54 = vmul.f32 %v1356_v25, %v257_v40  ;;  %v452_v60 = vmax.f32 %v388_v52, 0.0  ;;  %v480_v34 = vmax.f32 %v416_v22, 0.0 }
  0x40   : > { %v338_v63 = vmul.f32 %v1335_v11, %v262_v50  ;;  %v263_v11 = vld [vmem:[%s1323_s27 + $0x1d0] sm:$0xff]  ;;  %v413_v38 = vadd.f32 %v1366_v35, %v337_v26  ;;  %v495_v40 = vpack.c.bf16 %v443_v29, %v441_v28  ;;  %v311_v52 = vmul.f32 %v1356_v25, %v235_v45 }
  0x41   : > { %v420_v61 = vadd.f32 %v1342_v16, %v344_v53  ;;  %v1547_v4 = vpack.c.bf16 %v452_v60, %v450_v56  ;;  %v409_v13 = vadd.f32 %v1366_v35, %v333_v54  ;;  %v339_v27 = vmul.f32 %v1356_v25, %v263_v11 }
  0x42   : > { %v414_v21 = vadd.f32 %v1342_v16, %v338_v63  ;;  %v477_v49 = vmax.f32 %v413_v38, 0.0  ;;  %v341_v53 = vmul.f32 %v1356_v25, %v265_v46  ;;  %v343_v54 = vmul.f32 %v1356_v25, %v267_v2 }
  0x43   : > { %v484_v5 = vmax.f32 %v420_v61, 0.0  ;;  %v415_v39 = vadd.f32 %v1366_v35, %v339_v27  ;;  %v385_v57 = vadd.f32 %v1366_v35, %v309_v51  ;;  %v387_v58 = vadd.f32 %v1366_v35, %v311_v52 }
  0x44   : > { %v478_v33 = vmax.f32 %v414_v21, 0.0  ;;  %v417_v59 = vadd.f32 %v1366_v35, %v341_v53  ;;  %v419_v60 = vadd.f32 %v1366_v35, %v343_v54 }
  0x45   : > { %v516_v18 = vpack.c.bf16 %v484_v5, %v482_v1  ;;  %v479_v50 = vmax.f32 %v415_v39, 0.0  ;;  %v449_v61 = vmax.f32 %v385_v57, 0.0 }
  0x46   : > { %703 = vmatmul.mubr.bf16.gmra.mrb[12].mxu0 %v491_v20  ;;  %767 = vmatmul.mubr.bf16.gmra.mrb[12].mxu1 %v507_v23  ;;  %v384_v20 = vadd.f32 %v1342_v16, %v308_v62  ;;  %v305_v23 = vmul.f32 %v1356_v25, %v229_v10  ;;  %v446_v16 = vmax.f32 %v382_v19, 0.0  ;;  %v514_v44 = vpack.c.bf16 %v480_v34, %v478_v33 }
  0x47   : > { %1047 = vmatprep.mubr.msk.bf16.mxu0 %vm597_vm0, %v494_v24  ;;  %1055 = vmatprep.mubr.msk.bf16.mxu1 %vm597_vm0, %v510_v30  ;;  %v307_v24 = vmul.f32 %v1356_v25, %v231_v15  ;;  %v473_v30 = vmax.f32 %v409_v13, 0.0  ;;  %v513_v56 = vpack.c.bf16 %v479_v50, %v477_v49  ;;  %v451_v62 = vmax.f32 %v387_v58, 0.0 }
  0x48   : > { %v448_v32 = vmax.f32 %v384_v20, 0.0  ;;  %v381_v36 = vadd.f32 %v1366_v35, %v305_v23  ;;  %v481_v25 = vmax.f32 %v417_v59, 0.0  ;;  %v483_v63 = vmax.f32 %v419_v60, 0.0 }
  0x49   : > { %v383_v37 = vadd.f32 %v1366_v35, %v307_v24  ;;  %v511_v41 = vpack.c.bf16 %v475_v31, %v473_v30  ;;  %v499_v0 = vpack.c.bf16 %v451_v62, %v449_v61 }
  0x4a   : > { %v498_v43 = vpack.c.bf16 %v448_v32, %v446_v16  ;;  %v445_v47 = vmax.f32 %v381_v36, 0.0  ;;  %v515_v1 = vpack.c.bf16 %v483_v63, %v481_v25 }
  0x4b   : > { %v447_v48 = vmax.f32 %v383_v37, 0.0 }
  0x4d   : > { %v497_v55 = vpack.c.bf16 %v447_v48, %v445_v47 }
  0x4e   : > { %711 = vmatmul.mubr.bf16.gmra.mrb[16].mxu0 %v493_v3  ;;  %775 = vmatmul.mubr.bf16.gmra.mrb[16].mxu1 %v509_v6 }
  0x4f   : > { %1048 = vmatprep.mubr.msk.bf16.mxu0 %vm597_vm0, %v496_v7  ;;  %1056 = vmatprep.mubr.msk.bf16.mxu1 %vm597_vm0, %v512_v12 }
  0x56   : > { %719 = vmatmul.mubr.bf16.gmra.mrb[20].mxu0 %v495_v40  ;;  %783 = vmatmul.mubr.bf16.gmra.mrb[20].mxu1 %v511_v41 }
  0x57   : > { %1049 = vmatprep.mubr.msk.bf16.mxu0 %vm597_vm0, %v498_v43  ;;  %1057 = vmatprep.mubr.msk.bf16.mxu1 %vm597_vm0, %v514_v44 }
  0x5e   : > { %727 = vmatmul.mubr.bf16.gmra.mrb[24].mxu0 %v497_v55  ;;  %791 = vmatmul.mubr.bf16.gmra.mrb[24].mxu1 %v513_v56 }
  0x5f   : > { %1050 = vmatprep.mubr.msk.bf16.mxu0 %vm597_vm0, %v1547_v4  ;;  %1058 = vmatprep.mubr.msk.bf16.mxu1 %vm597_vm0, %v516_v18 }
  0x66   : > { %735 = vmatmul.mubr.bf16.gmra.mrb[28].mxu0 %v499_v0  ;;  %799 = vmatmul.mubr.bf16.gmra.mrb[28].mxu1 %v515_v1 }
 0x101   : > { %v680_v3 = vpop.f32.mrb[0].mxu0  ;;  %v744_v5 = vpop.f32.mrb[0].mxu1 }
 0x102   : > { %v682_v6 = vpop.f32.mrb[1].mxu0  ;;  %v746_v35 = vpop.f32.mrb[1].mxu1 }
 0x103   : > { %v683_v7 = vpop.f32.mrb[2].mxu0  ;;  %v747_v4 = vpop.f32.mrb[2].mxu1 }
 0x104   : > { %v1129_v8 = vpack.c.bf16 %v683_v7, %v680_v3  ;;  %v1169_v9 = vpack.c.bf16 %v747_v4, %v744_v5  ;;  %v685_v10 = vpop.f32.mrb[3].mxu0  ;;  %v749_v12 = vpop.f32.mrb[3].mxu1 }
 0x106   : > { %1130 = vst [vmem:[%s1592_s25] sm:$0xff] %v1129_v8   ;;  %1213 = vst [vmem:[%s1592_s25 + $0x40] sm:$0xff] %v1169_v9  }
 0x109   : > { %v688_v13 = vpop.f32.mrb[4].mxu0  ;;  %v752_v14 = vpop.f32.mrb[4].mxu1 }
 0x10a   : > { %v690_v15 = vpop.f32.mrb[5].mxu0  ;;  %v754_v17 = vpop.f32.mrb[5].mxu1 }
 0x10b   : > { %v691_v11 = vpop.f32.mrb[6].mxu0  ;;  %v755_v18 = vpop.f32.mrb[6].mxu1 }
 0x10c   : > { %v1134_v19 = vpack.c.bf16 %v691_v11, %v688_v13  ;;  %v1174_v20 = vpack.c.bf16 %v755_v18, %v752_v14  ;;  %v693_v21 = vpop.f32.mrb[7].mxu0  ;;  %v757_v22 = vpop.f32.mrb[7].mxu1 }
 0x10e   : > { %1206 = vst [vmem:[%s1592_s25 + $0x8] sm:$0xff] %v1134_v19   ;;  %1214 = vst [vmem:[%s1592_s25 + $0x48] sm:$0xff] %v1174_v20  }
 0x111   : > { %v696_v23 = vpop.f32.mrb[8].mxu0  ;;  %v760_v24 = vpop.f32.mrb[8].mxu1 }
 0x112   : > { %v698_v26 = vpop.f32.mrb[9].mxu0  ;;  %v762_v27 = vpop.f32.mrb[9].mxu1 }
 0x113   : > { %v699_v28 = vpop.f32.mrb[10].mxu0  ;;  %v763_v29 = vpop.f32.mrb[10].mxu1 }
 0x114   : > { %v1139_v30 = vpack.c.bf16 %v699_v28, %v696_v23  ;;  %v1179_v31 = vpack.c.bf16 %v763_v29, %v760_v24  ;;  %v701_v16 = vpop.f32.mrb[11].mxu0  ;;  %v765_v32 = vpop.f32.mrb[11].mxu1 }
 0x116   : > { %1207 = vst [vmem:[%s1592_s25 + $0x10] sm:$0xff] %v1139_v30   ;;  %1215 = vst [vmem:[%s1592_s25 + $0x50] sm:$0xff] %v1179_v31  }
 0x119   : > { %v704_v33 = vpop.f32.mrb[12].mxu0  ;;  %v768_v34 = vpop.f32.mrb[12].mxu1 }
 0x11a   : > { %v706_v36 = vpop.f32.mrb[13].mxu0  ;;  %v770_v37 = vpop.f32.mrb[13].mxu1 }
 0x11b   : > { %v707_v38 = vpop.f32.mrb[14].mxu0  ;;  %v771_v39 = vpop.f32.mrb[14].mxu1 }
 0x11c   : > { %v1144_v40 = vpack.c.bf16 %v707_v38, %v704_v33  ;;  %v1184_v41 = vpack.c.bf16 %v771_v39, %v768_v34  ;;  %v709_v42 = vpop.f32.mrb[15].mxu0  ;;  %v773_v43 = vpop.f32.mrb[15].mxu1 }
 0x11e   : > { %1208 = vst [vmem:[%s1592_s25 + $0x18] sm:$0xff] %v1144_v40   ;;  %1216 = vst [vmem:[%s1592_s25 + $0x58] sm:$0xff] %v1184_v41  }
 0x121   : > { %v712_v44 = vpop.f32.mrb[16].mxu0  ;;  %v776_v45 = vpop.f32.mrb[16].mxu1 }
 0x122   : > { %v714_v46 = vpop.f32.mrb[17].mxu0  ;;  %v778_v2 = vpop.f32.mrb[17].mxu1 }
 0x123   : > { %v715_v47 = vpop.f32.mrb[18].mxu0  ;;  %v779_v48 = vpop.f32.mrb[18].mxu1 }
 0x124   : > { %v1149_v49 = vpack.c.bf16 %v715_v47, %v712_v44  ;;  %v1189_v50 = vpack.c.bf16 %v779_v48, %v776_v45  ;;  %v717_v51 = vpop.f32.mrb[19].mxu0  ;;  %v781_v52 = vpop.f32.mrb[19].mxu1 }
 0x126   : > { %1209 = vst [vmem:[%s1592_s25 + $0x20] sm:$0xff] %v1149_v49   ;;  %1217 = vst [vmem:[%s1592_s25 + $0x60] sm:$0xff] %v1189_v50  }
 0x129   : > { %v720_v53 = vpop.f32.mrb[20].mxu0  ;;  %v784_v54 = vpop.f32.mrb[20].mxu1 }
 0x12a   : > { %v722_v55 = vpop.f32.mrb[21].mxu0  ;;  %v786_v56 = vpop.f32.mrb[21].mxu1 }
 0x12b   : > { %v723_v57 = vpop.f32.mrb[22].mxu0  ;;  %v787_v58 = vpop.f32.mrb[22].mxu1 }
 0x12c   : > { %v1154_v59 = vpack.c.bf16 %v723_v57, %v720_v53  ;;  %v1194_v60 = vpack.c.bf16 %v787_v58, %v784_v54  ;;  %v725_v61 = vpop.f32.mrb[23].mxu0  ;;  %v789_v62 = vpop.f32.mrb[23].mxu1 }
 0x12e   : > { %1210 = vst [vmem:[%s1592_s25 + $0x28] sm:$0xff] %v1154_v59   ;;  %1218 = vst [vmem:[%s1592_s25 + $0x68] sm:$0xff] %v1194_v60  }
 0x131   : > { %v728_v25 = vpop.f32.mrb[24].mxu0  ;;  %v792_v63 = vpop.f32.mrb[24].mxu1 }
 0x132   : > { %v730_v0 = vpop.f32.mrb[25].mxu0  ;;  %v794_v1 = vpop.f32.mrb[25].mxu1 }
 0x133   : > { %v731_v3 = vpop.f32.mrb[26].mxu0  ;;  %v795_v5 = vpop.f32.mrb[26].mxu1 }
 0x134   : > { %v1159_v6 = vpack.c.bf16 %v731_v3, %v728_v25  ;;  %v1199_v35 = vpack.c.bf16 %v795_v5, %v792_v63  ;;  %v733_v7 = vpop.f32.mrb[27].mxu0  ;;  %v797_v4 = vpop.f32.mrb[27].mxu1 }
 0x136   : > { %1211 = vst [vmem:[%s1592_s25 + $0x30] sm:$0xff] %v1159_v6   ;;  %1219 = vst [vmem:[%s1592_s25 + $0x70] sm:$0xff] %v1199_v35  }
 0x139   : > { %v736_v8 = vpop.f32.mrb[28].mxu0  ;;  %v800_v9 = vpop.f32.mrb[28].mxu1 }
 0x13a   : > { %v738_v10 = vpop.f32.mrb[29].mxu0  ;;  %v802_v12 = vpop.f32.mrb[29].mxu1 }
 0x13b   : > { %v739_v13 = vpop.f32.mrb[30].mxu0  ;;  %v803_v14 = vpop.f32.mrb[30].mxu1 }
 0x13c   : > { %v1164_v15 = vpack.c.bf16 %v739_v13, %v736_v8  ;;  %v1204_v17 = vpack.c.bf16 %v803_v14, %v800_v9  ;;  %v741_v11 = vpop.f32.mrb[31].mxu0  ;;  %v805_v18 = vpop.f32.mrb[31].mxu1 }
 0x13e   : > { %1212 = vst [vmem:[%s1592_s25 + $0x38] sm:$0xff] %v1164_v15   ;;  %1220 = vst [vmem:[%s1592_s25 + $0x78] sm:$0xff] %v1204_v17  }
 0x13f PF: > { %s14_s15 = sadd.s32 1, %s1266_s15  }
 0x140   : > { %p11_p4 = scmp.ge.s32.totalorder %s14_s15, 4  }
 0x142   :  { %13 = sbr.rel (!%p11_p4) target bundleno = 1 (0x1), region = 66 }

</bundles_post_ra>
